<compile_context>
chip_gen: v5e
topology: v5e:2x2
jax: 0.10.0
libtpu: 0.0.40
codegen_flags: <defaults>
</compile_context>

<pallas_src>
import math

import jax
import jax.numpy as jnp
from jax.experimental import pallas as pl
from jax.experimental.pallas import tpu as pltpu

# ----------------------------- small test config -----------------------------
PAST_NFRAME, CUR_NFRAME, FUT_NFRAME = 2, 8, 2
T_TOTAL = PAST_NFRAME + CUR_NFRAME + FUT_NFRAME     # 12
B = 2
POSE_DIM = 69
MODEL_DIM = 32
NHEAD = 4
HEAD_DIM = MODEL_DIM // NHEAD
FF_DIM = 64
NLAYER = 2
NZ = 8
S_MEM = T_TOTAL                                     # context (memory) length
L_TOK = CUR_NFRAME + 2                              # mu + logvar tokens + frames
BL = B * L_TOK                                      # stacked query rows
BS = B * S_MEM                                      # stacked memory rows
LN_EPS = 1e-5
NEG = -1e9

# ----- row offsets into the bf16 weight slab (bf16 tile = (16,128) aligned) -----
W_INFC = 0                          # in_fc_w               (69, 32)
W_ATTN = 96                         # 4 x [wq|wk|wv|wo]     (32, 128) each
W_FFN1 = 224                        # 2 x ffn w1            (32, 64)
W_FFN2 = 288                        # 2 x ffn w2            (64, 32)
W_HEAD = 416                        # [mu_w | logvar_w]     (32, 16)
RW = 448

# ----- row offsets into the f32 parameter slab (f32 tile = (8,128) aligned) -----
P_TOKPE = 0                         # tokens+PE(+in_fc bias), tiled over batch (BL, 32)
P_ATTB = 24                         # 4 x [bq|bk|bv|bo]     (1, 128) each
P_FFNB1 = 32                        # 2 x ffn b1            (1, 64)
P_FFNB2 = 40                        # 2 x ffn b2            (1, 32)
P_LN = 48                           # per layer 6 rows [g1,b1,g2,b2,g3,b3], stride 8
P_HEADB = 64                        # [mu_b | logvar_b]     (1, 16)
P_SELF = 72                         # block-diag self-attn bias  (BL, BL)
P_CROSS = 96                        # block-diag cross-attn bias (BL, BS)
RP = 120


# ------------------------------ the fused kernel ------------------------------
def _encoder_kernel(pose_ref, mem_ref, maskf_ref, eps_ref, w_ref, p_ref, out_ref):
    """Whole forward (both batch elements, sublane-stacked) in one grid step."""
    D = MODEL_DIM
    scale = 1.0 / math.sqrt(HEAD_DIM)

    def mmw(a, w):
        # bf16 MXU inputs, f32 accumulation.
        return jnp.dot(a.astype(jnp.bfloat16), w, preferred_element_type=jnp.float32)

    # Constant tables from the single f32 parameter slab.
    tok_pe = p_ref[P_TOKPE:P_TOKPE + BL, 0:D]                         # (BL, D)
    self_bias = p_ref[P_SELF:P_SELF + BL, 0:BL]                       # (BL, BL)
    cross_bias = (p_ref[P_CROSS:P_CROSS + BL, 0:BS]
                  + maskf_ref[...] * NEG)                             # (BL, BS)

    # in_fc + [mu_token, logvar_token] prepend + positional encoding.
    # pose rows b*L_TOK+{0,1} are zero (token slots); tok_pe already holds
    # tokens + PE (token rows) and PE + in_fc bias (frame rows), tiled over B.
    x = mmw(pose_ref[...], w_ref[W_INFC:W_INFC + POSE_DIM, 0:D]) + tok_pe  # (BL, D)
    mem = mem_ref[...]                                                # (BS, D)

    def layernorm(y, g, b):
        mean = jnp.mean(y, axis=-1, keepdims=True)
        c = y - mean
        var = jnp.mean(c * c, axis=-1, keepdims=True)
        return c * jax.lax.rsqrt(var + LN_EPS) * g + b

    def mha(x_q, x_kv, a_idx, bias):
        w = w_ref[W_ATTN + 32 * a_idx:W_ATTN + 32 * (a_idx + 1), :]   # (32,128) bf16
        b = p_ref[P_ATTB + a_idx:P_ATTB + a_idx + 1, :]               # (1,128) f32
        if x_q is x_kv:
            # self-attention: one fused (Lq,32)@(32,96) projection
            qkv = mmw(x_q, w[:, 0:3 * D]) + b[:, 0:3 * D]
            q, k, v = qkv[:, 0:D], qkv[:, D:2 * D], qkv[:, 2 * D:3 * D]
        else:
            # cross-attention: q from queries, fused KV from memory
            q = mmw(x_q, w[:, 0:D]) + b[:, 0:D]
            kv = mmw(x_kv, w[:, D:3 * D]) + b[:, D:3 * D]
            k, v = kv[:, 0:D], kv[:, D:2 * D]
        heads = []
        for h in range(NHEAD):
            sl = slice(h * HEAD_DIM, (h + 1) * HEAD_DIM)
            s = jnp.dot(q[:, sl], k[:, sl].T,
                        preferred_element_type=jnp.float32) * scale   # (Lq, Lk)
            s = s + bias
            m = jnp.max(s, axis=-1, keepdims=True)
            p = jnp.exp(s - m)
            p = p * pl.reciprocal(jnp.sum(p, axis=-1, keepdims=True), approx=True)
            heads.append(jnp.dot(p, v[:, sl],
                                 preferred_element_type=jnp.float32))  # (Lq, hd)
        o = jnp.concatenate(heads, axis=-1)                           # (Lq, D)
        return mmw(o, w[:, 3 * D:4 * D]) + b[:, 3 * D:4 * D]

    # nn.TransformerDecoder (post-norm), statically unrolled layers.
    for layer in range(NLAYER):
        ln = p_ref[P_LN + 8 * layer:P_LN + 8 * layer + 6, 0:D]        # (6, D)
        sa = mha(x, x, 2 * layer, self_bias)                          # self-attn
        x = layernorm(x + sa, ln[0:1, :], ln[1:2, :])
        ca = mha(x, mem, 2 * layer + 1, cross_bias)                   # cross-attn
        x = layernorm(x + ca, ln[2:3, :], ln[3:4, :])
        w1 = w_ref[W_FFN1 + 32 * layer:W_FFN1 + 32 * (layer + 1), 0:FF_DIM]
        b1 = p_ref[P_FFNB1 + layer:P_FFNB1 + layer + 1, 0:FF_DIM]
        w2 = w_ref[W_FFN2 + 64 * layer:W_FFN2 + 64 * (layer + 1), 0:D]
        b2 = p_ref[P_FFNB2 + layer:P_FFNB2 + layer + 1, 0:D]
        h1 = jnp.maximum(mmw(x, w1) + b1, 0.0)                        # ReLU
        ff = mmw(h1, w2) + b2
        x = layernorm(x + ff, ln[4:5, :], ln[5:6, :])

    # mu / logvar heads (packed) + Normal.rsample, one lane-dense store.
    head_w = w_ref[W_HEAD:W_HEAD + D, 0:2 * NZ]                       # (32, 16)
    head_b = p_ref[P_HEADB:P_HEADB + 1, 0:2 * NZ]                     # (1, 16)
    xt = jnp.concatenate([x[b * L_TOK:b * L_TOK + 2, :] for b in range(B)], axis=0)
    ho = mmw(xt, head_w) + head_b                                     # (2B, 2*NZ)
    mu = jnp.concatenate([ho[2 * b:2 * b + 1, 0:NZ] for b in range(B)], axis=0)
    logvar = jnp.concatenate([ho[2 * b + 1:2 * b + 2, NZ:2 * NZ] for b in range(B)],
                             axis=0)
    samp = mu + jnp.exp(0.5 * logvar) * eps_ref[...]
    out_ref[...] = jnp.concatenate([mu, logvar, samp], axis=-1).astype(out_ref.dtype)


# ------------------------------ forward wrapper -------------------------------
def data_encoder_forward(packed, data, sample_key):
    # x_in = body_pose_tp[past_nframe:-fut_nframe]   (time-major (T, B, 69))
    pose = data['body_pose_tp'][PAST_NFRAME:PAST_NFRAME + CUR_NFRAME]  # (Lx, B, 69)
    pose = jnp.transpose(pose, (1, 0, 2))                              # (B, Lx, 69)
    # two zero rows per batch = slots for mu/logvar tokens (added via tok_pe)
    pose = jnp.pad(pose, ((0, 0), (2, 0), (0, 0))).reshape(BL, POSE_DIM)
    memory = jnp.transpose(data['context'], (1, 0, 2)).reshape(BS, MODEL_DIM)
    # memory_key_padding_mask: True -> ignore key (bias applied in-kernel)
    maskf = data['vis_frame_mask'].astype(jnp.float32).reshape(1, BS)
    eps = jax.random.normal(sample_key, (B, NZ), jnp.float32)

    out = pl.pallas_call(
        _encoder_kernel,
        out_shape=jax.ShapeDtypeStruct((B, 3 * NZ), jnp.float32),
        grid=(1,),
        in_specs=[
            pl.BlockSpec((BL, POSE_DIM), lambda i: (0, 0)),
            pl.BlockSpec((BS, MODEL_DIM), lambda i: (0, 0)),
            pl.BlockSpec((1, BS), lambda i: (0, 0)),
            pl.BlockSpec((B, NZ), lambda i: (0, 0)),
            pl.BlockSpec((RW, 128), lambda i: (0, 0)),
            pl.BlockSpec((RP, 128), lambda i: (0, 0)),
        ],
        out_specs=pl.BlockSpec((B, 3 * NZ), lambda i: (0, 0)),
        compiler_params=pltpu.CompilerParams(
            dimension_semantics=("arbitrary",)),
    )(pose, memory, maskf, eps, packed['wslab'], packed['pslab'])

    mu = out[:, 0:NZ]
    logvar = out[:, NZ:2 * NZ]
    q_z_samp = out[:, 2 * NZ:3 * NZ]
    return mu, logvar, q_z_samp


# ----------------------------- deterministic init -----------------------------
def sinusoidal_pe(length, dim):
    # TODO(synk): the source of the module's custom PositionalEncoding class is
    # not provided; standard additive sinusoidal PE is used as its stand-in.
    pos = jnp.arange(length, dtype=jnp.float32)[:, None]
    i = jnp.arange(dim // 2, dtype=jnp.float32)[None, :]
    freq = jnp.exp(-math.log(10000.0) * (2.0 * i / dim))
    ang = pos * freq
    pe = jnp.zeros((length, dim), jnp.float32)
    pe = pe.at[:, 0::2].set(jnp.sin(ang))
    pe = pe.at[:, 1::2].set(jnp.cos(ang))
    return pe


def init_packed_params(key):
    """Builds the weight set packed into the kernel's two lane-dense slabs."""
    keys = iter(jax.random.split(key, 64))

    def dense(din, dout, scale=0.05):
        return scale * jax.random.normal(next(keys), (din, dout), jnp.float32)

    in_fc_w = dense(POSE_DIM, MODEL_DIM)
    in_fc_b = jnp.zeros((MODEL_DIM,), jnp.float32)
    mu_token = 0.01 * jax.random.normal(next(keys), (MODEL_DIM,), jnp.float32)
    logvar_token = 0.01 * jax.random.normal(next(keys), (MODEL_DIM,), jnp.float32)

    # tok_pe: rows 0/1 = tokens + PE; rows 2.. = PE + in_fc bias (folded), tiled B.
    pe = sinusoidal_pe(L_TOK, MODEL_DIM)
    tok_pe = pe.at[0].add(mu_token).at[1].add(logvar_token)
    tok_pe = tok_pe.at[2:].add(in_fc_b[None, :])
    tok_pe_tiled = jnp.tile(tok_pe, (B, 1))                           # (BL, 32)

    wslab = jnp.zeros((RW, 128), jnp.float32)
    pslab = jnp.zeros((RP, 128), jnp.float32)

    wslab = wslab.at[W_INFC:W_INFC + POSE_DIM, 0:MODEL_DIM].set(in_fc_w)
    pslab = pslab.at[P_TOKPE:P_TOKPE + BL, 0:MODEL_DIM].set(tok_pe_tiled)

    for a in range(2 * NLAYER):                 # self-attn / cross-attn per layer
        wq, wk, wv, wo = (dense(MODEL_DIM, MODEL_DIM) for _ in range(4))
        wslab = wslab.at[W_ATTN + 32 * a:W_ATTN + 32 * (a + 1), :].set(
            jnp.concatenate([wq, wk, wv, wo], axis=1))
        # attention biases stay zero rows (PyTorch MHA default bias init)

    for l in range(NLAYER):
        wslab = wslab.at[W_FFN1 + 32 * l:W_FFN1 + 32 * (l + 1), 0:FF_DIM].set(
            dense(MODEL_DIM, FF_DIM))
        wslab = wslab.at[W_FFN2 + 64 * l:W_FFN2 + 64 * (l + 1), 0:MODEL_DIM].set(
            dense(FF_DIM, MODEL_DIM))
        ln = jnp.stack([jnp.ones(MODEL_DIM), jnp.zeros(MODEL_DIM),
                        jnp.ones(MODEL_DIM), jnp.zeros(MODEL_DIM),
                        jnp.ones(MODEL_DIM), jnp.zeros(MODEL_DIM)]).astype(jnp.float32)
        pslab = pslab.at[P_LN + 8 * l:P_LN + 8 * l + 6, 0:MODEL_DIM].set(ln)

    head_w = jnp.concatenate([dense(MODEL_DIM, NZ), dense(MODEL_DIM, NZ)], axis=1)
    wslab = wslab.at[W_HEAD:W_HEAD + MODEL_DIM, 0:2 * NZ].set(head_w)
    # head biases stay zero rows

    # Constant block-diagonal attention biases (no cross-batch mixing when the
    # batch is sublane-stacked into one matrix).
    qb = jnp.repeat(jnp.arange(B), L_TOK)                              # (BL,)
    kb_self = jnp.repeat(jnp.arange(B), L_TOK)                         # (BL,)
    kb_cross = jnp.repeat(jnp.arange(B), S_MEM)                        # (BS,)
    self_bias = jnp.where(qb[:, None] == kb_self[None, :], 0.0, NEG)
    cross_bias = jnp.where(qb[:, None] == kb_cross[None, :], 0.0, NEG)
    pslab = pslab.at[P_SELF:P_SELF + BL, 0:BL].set(self_bias)
    pslab = pslab.at[P_CROSS:P_CROSS + BL, 0:BS].set(cross_bias)

    return {'wslab': wslab.astype(jnp.bfloat16),   # MXU-native weight slab
            'pslab': pslab}                        # f32 bias/LN/PE/const slab


if __name__ == "__main__":
    root = jax.random.PRNGKey(0)
    k_params, k_pose, k_ctx, k_samp = jax.random.split(root, 4)
    packed = init_packed_params(k_params)
    data = {
        'body_pose_tp': jax.random.normal(k_pose, (T_TOTAL, B, POSE_DIM), jnp.float32),
        'context': jax.random.normal(k_ctx, (S_MEM, B, MODEL_DIM), jnp.float32),
        # True => key is padded / ignored (PyTorch memory_key_padding_mask semantics)
        'vis_frame_mask': jnp.arange(S_MEM)[None, :] >= jnp.array([[S_MEM], [S_MEM - 3]]),
    }
    fwd = jax.jit(data_encoder_forward)
    mu, logvar, samp = fwd(packed, data, k_samp)
    jax.block_until_ready((mu, logvar, samp))
    assert mu.shape == (B, NZ) and logvar.shape == (B, NZ) and samp.shape == (B, NZ)
    assert bool(jnp.all(jnp.isfinite(mu)))
    assert bool(jnp.all(jnp.isfinite(logvar)))
    assert bool(jnp.all(jnp.isfinite(samp)))
    print("KERNEL_OK")
</pallas_src>

<mosaic_0001>
module attributes {stable_mosaic.version = 11 : i64} {
  func.func @_encoder_kernel(%arg0: i32, %arg1: memref<20x69xf32, #tpu.memory_space<vmem>>, %arg2: memref<24x32xf32, #tpu.memory_space<vmem>>, %arg3: memref<1x24xf32, #tpu.memory_space<vmem>>, %arg4: memref<2x8xf32, #tpu.memory_space<vmem>>, %arg5: memref<448x128xbf16, #tpu.memory_space<vmem>>, %arg6: memref<120x128xf32, #tpu.memory_space<vmem>>, %arg7: memref<2x24xf32, #tpu.memory_space<vmem>>) attributes {dimension_semantics = [#tpu.dimension_semantics<arbitrary>], iteration_bounds = array<i64: 1>, scalar_prefetch = 0 : i64, scratch_operands = 0 : i64, tpu.core_type = #tpu.core_type<tc>, window_params = [{pipeline_mode = #tpu.pipeline_mode<synchronous>, transform_indices = @transform_0, window_bounds = array<i64: 20, 69>}, {pipeline_mode = #tpu.pipeline_mode<synchronous>, transform_indices = @transform_1, window_bounds = array<i64: 24, 32>}, {pipeline_mode = #tpu.pipeline_mode<synchronous>, transform_indices = @transform_2, window_bounds = array<i64: 1, 24>}, {pipeline_mode = #tpu.pipeline_mode<synchronous>, transform_indices = @transform_3, window_bounds = array<i64: 2, 8>}, {pipeline_mode = #tpu.pipeline_mode<synchronous>, transform_indices = @transform_4, window_bounds = array<i64: 448, 128>}, {pipeline_mode = #tpu.pipeline_mode<synchronous>, transform_indices = @transform_5, window_bounds = array<i64: 120, 128>}, {pipeline_mode = #tpu.pipeline_mode<synchronous>, transform_indices = @transform_6, window_bounds = array<i64: 2, 24>}]} {
    %c0 = arith.constant 0 : index
    %c0_0 = arith.constant 0 : index
    %0 = vector.load %arg6[%c0, %c0_0] : memref<120x128xf32, #tpu.memory_space<vmem>>, vector<20x32xf32>
    %c72 = arith.constant 72 : index
    %c0_1 = arith.constant 0 : index
    %1 = vector.load %arg6[%c72, %c0_1] : memref<120x128xf32, #tpu.memory_space<vmem>>, vector<20x20xf32>
    %c96 = arith.constant 96 : index
    %c0_2 = arith.constant 0 : index
    %2 = vector.load %arg6[%c96, %c0_2] : memref<120x128xf32, #tpu.memory_space<vmem>>, vector<20x24xf32>
    %c0_3 = arith.constant 0 : index
    %c0_4 = arith.constant 0 : index
    %3 = vector.load %arg3[%c0_3, %c0_4] : memref<1x24xf32, #tpu.memory_space<vmem>>, vector<1x24xf32>
    %cst = arith.constant -1.000000e+09 : f32
    %4 = vector.broadcast %cst : f32 to vector<1x24xf32>
    %5 = arith.mulf %3, %4 : vector<1x24xf32>
    %6 = vector.broadcast %5 : vector<1x24xf32> to vector<20x24xf32>
    %7 = arith.addf %2, %6 : vector<20x24xf32>
    %c0_5 = arith.constant 0 : index
    %c0_6 = arith.constant 0 : index
    %8 = vector.load %arg1[%c0_5, %c0_6] : memref<20x69xf32, #tpu.memory_space<vmem>>, vector<20x69xf32>
    %c0_7 = arith.constant 0 : index
    %c0_8 = arith.constant 0 : index
    %9 = vector.load %arg5[%c0_7, %c0_8] : memref<448x128xbf16, #tpu.memory_space<vmem>>, vector<69x32xbf16>
    %10 = arith.truncf %8 : vector<20x69xf32> to vector<20x69xbf16>
    %cst_9 = arith.constant dense<0.000000e+00> : vector<20x32xf32>
    %11 = tpu.matmul %10, %9, %cst_9 {dimension_numbers = #tpu.dot_dimension_numbers<[1], [0], [0], [1], [0, 0, 1, 1], [], []>} : vector<20x69xbf16>, vector<69x32xbf16>, vector<20x32xf32> -> vector<20x32xf32>
    %12 = arith.addf %11, %0 : vector<20x32xf32>
    %c0_10 = arith.constant 0 : index
    %c0_11 = arith.constant 0 : index
    %13 = vector.load %arg2[%c0_10, %c0_11] : memref<24x32xf32, #tpu.memory_space<vmem>>, vector<24x32xf32>
    %c48 = arith.constant 48 : index
    %c0_12 = arith.constant 0 : index
    %14 = vector.load %arg6[%c48, %c0_12] : memref<120x128xf32, #tpu.memory_space<vmem>>, vector<6x32xf32>
    %c96_13 = arith.constant 96 : index
    %c0_14 = arith.constant 0 : index
    %15 = vector.load %arg5[%c96_13, %c0_14] : memref<448x128xbf16, #tpu.memory_space<vmem>>, vector<32x128xbf16>
    %c24 = arith.constant 24 : index
    %c0_15 = arith.constant 0 : index
    %16 = vector.load %arg6[%c24, %c0_15] : memref<120x128xf32, #tpu.memory_space<vmem>>, vector<1x128xf32>
    %17 = vector.extract_strided_slice %15 {offsets = [0, 0], sizes = [32, 96], strides = [1, 1]} : vector<32x128xbf16> to vector<32x96xbf16>
    %18 = arith.truncf %12 : vector<20x32xf32> to vector<20x32xbf16>
    %cst_16 = arith.constant dense<0.000000e+00> : vector<20x96xf32>
    %19 = tpu.matmul %18, %17, %cst_16 {dimension_numbers = #tpu.dot_dimension_numbers<[1], [0], [0], [1], [0, 0, 1, 1], [], []>} : vector<20x32xbf16>, vector<32x96xbf16>, vector<20x96xf32> -> vector<20x96xf32>
    %20 = vector.extract_strided_slice %16 {offsets = [0, 0], sizes = [1, 96], strides = [1, 1]} : vector<1x128xf32> to vector<1x96xf32>
    %21 = vector.broadcast %20 : vector<1x96xf32> to vector<20x96xf32>
    %22 = arith.addf %19, %21 : vector<20x96xf32>
    %23 = vector.extract_strided_slice %22 {offsets = [0, 0], sizes = [20, 32], strides = [1, 1]} : vector<20x96xf32> to vector<20x32xf32>
    %24 = vector.extract_strided_slice %22 {offsets = [0, 32], sizes = [20, 32], strides = [1, 1]} : vector<20x96xf32> to vector<20x32xf32>
    %25 = vector.extract_strided_slice %22 {offsets = [0, 64], sizes = [20, 32], strides = [1, 1]} : vector<20x96xf32> to vector<20x32xf32>
    %26 = vector.extract_strided_slice %23 {offsets = [0, 0], sizes = [20, 8], strides = [1, 1]} : vector<20x32xf32> to vector<20x8xf32>
    %27 = vector.extract_strided_slice %24 {offsets = [0, 0], sizes = [20, 8], strides = [1, 1]} : vector<20x32xf32> to vector<20x8xf32>
    %28 = tpu.transpose %27, [1, 0] : vector<20x8xf32> -> vector<8x20xf32>
    %cst_17 = arith.constant dense<0.000000e+00> : vector<20x20xf32>
    %29 = tpu.matmul %26, %28, %cst_17 {dimension_numbers = #tpu.dot_dimension_numbers<[1], [0], [0], [1], [0, 0, 1, 1], [], []>} : vector<20x8xf32>, vector<8x20xf32>, vector<20x20xf32> -> vector<20x20xf32>
    %cst_18 = arith.constant 0.353553385 : f32
    %30 = vector.broadcast %cst_18 : f32 to vector<20x20xf32>
    %31 = arith.mulf %29, %30 : vector<20x20xf32>
    %32 = arith.addf %31, %1 : vector<20x20xf32>
    %cst_19 = arith.constant dense<0xFF800000> : vector<20xf32>
    %33 = vector.multi_reduction <maximumf>, %32, %cst_19 [1] : vector<20x20xf32> to vector<20xf32>
    %34 = vector.shape_cast %33 : vector<20xf32> to vector<20x1xf32>
    %35 = vector.broadcast %34 : vector<20x1xf32> to vector<20x20xf32>
    %36 = arith.subf %32, %35 : vector<20x20xf32>
    %37 = math.exp %36 : vector<20x20xf32>
    %cst_20 = arith.constant dense<0.000000e+00> : vector<20xf32>
    %38 = vector.multi_reduction <add>, %37, %cst_20 [1] : vector<20x20xf32> to vector<20xf32>
    %39 = vector.shape_cast %38 : vector<20xf32> to vector<20x1xf32>
    %40 = tpu.reciprocal %39 {approx = true} : vector<20x1xf32> -> vector<20x1xf32>
    %41 = vector.broadcast %40 : vector<20x1xf32> to vector<20x20xf32>
    %42 = arith.mulf %37, %41 : vector<20x20xf32>
    %43 = vector.extract_strided_slice %25 {offsets = [0, 0], sizes = [20, 8], strides = [1, 1]} : vector<20x32xf32> to vector<20x8xf32>
    %cst_21 = arith.constant dense<0.000000e+00> : vector<20x8xf32>
    %44 = tpu.matmul %42, %43, %cst_21 {dimension_numbers = #tpu.dot_dimension_numbers<[1], [0], [0], [1], [0, 0, 1, 1], [], []>} : vector<20x20xf32>, vector<20x8xf32>, vector<20x8xf32> -> vector<20x8xf32>
    %45 = vector.extract_strided_slice %23 {offsets = [0, 8], sizes = [20, 8], strides = [1, 1]} : vector<20x32xf32> to vector<20x8xf32>
    %46 = vector.extract_strided_slice %24 {offsets = [0, 8], sizes = [20, 8], strides = [1, 1]} : vector<20x32xf32> to vector<20x8xf32>
    %47 = tpu.transpose %46, [1, 0] : vector<20x8xf32> -> vector<8x20xf32>
    %cst_22 = arith.constant dense<0.000000e+00> : vector<20x20xf32>
    %48 = tpu.matmul %45, %47, %cst_22 {dimension_numbers = #tpu.dot_dimension_numbers<[1], [0], [0], [1], [0, 0, 1, 1], [], []>} : vector<20x8xf32>, vector<8x20xf32>, vector<20x20xf32> -> vector<20x20xf32>
    %cst_23 = arith.constant 0.353553385 : f32
    %49 = vector.broadcast %cst_23 : f32 to vector<20x20xf32>
    %50 = arith.mulf %48, %49 : vector<20x20xf32>
    %51 = arith.addf %50, %1 : vector<20x20xf32>
    %cst_24 = arith.constant dense<0xFF800000> : vector<20xf32>
    %52 = vector.multi_reduction <maximumf>, %51, %cst_24 [1] : vector<20x20xf32> to vector<20xf32>
    %53 = vector.shape_cast %52 : vector<20xf32> to vector<20x1xf32>
    %54 = vector.broadcast %53 : vector<20x1xf32> to vector<20x20xf32>
    %55 = arith.subf %51, %54 : vector<20x20xf32>
    %56 = math.exp %55 : vector<20x20xf32>
    %cst_25 = arith.constant dense<0.000000e+00> : vector<20xf32>
    %57 = vector.multi_reduction <add>, %56, %cst_25 [1] : vector<20x20xf32> to vector<20xf32>
    %58 = vector.shape_cast %57 : vector<20xf32> to vector<20x1xf32>
    %59 = tpu.reciprocal %58 {approx = true} : vector<20x1xf32> -> vector<20x1xf32>
    %60 = vector.broadcast %59 : vector<20x1xf32> to vector<20x20xf32>
    %61 = arith.mulf %56, %60 : vector<20x20xf32>
    %62 = vector.extract_strided_slice %25 {offsets = [0, 8], sizes = [20, 8], strides = [1, 1]} : vector<20x32xf32> to vector<20x8xf32>
    %cst_26 = arith.constant dense<0.000000e+00> : vector<20x8xf32>
    %63 = tpu.matmul %61, %62, %cst_26 {dimension_numbers = #tpu.dot_dimension_numbers<[1], [0], [0], [1], [0, 0, 1, 1], [], []>} : vector<20x20xf32>, vector<20x8xf32>, vector<20x8xf32> -> vector<20x8xf32>
    %64 = vector.extract_strided_slice %23 {offsets = [0, 16], sizes = [20, 8], strides = [1, 1]} : vector<20x32xf32> to vector<20x8xf32>
    %65 = vector.extract_strided_slice %24 {offsets = [0, 16], sizes = [20, 8], strides = [1, 1]} : vector<20x32xf32> to vector<20x8xf32>
    %66 = tpu.transpose %65, [1, 0] : vector<20x8xf32> -> vector<8x20xf32>
    %cst_27 = arith.constant dense<0.000000e+00> : vector<20x20xf32>
    %67 = tpu.matmul %64, %66, %cst_27 {dimension_numbers = #tpu.dot_dimension_numbers<[1], [0], [0], [1], [0, 0, 1, 1], [], []>} : vector<20x8xf32>, vector<8x20xf32>, vector<20x20xf32> -> vector<20x20xf32>
    %cst_28 = arith.constant 0.353553385 : f32
    %68 = vector.broadcast %cst_28 : f32 to vector<20x20xf32>
    %69 = arith.mulf %67, %68 : vector<20x20xf32>
    %70 = arith.addf %69, %1 : vector<20x20xf32>
    %cst_29 = arith.constant dense<0xFF800000> : vector<20xf32>
    %71 = vector.multi_reduction <maximumf>, %70, %cst_29 [1] : vector<20x20xf32> to vector<20xf32>
    %72 = vector.shape_cast %71 : vector<20xf32> to vector<20x1xf32>
    %73 = vector.broadcast %72 : vector<20x1xf32> to vector<20x20xf32>
    %74 = arith.subf %70, %73 : vector<20x20xf32>
    %75 = math.exp %74 : vector<20x20xf32>
    %cst_30 = arith.constant dense<0.000000e+00> : vector<20xf32>
    %76 = vector.multi_reduction <add>, %75, %cst_30 [1] : vector<20x20xf32> to vector<20xf32>
    %77 = vector.shape_cast %76 : vector<20xf32> to vector<20x1xf32>
    %78 = tpu.reciprocal %77 {approx = true} : vector<20x1xf32> -> vector<20x1xf32>
    %79 = vector.broadcast %78 : vector<20x1xf32> to vector<20x20xf32>
    %80 = arith.mulf %75, %79 : vector<20x20xf32>
    %81 = vector.extract_strided_slice %25 {offsets = [0, 16], sizes = [20, 8], strides = [1, 1]} : vector<20x32xf32> to vector<20x8xf32>
    %cst_31 = arith.constant dense<0.000000e+00> : vector<20x8xf32>
    %82 = tpu.matmul %80, %81, %cst_31 {dimension_numbers = #tpu.dot_dimension_numbers<[1], [0], [0], [1], [0, 0, 1, 1], [], []>} : vector<20x20xf32>, vector<20x8xf32>, vector<20x8xf32> -> vector<20x8xf32>
    %83 = vector.extract_strided_slice %23 {offsets = [0, 24], sizes = [20, 8], strides = [1, 1]} : vector<20x32xf32> to vector<20x8xf32>
    %84 = vector.extract_strided_slice %24 {offsets = [0, 24], sizes = [20, 8], strides = [1, 1]} : vector<20x32xf32> to vector<20x8xf32>
    %85 = tpu.transpose %84, [1, 0] : vector<20x8xf32> -> vector<8x20xf32>
    %cst_32 = arith.constant dense<0.000000e+00> : vector<20x20xf32>
    %86 = tpu.matmul %83, %85, %cst_32 {dimension_numbers = #tpu.dot_dimension_numbers<[1], [0], [0], [1], [0, 0, 1, 1], [], []>} : vector<20x8xf32>, vector<8x20xf32>, vector<20x20xf32> -> vector<20x20xf32>
    %cst_33 = arith.constant 0.353553385 : f32
    %87 = vector.broadcast %cst_33 : f32 to vector<20x20xf32>
    %88 = arith.mulf %86, %87 : vector<20x20xf32>
    %89 = arith.addf %88, %1 : vector<20x20xf32>
    %cst_34 = arith.constant dense<0xFF800000> : vector<20xf32>
    %90 = vector.multi_reduction <maximumf>, %89, %cst_34 [1] : vector<20x20xf32> to vector<20xf32>
    %91 = vector.shape_cast %90 : vector<20xf32> to vector<20x1xf32>
    %92 = vector.broadcast %91 : vector<20x1xf32> to vector<20x20xf32>
    %93 = arith.subf %89, %92 : vector<20x20xf32>
    %94 = math.exp %93 : vector<20x20xf32>
    %cst_35 = arith.constant dense<0.000000e+00> : vector<20xf32>
    %95 = vector.multi_reduction <add>, %94, %cst_35 [1] : vector<20x20xf32> to vector<20xf32>
    %96 = vector.shape_cast %95 : vector<20xf32> to vector<20x1xf32>
    %97 = tpu.reciprocal %96 {approx = true} : vector<20x1xf32> -> vector<20x1xf32>
    %98 = vector.broadcast %97 : vector<20x1xf32> to vector<20x20xf32>
    %99 = arith.mulf %94, %98 : vector<20x20xf32>
    %100 = vector.extract_strided_slice %25 {offsets = [0, 24], sizes = [20, 8], strides = [1, 1]} : vector<20x32xf32> to vector<20x8xf32>
    %cst_36 = arith.constant dense<0.000000e+00> : vector<20x8xf32>
    %101 = tpu.matmul %99, %100, %cst_36 {dimension_numbers = #tpu.dot_dimension_numbers<[1], [0], [0], [1], [0, 0, 1, 1], [], []>} : vector<20x20xf32>, vector<20x8xf32>, vector<20x8xf32> -> vector<20x8xf32>
    %102 = tpu.concatenate %44, %63, %82, %101 in 1 : vector<20x8xf32>, vector<20x8xf32>, vector<20x8xf32>, vector<20x8xf32> -> vector<20x32xf32>
    %103 = vector.extract_strided_slice %15 {offsets = [0, 96], sizes = [32, 32], strides = [1, 1]} : vector<32x128xbf16> to vector<32x32xbf16>
    %104 = arith.truncf %102 : vector<20x32xf32> to vector<20x32xbf16>
    %cst_37 = arith.constant dense<0.000000e+00> : vector<20x32xf32>
    %105 = tpu.matmul %104, %103, %cst_37 {dimension_numbers = #tpu.dot_dimension_numbers<[1], [0], [0], [1], [0, 0, 1, 1], [], []>} : vector<20x32xbf16>, vector<32x32xbf16>, vector<20x32xf32> -> vector<20x32xf32>
    %106 = vector.extract_strided_slice %16 {offsets = [0, 96], sizes = [1, 32], strides = [1, 1]} : vector<1x128xf32> to vector<1x32xf32>
    %107 = vector.broadcast %106 : vector<1x32xf32> to vector<20x32xf32>
    %108 = arith.addf %105, %107 : vector<20x32xf32>
    %109 = arith.addf %12, %108 : vector<20x32xf32>
    %110 = vector.extract_strided_slice %14 {offsets = [0, 0], sizes = [1, 32], strides = [1, 1]} : vector<6x32xf32> to vector<1x32xf32>
    %111 = vector.extract_strided_slice %14 {offsets = [1, 0], sizes = [1, 32], strides = [1, 1]} : vector<6x32xf32> to vector<1x32xf32>
    %cst_38 = arith.constant dense<0.000000e+00> : vector<20xf32>
    %112 = vector.multi_reduction <add>, %109, %cst_38 [1] : vector<20x32xf32> to vector<20xf32>
    %113 = vector.shape_cast %112 : vector<20xf32> to vector<20x1xf32>
    %cst_39 = arith.constant 3.200000e+01 : f32
    %114 = vector.broadcast %cst_39 : f32 to vector<20x1xf32>
    %115 = arith.divf %113, %114 : vector<20x1xf32>
    %116 = vector.broadcast %115 : vector<20x1xf32> to vector<20x32xf32>
    %117 = arith.subf %109, %116 : vector<20x32xf32>
    %118 = arith.mulf %117, %117 : vector<20x32xf32>
    %cst_40 = arith.constant dense<0.000000e+00> : vector<20xf32>
    %119 = vector.multi_reduction <add>, %118, %cst_40 [1] : vector<20x32xf32> to vector<20xf32>
    %120 = vector.shape_cast %119 : vector<20xf32> to vector<20x1xf32>
    %cst_41 = arith.constant 3.200000e+01 : f32
    %121 = vector.broadcast %cst_41 : f32 to vector<20x1xf32>
    %122 = arith.divf %120, %121 : vector<20x1xf32>
    %cst_42 = arith.constant 9.99999974E-6 : f32
    %123 = vector.broadcast %cst_42 : f32 to vector<20x1xf32>
    %124 = arith.addf %122, %123 : vector<20x1xf32>
    %125 = math.rsqrt %124 : vector<20x1xf32>
    %126 = vector.broadcast %125 : vector<20x1xf32> to vector<20x32xf32>
    %127 = arith.mulf %117, %126 : vector<20x32xf32>
    %128 = vector.broadcast %110 : vector<1x32xf32> to vector<20x32xf32>
    %129 = arith.mulf %127, %128 : vector<20x32xf32>
    %130 = vector.broadcast %111 : vector<1x32xf32> to vector<20x32xf32>
    %131 = arith.addf %129, %130 : vector<20x32xf32>
    %c128 = arith.constant 128 : index
    %c0_43 = arith.constant 0 : index
    %132 = vector.load %arg5[%c128, %c0_43] : memref<448x128xbf16, #tpu.memory_space<vmem>>, vector<32x128xbf16>
    %c25 = arith.constant 25 : index
    %c0_44 = arith.constant 0 : index
    %133 = vector.load %arg6[%c25, %c0_44] : memref<120x128xf32, #tpu.memory_space<vmem>>, vector<1x128xf32>
    %134 = vector.extract_strided_slice %132 {offsets = [0, 0], sizes = [32, 32], strides = [1, 1]} : vector<32x128xbf16> to vector<32x32xbf16>
    %135 = arith.truncf %131 : vector<20x32xf32> to vector<20x32xbf16>
    %cst_45 = arith.constant dense<0.000000e+00> : vector<20x32xf32>
    %136 = tpu.matmul %135, %134, %cst_45 {dimension_numbers = #tpu.dot_dimension_numbers<[1], [0], [0], [1], [0, 0, 1, 1], [], []>} : vector<20x32xbf16>, vector<32x32xbf16>, vector<20x32xf32> -> vector<20x32xf32>
    %137 = vector.extract_strided_slice %133 {offsets = [0, 0], sizes = [1, 32], strides = [1, 1]} : vector<1x128xf32> to vector<1x32xf32>
    %138 = vector.broadcast %137 : vector<1x32xf32> to vector<20x32xf32>
    %139 = arith.addf %136, %138 : vector<20x32xf32>
    %140 = vector.extract_strided_slice %132 {offsets = [0, 32], sizes = [32, 64], strides = [1, 1]} : vector<32x128xbf16> to vector<32x64xbf16>
    %141 = arith.truncf %13 : vector<24x32xf32> to vector<24x32xbf16>
    %cst_46 = arith.constant dense<0.000000e+00> : vector<24x64xf32>
    %142 = tpu.matmul %141, %140, %cst_46 {dimension_numbers = #tpu.dot_dimension_numbers<[1], [0], [0], [1], [0, 0, 1, 1], [], []>} : vector<24x32xbf16>, vector<32x64xbf16>, vector<24x64xf32> -> vector<24x64xf32>
    %143 = vector.extract_strided_slice %133 {offsets = [0, 32], sizes = [1, 64], strides = [1, 1]} : vector<1x128xf32> to vector<1x64xf32>
    %144 = vector.broadcast %143 : vector<1x64xf32> to vector<24x64xf32>
    %145 = arith.addf %142, %144 : vector<24x64xf32>
    %146 = vector.extract_strided_slice %145 {offsets = [0, 0], sizes = [24, 32], strides = [1, 1]} : vector<24x64xf32> to vector<24x32xf32>
    %147 = vector.extract_strided_slice %145 {offsets = [0, 32], sizes = [24, 32], strides = [1, 1]} : vector<24x64xf32> to vector<24x32xf32>
    %148 = vector.extract_strided_slice %139 {offsets = [0, 0], sizes = [20, 8], strides = [1, 1]} : vector<20x32xf32> to vector<20x8xf32>
    %149 = vector.extract_strided_slice %146 {offsets = [0, 0], sizes = [24, 8], strides = [1, 1]} : vector<24x32xf32> to vector<24x8xf32>
    %150 = tpu.transpose %149, [1, 0] : vector<24x8xf32> -> vector<8x24xf32>
    %cst_47 = arith.constant dense<0.000000e+00> : vector<20x24xf32>
    %151 = tpu.matmul %148, %150, %cst_47 {dimension_numbers = #tpu.dot_dimension_numbers<[1], [0], [0], [1], [0, 0, 1, 1], [], []>} : vector<20x8xf32>, vector<8x24xf32>, vector<20x24xf32> -> vector<20x24xf32>
    %cst_48 = arith.constant 0.353553385 : f32
    %152 = vector.broadcast %cst_48 : f32 to vector<20x24xf32>
    %153 = arith.mulf %151, %152 : vector<20x24xf32>
    %154 = arith.addf %153, %7 : vector<20x24xf32>
    %cst_49 = arith.constant dense<0xFF800000> : vector<20xf32>
    %155 = vector.multi_reduction <maximumf>, %154, %cst_49 [1] : vector<20x24xf32> to vector<20xf32>
    %156 = vector.shape_cast %155 : vector<20xf32> to vector<20x1xf32>
    %157 = vector.broadcast %156 : vector<20x1xf32> to vector<20x24xf32>
    %158 = arith.subf %154, %157 : vector<20x24xf32>
    %159 = math.exp %158 : vector<20x24xf32>
    %cst_50 = arith.constant dense<0.000000e+00> : vector<20xf32>
    %160 = vector.multi_reduction <add>, %159, %cst_50 [1] : vector<20x24xf32> to vector<20xf32>
    %161 = vector.shape_cast %160 : vector<20xf32> to vector<20x1xf32>
    %162 = tpu.reciprocal %161 {approx = true} : vector<20x1xf32> -> vector<20x1xf32>
    %163 = vector.broadcast %162 : vector<20x1xf32> to vector<20x24xf32>
    %164 = arith.mulf %159, %163 : vector<20x24xf32>
    %165 = vector.extract_strided_slice %147 {offsets = [0, 0], sizes = [24, 8], strides = [1, 1]} : vector<24x32xf32> to vector<24x8xf32>
    %cst_51 = arith.constant dense<0.000000e+00> : vector<20x8xf32>
    %166 = tpu.matmul %164, %165, %cst_51 {dimension_numbers = #tpu.dot_dimension_numbers<[1], [0], [0], [1], [0, 0, 1, 1], [], []>} : vector<20x24xf32>, vector<24x8xf32>, vector<20x8xf32> -> vector<20x8xf32>
    %167 = vector.extract_strided_slice %139 {offsets = [0, 8], sizes = [20, 8], strides = [1, 1]} : vector<20x32xf32> to vector<20x8xf32>
    %168 = vector.extract_strided_slice %146 {offsets = [0, 8], sizes = [24, 8], strides = [1, 1]} : vector<24x32xf32> to vector<24x8xf32>
    %169 = tpu.transpose %168, [1, 0] : vector<24x8xf32> -> vector<8x24xf32>
    %cst_52 = arith.constant dense<0.000000e+00> : vector<20x24xf32>
    %170 = tpu.matmul %167, %169, %cst_52 {dimension_numbers = #tpu.dot_dimension_numbers<[1], [0], [0], [1], [0, 0, 1, 1], [], []>} : vector<20x8xf32>, vector<8x24xf32>, vector<20x24xf32> -> vector<20x24xf32>
    %cst_53 = arith.constant 0.353553385 : f32
    %171 = vector.broadcast %cst_53 : f32 to vector<20x24xf32>
    %172 = arith.mulf %170, %171 : vector<20x24xf32>
    %173 = arith.addf %172, %7 : vector<20x24xf32>
    %cst_54 = arith.constant dense<0xFF800000> : vector<20xf32>
    %174 = vector.multi_reduction <maximumf>, %173, %cst_54 [1] : vector<20x24xf32> to vector<20xf32>
    %175 = vector.shape_cast %174 : vector<20xf32> to vector<20x1xf32>
    %176 = vector.broadcast %175 : vector<20x1xf32> to vector<20x24xf32>
    %177 = arith.subf %173, %176 : vector<20x24xf32>
    %178 = math.exp %177 : vector<20x24xf32>
    %cst_55 = arith.constant dense<0.000000e+00> : vector<20xf32>
    %179 = vector.multi_reduction <add>, %178, %cst_55 [1] : vector<20x24xf32> to vector<20xf32>
    %180 = vector.shape_cast %179 : vector<20xf32> to vector<20x1xf32>
    %181 = tpu.reciprocal %180 {approx = true} : vector<20x1xf32> -> vector<20x1xf32>
    %182 = vector.broadcast %181 : vector<20x1xf32> to vector<20x24xf32>
    %183 = arith.mulf %178, %182 : vector<20x24xf32>
    %184 = vector.extract_strided_slice %147 {offsets = [0, 8], sizes = [24, 8], strides = [1, 1]} : vector<24x32xf32> to vector<24x8xf32>
    %cst_56 = arith.constant dense<0.000000e+00> : vector<20x8xf32>
    %185 = tpu.matmul %183, %184, %cst_56 {dimension_numbers = #tpu.dot_dimension_numbers<[1], [0], [0], [1], [0, 0, 1, 1], [], []>} : vector<20x24xf32>, vector<24x8xf32>, vector<20x8xf32> -> vector<20x8xf32>
    %186 = vector.extract_strided_slice %139 {offsets = [0, 16], sizes = [20, 8], strides = [1, 1]} : vector<20x32xf32> to vector<20x8xf32>
    %187 = vector.extract_strided_slice %146 {offsets = [0, 16], sizes = [24, 8], strides = [1, 1]} : vector<24x32xf32> to vector<24x8xf32>
    %188 = tpu.transpose %187, [1, 0] : vector<24x8xf32> -> vector<8x24xf32>
    %cst_57 = arith.constant dense<0.000000e+00> : vector<20x24xf32>
    %189 = tpu.matmul %186, %188, %cst_57 {dimension_numbers = #tpu.dot_dimension_numbers<[1], [0], [0], [1], [0, 0, 1, 1], [], []>} : vector<20x8xf32>, vector<8x24xf32>, vector<20x24xf32> -> vector<20x24xf32>
    %cst_58 = arith.constant 0.353553385 : f32
    %190 = vector.broadcast %cst_58 : f32 to vector<20x24xf32>
    %191 = arith.mulf %189, %190 : vector<20x24xf32>
    %192 = arith.addf %191, %7 : vector<20x24xf32>
    %cst_59 = arith.constant dense<0xFF800000> : vector<20xf32>
    %193 = vector.multi_reduction <maximumf>, %192, %cst_59 [1] : vector<20x24xf32> to vector<20xf32>
    %194 = vector.shape_cast %193 : vector<20xf32> to vector<20x1xf32>
    %195 = vector.broadcast %194 : vector<20x1xf32> to vector<20x24xf32>
    %196 = arith.subf %192, %195 : vector<20x24xf32>
    %197 = math.exp %196 : vector<20x24xf32>
    %cst_60 = arith.constant dense<0.000000e+00> : vector<20xf32>
    %198 = vector.multi_reduction <add>, %197, %cst_60 [1] : vector<20x24xf32> to vector<20xf32>
    %199 = vector.shape_cast %198 : vector<20xf32> to vector<20x1xf32>
    %200 = tpu.reciprocal %199 {approx = true} : vector<20x1xf32> -> vector<20x1xf32>
    %201 = vector.broadcast %200 : vector<20x1xf32> to vector<20x24xf32>
    %202 = arith.mulf %197, %201 : vector<20x24xf32>
    %203 = vector.extract_strided_slice %147 {offsets = [0, 16], sizes = [24, 8], strides = [1, 1]} : vector<24x32xf32> to vector<24x8xf32>
    %cst_61 = arith.constant dense<0.000000e+00> : vector<20x8xf32>
    %204 = tpu.matmul %202, %203, %cst_61 {dimension_numbers = #tpu.dot_dimension_numbers<[1], [0], [0], [1], [0, 0, 1, 1], [], []>} : vector<20x24xf32>, vector<24x8xf32>, vector<20x8xf32> -> vector<20x8xf32>
    %205 = vector.extract_strided_slice %139 {offsets = [0, 24], sizes = [20, 8], strides = [1, 1]} : vector<20x32xf32> to vector<20x8xf32>
    %206 = vector.extract_strided_slice %146 {offsets = [0, 24], sizes = [24, 8], strides = [1, 1]} : vector<24x32xf32> to vector<24x8xf32>
    %207 = tpu.transpose %206, [1, 0] : vector<24x8xf32> -> vector<8x24xf32>
    %cst_62 = arith.constant dense<0.000000e+00> : vector<20x24xf32>
    %208 = tpu.matmul %205, %207, %cst_62 {dimension_numbers = #tpu.dot_dimension_numbers<[1], [0], [0], [1], [0, 0, 1, 1], [], []>} : vector<20x8xf32>, vector<8x24xf32>, vector<20x24xf32> -> vector<20x24xf32>
    %cst_63 = arith.constant 0.353553385 : f32
    %209 = vector.broadcast %cst_63 : f32 to vector<20x24xf32>
    %210 = arith.mulf %208, %209 : vector<20x24xf32>
    %211 = arith.addf %210, %7 : vector<20x24xf32>
    %cst_64 = arith.constant dense<0xFF800000> : vector<20xf32>
    %212 = vector.multi_reduction <maximumf>, %211, %cst_64 [1] : vector<20x24xf32> to vector<20xf32>
    %213 = vector.shape_cast %212 : vector<20xf32> to vector<20x1xf32>
    %214 = vector.broadcast %213 : vector<20x1xf32> to vector<20x24xf32>
    %215 = arith.subf %211, %214 : vector<20x24xf32>
    %216 = math.exp %215 : vector<20x24xf32>
    %cst_65 = arith.constant dense<0.000000e+00> : vector<20xf32>
    %217 = vector.multi_reduction <add>, %216, %cst_65 [1] : vector<20x24xf32> to vector<20xf32>
    %218 = vector.shape_cast %217 : vector<20xf32> to vector<20x1xf32>
    %219 = tpu.reciprocal %218 {approx = true} : vector<20x1xf32> -> vector<20x1xf32>
    %220 = vector.broadcast %219 : vector<20x1xf32> to vector<20x24xf32>
    %221 = arith.mulf %216, %220 : vector<20x24xf32>
    %222 = vector.extract_strided_slice %147 {offsets = [0, 24], sizes = [24, 8], strides = [1, 1]} : vector<24x32xf32> to vector<24x8xf32>
    %cst_66 = arith.constant dense<0.000000e+00> : vector<20x8xf32>
    %223 = tpu.matmul %221, %222, %cst_66 {dimension_numbers = #tpu.dot_dimension_numbers<[1], [0], [0], [1], [0, 0, 1, 1], [], []>} : vector<20x24xf32>, vector<24x8xf32>, vector<20x8xf32> -> vector<20x8xf32>
    %224 = tpu.concatenate %166, %185, %204, %223 in 1 : vector<20x8xf32>, vector<20x8xf32>, vector<20x8xf32>, vector<20x8xf32> -> vector<20x32xf32>
    %225 = vector.extract_strided_slice %132 {offsets = [0, 96], sizes = [32, 32], strides = [1, 1]} : vector<32x128xbf16> to vector<32x32xbf16>
    %226 = arith.truncf %224 : vector<20x32xf32> to vector<20x32xbf16>
    %cst_67 = arith.constant dense<0.000000e+00> : vector<20x32xf32>
    %227 = tpu.matmul %226, %225, %cst_67 {dimension_numbers = #tpu.dot_dimension_numbers<[1], [0], [0], [1], [0, 0, 1, 1], [], []>} : vector<20x32xbf16>, vector<32x32xbf16>, vector<20x32xf32> -> vector<20x32xf32>
    %228 = vector.extract_strided_slice %133 {offsets = [0, 96], sizes = [1, 32], strides = [1, 1]} : vector<1x128xf32> to vector<1x32xf32>
    %229 = vector.broadcast %228 : vector<1x32xf32> to vector<20x32xf32>
    %230 = arith.addf %227, %229 : vector<20x32xf32>
    %231 = arith.addf %131, %230 : vector<20x32xf32>
    %232 = vector.extract_strided_slice %14 {offsets = [2, 0], sizes = [1, 32], strides = [1, 1]} : vector<6x32xf32> to vector<1x32xf32>
    %233 = vector.extract_strided_slice %14 {offsets = [3, 0], sizes = [1, 32], strides = [1, 1]} : vector<6x32xf32> to vector<1x32xf32>
    %cst_68 = arith.constant dense<0.000000e+00> : vector<20xf32>
    %234 = vector.multi_reduction <add>, %231, %cst_68 [1] : vector<20x32xf32> to vector<20xf32>
    %235 = vector.shape_cast %234 : vector<20xf32> to vector<20x1xf32>
    %cst_69 = arith.constant 3.200000e+01 : f32
    %236 = vector.broadcast %cst_69 : f32 to vector<20x1xf32>
    %237 = arith.divf %235, %236 : vector<20x1xf32>
    %238 = vector.broadcast %237 : vector<20x1xf32> to vector<20x32xf32>
    %239 = arith.subf %231, %238 : vector<20x32xf32>
    %240 = arith.mulf %239, %239 : vector<20x32xf32>
    %cst_70 = arith.constant dense<0.000000e+00> : vector<20xf32>
    %241 = vector.multi_reduction <add>, %240, %cst_70 [1] : vector<20x32xf32> to vector<20xf32>
    %242 = vector.shape_cast %241 : vector<20xf32> to vector<20x1xf32>
    %cst_71 = arith.constant 3.200000e+01 : f32
    %243 = vector.broadcast %cst_71 : f32 to vector<20x1xf32>
    %244 = arith.divf %242, %243 : vector<20x1xf32>
    %cst_72 = arith.constant 9.99999974E-6 : f32
    %245 = vector.broadcast %cst_72 : f32 to vector<20x1xf32>
    %246 = arith.addf %244, %245 : vector<20x1xf32>
    %247 = math.rsqrt %246 : vector<20x1xf32>
    %248 = vector.broadcast %247 : vector<20x1xf32> to vector<20x32xf32>
    %249 = arith.mulf %239, %248 : vector<20x32xf32>
    %250 = vector.broadcast %232 : vector<1x32xf32> to vector<20x32xf32>
    %251 = arith.mulf %249, %250 : vector<20x32xf32>
    %252 = vector.broadcast %233 : vector<1x32xf32> to vector<20x32xf32>
    %253 = arith.addf %251, %252 : vector<20x32xf32>
    %c224 = arith.constant 224 : index
    %c0_73 = arith.constant 0 : index
    %254 = vector.load %arg5[%c224, %c0_73] : memref<448x128xbf16, #tpu.memory_space<vmem>>, vector<32x64xbf16>
    %c32 = arith.constant 32 : index
    %c0_74 = arith.constant 0 : index
    %255 = vector.load %arg6[%c32, %c0_74] : memref<120x128xf32, #tpu.memory_space<vmem>>, vector<1x64xf32>
    %c288 = arith.constant 288 : index
    %c0_75 = arith.constant 0 : index
    %256 = vector.load %arg5[%c288, %c0_75] : memref<448x128xbf16, #tpu.memory_space<vmem>>, vector<64x32xbf16>
    %c40 = arith.constant 40 : index
    %c0_76 = arith.constant 0 : index
    %257 = vector.load %arg6[%c40, %c0_76] : memref<120x128xf32, #tpu.memory_space<vmem>>, vector<1x32xf32>
    %258 = arith.truncf %253 : vector<20x32xf32> to vector<20x32xbf16>
    %cst_77 = arith.constant dense<0.000000e+00> : vector<20x64xf32>
    %259 = tpu.matmul %258, %254, %cst_77 {dimension_numbers = #tpu.dot_dimension_numbers<[1], [0], [0], [1], [0, 0, 1, 1], [], []>} : vector<20x32xbf16>, vector<32x64xbf16>, vector<20x64xf32> -> vector<20x64xf32>
    %260 = vector.broadcast %255 : vector<1x64xf32> to vector<20x64xf32>
    %261 = arith.addf %259, %260 : vector<20x64xf32>
    %cst_78 = arith.constant 0.000000e+00 : f32
    %262 = vector.broadcast %cst_78 : f32 to vector<20x64xf32>
    %263 = arith.maximumf %261, %262 : vector<20x64xf32>
    %264 = arith.truncf %263 : vector<20x64xf32> to vector<20x64xbf16>
    %cst_79 = arith.constant dense<0.000000e+00> : vector<20x32xf32>
    %265 = tpu.matmul %264, %256, %cst_79 {dimension_numbers = #tpu.dot_dimension_numbers<[1], [0], [0], [1], [0, 0, 1, 1], [], []>} : vector<20x64xbf16>, vector<64x32xbf16>, vector<20x32xf32> -> vector<20x32xf32>
    %266 = vector.broadcast %257 : vector<1x32xf32> to vector<20x32xf32>
    %267 = arith.addf %265, %266 : vector<20x32xf32>
    %268 = arith.addf %253, %267 : vector<20x32xf32>
    %269 = vector.extract_strided_slice %14 {offsets = [4, 0], sizes = [1, 32], strides = [1, 1]} : vector<6x32xf32> to vector<1x32xf32>
    %270 = vector.extract_strided_slice %14 {offsets = [5, 0], sizes = [1, 32], strides = [1, 1]} : vector<6x32xf32> to vector<1x32xf32>
    %cst_80 = arith.constant dense<0.000000e+00> : vector<20xf32>
    %271 = vector.multi_reduction <add>, %268, %cst_80 [1] : vector<20x32xf32> to vector<20xf32>
    %272 = vector.shape_cast %271 : vector<20xf32> to vector<20x1xf32>
    %cst_81 = arith.constant 3.200000e+01 : f32
    %273 = vector.broadcast %cst_81 : f32 to vector<20x1xf32>
    %274 = arith.divf %272, %273 : vector<20x1xf32>
    %275 = vector.broadcast %274 : vector<20x1xf32> to vector<20x32xf32>
    %276 = arith.subf %268, %275 : vector<20x32xf32>
    %277 = arith.mulf %276, %276 : vector<20x32xf32>
    %cst_82 = arith.constant dense<0.000000e+00> : vector<20xf32>
    %278 = vector.multi_reduction <add>, %277, %cst_82 [1] : vector<20x32xf32> to vector<20xf32>
    %279 = vector.shape_cast %278 : vector<20xf32> to vector<20x1xf32>
    %cst_83 = arith.constant 3.200000e+01 : f32
    %280 = vector.broadcast %cst_83 : f32 to vector<20x1xf32>
    %281 = arith.divf %279, %280 : vector<20x1xf32>
    %cst_84 = arith.constant 9.99999974E-6 : f32
    %282 = vector.broadcast %cst_84 : f32 to vector<20x1xf32>
    %283 = arith.addf %281, %282 : vector<20x1xf32>
    %284 = math.rsqrt %283 : vector<20x1xf32>
    %285 = vector.broadcast %284 : vector<20x1xf32> to vector<20x32xf32>
    %286 = arith.mulf %276, %285 : vector<20x32xf32>
    %287 = vector.broadcast %269 : vector<1x32xf32> to vector<20x32xf32>
    %288 = arith.mulf %286, %287 : vector<20x32xf32>
    %289 = vector.broadcast %270 : vector<1x32xf32> to vector<20x32xf32>
    %290 = arith.addf %288, %289 : vector<20x32xf32>
    %c56 = arith.constant 56 : index
    %c0_85 = arith.constant 0 : index
    %291 = vector.load %arg6[%c56, %c0_85] : memref<120x128xf32, #tpu.memory_space<vmem>>, vector<6x32xf32>
    %c160 = arith.constant 160 : index
    %c0_86 = arith.constant 0 : index
    %292 = vector.load %arg5[%c160, %c0_86] : memref<448x128xbf16, #tpu.memory_space<vmem>>, vector<32x128xbf16>
    %c26 = arith.constant 26 : index
    %c0_87 = arith.constant 0 : index
    %293 = vector.load %arg6[%c26, %c0_87] : memref<120x128xf32, #tpu.memory_space<vmem>>, vector<1x128xf32>
    %294 = vector.extract_strided_slice %292 {offsets = [0, 0], sizes = [32, 96], strides = [1, 1]} : vector<32x128xbf16> to vector<32x96xbf16>
    %295 = arith.truncf %290 : vector<20x32xf32> to vector<20x32xbf16>
    %cst_88 = arith.constant dense<0.000000e+00> : vector<20x96xf32>
    %296 = tpu.matmul %295, %294, %cst_88 {dimension_numbers = #tpu.dot_dimension_numbers<[1], [0], [0], [1], [0, 0, 1, 1], [], []>} : vector<20x32xbf16>, vector<32x96xbf16>, vector<20x96xf32> -> vector<20x96xf32>
    %297 = vector.extract_strided_slice %293 {offsets = [0, 0], sizes = [1, 96], strides = [1, 1]} : vector<1x128xf32> to vector<1x96xf32>
    %298 = vector.broadcast %297 : vector<1x96xf32> to vector<20x96xf32>
    %299 = arith.addf %296, %298 : vector<20x96xf32>
    %300 = vector.extract_strided_slice %299 {offsets = [0, 0], sizes = [20, 32], strides = [1, 1]} : vector<20x96xf32> to vector<20x32xf32>
    %301 = vector.extract_strided_slice %299 {offsets = [0, 32], sizes = [20, 32], strides = [1, 1]} : vector<20x96xf32> to vector<20x32xf32>
    %302 = vector.extract_strided_slice %299 {offsets = [0, 64], sizes = [20, 32], strides = [1, 1]} : vector<20x96xf32> to vector<20x32xf32>
    %303 = vector.extract_strided_slice %300 {offsets = [0, 0], sizes = [20, 8], strides = [1, 1]} : vector<20x32xf32> to vector<20x8xf32>
    %304 = vector.extract_strided_slice %301 {offsets = [0, 0], sizes = [20, 8], strides = [1, 1]} : vector<20x32xf32> to vector<20x8xf32>
    %305 = tpu.transpose %304, [1, 0] : vector<20x8xf32> -> vector<8x20xf32>
    %cst_89 = arith.constant dense<0.000000e+00> : vector<20x20xf32>
    %306 = tpu.matmul %303, %305, %cst_89 {dimension_numbers = #tpu.dot_dimension_numbers<[1], [0], [0], [1], [0, 0, 1, 1], [], []>} : vector<20x8xf32>, vector<8x20xf32>, vector<20x20xf32> -> vector<20x20xf32>
    %cst_90 = arith.constant 0.353553385 : f32
    %307 = vector.broadcast %cst_90 : f32 to vector<20x20xf32>
    %308 = arith.mulf %306, %307 : vector<20x20xf32>
    %309 = arith.addf %308, %1 : vector<20x20xf32>
    %cst_91 = arith.constant dense<0xFF800000> : vector<20xf32>
    %310 = vector.multi_reduction <maximumf>, %309, %cst_91 [1] : vector<20x20xf32> to vector<20xf32>
    %311 = vector.shape_cast %310 : vector<20xf32> to vector<20x1xf32>
    %312 = vector.broadcast %311 : vector<20x1xf32> to vector<20x20xf32>
    %313 = arith.subf %309, %312 : vector<20x20xf32>
    %314 = math.exp %313 : vector<20x20xf32>
    %cst_92 = arith.constant dense<0.000000e+00> : vector<20xf32>
    %315 = vector.multi_reduction <add>, %314, %cst_92 [1] : vector<20x20xf32> to vector<20xf32>
    %316 = vector.shape_cast %315 : vector<20xf32> to vector<20x1xf32>
    %317 = tpu.reciprocal %316 {approx = true} : vector<20x1xf32> -> vector<20x1xf32>
    %318 = vector.broadcast %317 : vector<20x1xf32> to vector<20x20xf32>
    %319 = arith.mulf %314, %318 : vector<20x20xf32>
    %320 = vector.extract_strided_slice %302 {offsets = [0, 0], sizes = [20, 8], strides = [1, 1]} : vector<20x32xf32> to vector<20x8xf32>
    %cst_93 = arith.constant dense<0.000000e+00> : vector<20x8xf32>
    %321 = tpu.matmul %319, %320, %cst_93 {dimension_numbers = #tpu.dot_dimension_numbers<[1], [0], [0], [1], [0, 0, 1, 1], [], []>} : vector<20x20xf32>, vector<20x8xf32>, vector<20x8xf32> -> vector<20x8xf32>
    %322 = vector.extract_strided_slice %300 {offsets = [0, 8], sizes = [20, 8], strides = [1, 1]} : vector<20x32xf32> to vector<20x8xf32>
    %323 = vector.extract_strided_slice %301 {offsets = [0, 8], sizes = [20, 8], strides = [1, 1]} : vector<20x32xf32> to vector<20x8xf32>
    %324 = tpu.transpose %323, [1, 0] : vector<20x8xf32> -> vector<8x20xf32>
    %cst_94 = arith.constant dense<0.000000e+00> : vector<20x20xf32>
    %325 = tpu.matmul %322, %324, %cst_94 {dimension_numbers = #tpu.dot_dimension_numbers<[1], [0], [0], [1], [0, 0, 1, 1], [], []>} : vector<20x8xf32>, vector<8x20xf32>, vector<20x20xf32> -> vector<20x20xf32>
    %cst_95 = arith.constant 0.353553385 : f32
    %326 = vector.broadcast %cst_95 : f32 to vector<20x20xf32>
    %327 = arith.mulf %325, %326 : vector<20x20xf32>
    %328 = arith.addf %327, %1 : vector<20x20xf32>
    %cst_96 = arith.constant dense<0xFF800000> : vector<20xf32>
    %329 = vector.multi_reduction <maximumf>, %328, %cst_96 [1] : vector<20x20xf32> to vector<20xf32>
    %330 = vector.shape_cast %329 : vector<20xf32> to vector<20x1xf32>
    %331 = vector.broadcast %330 : vector<20x1xf32> to vector<20x20xf32>
    %332 = arith.subf %328, %331 : vector<20x20xf32>
    %333 = math.exp %332 : vector<20x20xf32>
    %cst_97 = arith.constant dense<0.000000e+00> : vector<20xf32>
    %334 = vector.multi_reduction <add>, %333, %cst_97 [1] : vector<20x20xf32> to vector<20xf32>
    %335 = vector.shape_cast %334 : vector<20xf32> to vector<20x1xf32>
    %336 = tpu.reciprocal %335 {approx = true} : vector<20x1xf32> -> vector<20x1xf32>
    %337 = vector.broadcast %336 : vector<20x1xf32> to vector<20x20xf32>
    %338 = arith.mulf %333, %337 : vector<20x20xf32>
    %339 = vector.extract_strided_slice %302 {offsets = [0, 8], sizes = [20, 8], strides = [1, 1]} : vector<20x32xf32> to vector<20x8xf32>
    %cst_98 = arith.constant dense<0.000000e+00> : vector<20x8xf32>
    %340 = tpu.matmul %338, %339, %cst_98 {dimension_numbers = #tpu.dot_dimension_numbers<[1], [0], [0], [1], [0, 0, 1, 1], [], []>} : vector<20x20xf32>, vector<20x8xf32>, vector<20x8xf32> -> vector<20x8xf32>
    %341 = vector.extract_strided_slice %300 {offsets = [0, 16], sizes = [20, 8], strides = [1, 1]} : vector<20x32xf32> to vector<20x8xf32>
    %342 = vector.extract_strided_slice %301 {offsets = [0, 16], sizes = [20, 8], strides = [1, 1]} : vector<20x32xf32> to vector<20x8xf32>
    %343 = tpu.transpose %342, [1, 0] : vector<20x8xf32> -> vector<8x20xf32>
    %cst_99 = arith.constant dense<0.000000e+00> : vector<20x20xf32>
    %344 = tpu.matmul %341, %343, %cst_99 {dimension_numbers = #tpu.dot_dimension_numbers<[1], [0], [0], [1], [0, 0, 1, 1], [], []>} : vector<20x8xf32>, vector<8x20xf32>, vector<20x20xf32> -> vector<20x20xf32>
    %cst_100 = arith.constant 0.353553385 : f32
    %345 = vector.broadcast %cst_100 : f32 to vector<20x20xf32>
    %346 = arith.mulf %344, %345 : vector<20x20xf32>
    %347 = arith.addf %346, %1 : vector<20x20xf32>
    %cst_101 = arith.constant dense<0xFF800000> : vector<20xf32>
    %348 = vector.multi_reduction <maximumf>, %347, %cst_101 [1] : vector<20x20xf32> to vector<20xf32>
    %349 = vector.shape_cast %348 : vector<20xf32> to vector<20x1xf32>
    %350 = vector.broadcast %349 : vector<20x1xf32> to vector<20x20xf32>
    %351 = arith.subf %347, %350 : vector<20x20xf32>
    %352 = math.exp %351 : vector<20x20xf32>
    %cst_102 = arith.constant dense<0.000000e+00> : vector<20xf32>
    %353 = vector.multi_reduction <add>, %352, %cst_102 [1] : vector<20x20xf32> to vector<20xf32>
    %354 = vector.shape_cast %353 : vector<20xf32> to vector<20x1xf32>
    %355 = tpu.reciprocal %354 {approx = true} : vector<20x1xf32> -> vector<20x1xf32>
    %356 = vector.broadcast %355 : vector<20x1xf32> to vector<20x20xf32>
    %357 = arith.mulf %352, %356 : vector<20x20xf32>
    %358 = vector.extract_strided_slice %302 {offsets = [0, 16], sizes = [20, 8], strides = [1, 1]} : vector<20x32xf32> to vector<20x8xf32>
    %cst_103 = arith.constant dense<0.000000e+00> : vector<20x8xf32>
    %359 = tpu.matmul %357, %358, %cst_103 {dimension_numbers = #tpu.dot_dimension_numbers<[1], [0], [0], [1], [0, 0, 1, 1], [], []>} : vector<20x20xf32>, vector<20x8xf32>, vector<20x8xf32> -> vector<20x8xf32>
    %360 = vector.extract_strided_slice %300 {offsets = [0, 24], sizes = [20, 8], strides = [1, 1]} : vector<20x32xf32> to vector<20x8xf32>
    %361 = vector.extract_strided_slice %301 {offsets = [0, 24], sizes = [20, 8], strides = [1, 1]} : vector<20x32xf32> to vector<20x8xf32>
    %362 = tpu.transpose %361, [1, 0] : vector<20x8xf32> -> vector<8x20xf32>
    %cst_104 = arith.constant dense<0.000000e+00> : vector<20x20xf32>
    %363 = tpu.matmul %360, %362, %cst_104 {dimension_numbers = #tpu.dot_dimension_numbers<[1], [0], [0], [1], [0, 0, 1, 1], [], []>} : vector<20x8xf32>, vector<8x20xf32>, vector<20x20xf32> -> vector<20x20xf32>
    %cst_105 = arith.constant 0.353553385 : f32
    %364 = vector.broadcast %cst_105 : f32 to vector<20x20xf32>
    %365 = arith.mulf %363, %364 : vector<20x20xf32>
    %366 = arith.addf %365, %1 : vector<20x20xf32>
    %cst_106 = arith.constant dense<0xFF800000> : vector<20xf32>
    %367 = vector.multi_reduction <maximumf>, %366, %cst_106 [1] : vector<20x20xf32> to vector<20xf32>
    %368 = vector.shape_cast %367 : vector<20xf32> to vector<20x1xf32>
    %369 = vector.broadcast %368 : vector<20x1xf32> to vector<20x20xf32>
    %370 = arith.subf %366, %369 : vector<20x20xf32>
    %371 = math.exp %370 : vector<20x20xf32>
    %cst_107 = arith.constant dense<0.000000e+00> : vector<20xf32>
    %372 = vector.multi_reduction <add>, %371, %cst_107 [1] : vector<20x20xf32> to vector<20xf32>
    %373 = vector.shape_cast %372 : vector<20xf32> to vector<20x1xf32>
    %374 = tpu.reciprocal %373 {approx = true} : vector<20x1xf32> -> vector<20x1xf32>
    %375 = vector.broadcast %374 : vector<20x1xf32> to vector<20x20xf32>
    %376 = arith.mulf %371, %375 : vector<20x20xf32>
    %377 = vector.extract_strided_slice %302 {offsets = [0, 24], sizes = [20, 8], strides = [1, 1]} : vector<20x32xf32> to vector<20x8xf32>
    %cst_108 = arith.constant dense<0.000000e+00> : vector<20x8xf32>
    %378 = tpu.matmul %376, %377, %cst_108 {dimension_numbers = #tpu.dot_dimension_numbers<[1], [0], [0], [1], [0, 0, 1, 1], [], []>} : vector<20x20xf32>, vector<20x8xf32>, vector<20x8xf32> -> vector<20x8xf32>
    %379 = tpu.concatenate %321, %340, %359, %378 in 1 : vector<20x8xf32>, vector<20x8xf32>, vector<20x8xf32>, vector<20x8xf32> -> vector<20x32xf32>
    %380 = vector.extract_strided_slice %292 {offsets = [0, 96], sizes = [32, 32], strides = [1, 1]} : vector<32x128xbf16> to vector<32x32xbf16>
    %381 = arith.truncf %379 : vector<20x32xf32> to vector<20x32xbf16>
    %cst_109 = arith.constant dense<0.000000e+00> : vector<20x32xf32>
    %382 = tpu.matmul %381, %380, %cst_109 {dimension_numbers = #tpu.dot_dimension_numbers<[1], [0], [0], [1], [0, 0, 1, 1], [], []>} : vector<20x32xbf16>, vector<32x32xbf16>, vector<20x32xf32> -> vector<20x32xf32>
    %383 = vector.extract_strided_slice %293 {offsets = [0, 96], sizes = [1, 32], strides = [1, 1]} : vector<1x128xf32> to vector<1x32xf32>
    %384 = vector.broadcast %383 : vector<1x32xf32> to vector<20x32xf32>
    %385 = arith.addf %382, %384 : vector<20x32xf32>
    %386 = arith.addf %290, %385 : vector<20x32xf32>
    %387 = vector.extract_strided_slice %291 {offsets = [0, 0], sizes = [1, 32], strides = [1, 1]} : vector<6x32xf32> to vector<1x32xf32>
    %388 = vector.extract_strided_slice %291 {offsets = [1, 0], sizes = [1, 32], strides = [1, 1]} : vector<6x32xf32> to vector<1x32xf32>
    %cst_110 = arith.constant dense<0.000000e+00> : vector<20xf32>
    %389 = vector.multi_reduction <add>, %386, %cst_110 [1] : vector<20x32xf32> to vector<20xf32>
    %390 = vector.shape_cast %389 : vector<20xf32> to vector<20x1xf32>
    %cst_111 = arith.constant 3.200000e+01 : f32
    %391 = vector.broadcast %cst_111 : f32 to vector<20x1xf32>
    %392 = arith.divf %390, %391 : vector<20x1xf32>
    %393 = vector.broadcast %392 : vector<20x1xf32> to vector<20x32xf32>
    %394 = arith.subf %386, %393 : vector<20x32xf32>
    %395 = arith.mulf %394, %394 : vector<20x32xf32>
    %cst_112 = arith.constant dense<0.000000e+00> : vector<20xf32>
    %396 = vector.multi_reduction <add>, %395, %cst_112 [1] : vector<20x32xf32> to vector<20xf32>
    %397 = vector.shape_cast %396 : vector<20xf32> to vector<20x1xf32>
    %cst_113 = arith.constant 3.200000e+01 : f32
    %398 = vector.broadcast %cst_113 : f32 to vector<20x1xf32>
    %399 = arith.divf %397, %398 : vector<20x1xf32>
    %cst_114 = arith.constant 9.99999974E-6 : f32
    %400 = vector.broadcast %cst_114 : f32 to vector<20x1xf32>
    %401 = arith.addf %399, %400 : vector<20x1xf32>
    %402 = math.rsqrt %401 : vector<20x1xf32>
    %403 = vector.broadcast %402 : vector<20x1xf32> to vector<20x32xf32>
    %404 = arith.mulf %394, %403 : vector<20x32xf32>
    %405 = vector.broadcast %387 : vector<1x32xf32> to vector<20x32xf32>
    %406 = arith.mulf %404, %405 : vector<20x32xf32>
    %407 = vector.broadcast %388 : vector<1x32xf32> to vector<20x32xf32>
    %408 = arith.addf %406, %407 : vector<20x32xf32>
    %c192 = arith.constant 192 : index
    %c0_115 = arith.constant 0 : index
    %409 = vector.load %arg5[%c192, %c0_115] : memref<448x128xbf16, #tpu.memory_space<vmem>>, vector<32x128xbf16>
    %c27 = arith.constant 27 : index
    %c0_116 = arith.constant 0 : index
    %410 = vector.load %arg6[%c27, %c0_116] : memref<120x128xf32, #tpu.memory_space<vmem>>, vector<1x128xf32>
    %411 = vector.extract_strided_slice %409 {offsets = [0, 0], sizes = [32, 32], strides = [1, 1]} : vector<32x128xbf16> to vector<32x32xbf16>
    %412 = arith.truncf %408 : vector<20x32xf32> to vector<20x32xbf16>
    %cst_117 = arith.constant dense<0.000000e+00> : vector<20x32xf32>
    %413 = tpu.matmul %412, %411, %cst_117 {dimension_numbers = #tpu.dot_dimension_numbers<[1], [0], [0], [1], [0, 0, 1, 1], [], []>} : vector<20x32xbf16>, vector<32x32xbf16>, vector<20x32xf32> -> vector<20x32xf32>
    %414 = vector.extract_strided_slice %410 {offsets = [0, 0], sizes = [1, 32], strides = [1, 1]} : vector<1x128xf32> to vector<1x32xf32>
    %415 = vector.broadcast %414 : vector<1x32xf32> to vector<20x32xf32>
    %416 = arith.addf %413, %415 : vector<20x32xf32>
    %417 = vector.extract_strided_slice %409 {offsets = [0, 32], sizes = [32, 64], strides = [1, 1]} : vector<32x128xbf16> to vector<32x64xbf16>
    %418 = arith.truncf %13 : vector<24x32xf32> to vector<24x32xbf16>
    %cst_118 = arith.constant dense<0.000000e+00> : vector<24x64xf32>
    %419 = tpu.matmul %418, %417, %cst_118 {dimension_numbers = #tpu.dot_dimension_numbers<[1], [0], [0], [1], [0, 0, 1, 1], [], []>} : vector<24x32xbf16>, vector<32x64xbf16>, vector<24x64xf32> -> vector<24x64xf32>
    %420 = vector.extract_strided_slice %410 {offsets = [0, 32], sizes = [1, 64], strides = [1, 1]} : vector<1x128xf32> to vector<1x64xf32>
    %421 = vector.broadcast %420 : vector<1x64xf32> to vector<24x64xf32>
    %422 = arith.addf %419, %421 : vector<24x64xf32>
    %423 = vector.extract_strided_slice %422 {offsets = [0, 0], sizes = [24, 32], strides = [1, 1]} : vector<24x64xf32> to vector<24x32xf32>
    %424 = vector.extract_strided_slice %422 {offsets = [0, 32], sizes = [24, 32], strides = [1, 1]} : vector<24x64xf32> to vector<24x32xf32>
    %425 = vector.extract_strided_slice %416 {offsets = [0, 0], sizes = [20, 8], strides = [1, 1]} : vector<20x32xf32> to vector<20x8xf32>
    %426 = vector.extract_strided_slice %423 {offsets = [0, 0], sizes = [24, 8], strides = [1, 1]} : vector<24x32xf32> to vector<24x8xf32>
    %427 = tpu.transpose %426, [1, 0] : vector<24x8xf32> -> vector<8x24xf32>
    %cst_119 = arith.constant dense<0.000000e+00> : vector<20x24xf32>
    %428 = tpu.matmul %425, %427, %cst_119 {dimension_numbers = #tpu.dot_dimension_numbers<[1], [0], [0], [1], [0, 0, 1, 1], [], []>} : vector<20x8xf32>, vector<8x24xf32>, vector<20x24xf32> -> vector<20x24xf32>
    %cst_120 = arith.constant 0.353553385 : f32
    %429 = vector.broadcast %cst_120 : f32 to vector<20x24xf32>
    %430 = arith.mulf %428, %429 : vector<20x24xf32>
    %431 = arith.addf %430, %7 : vector<20x24xf32>
    %cst_121 = arith.constant dense<0xFF800000> : vector<20xf32>
    %432 = vector.multi_reduction <maximumf>, %431, %cst_121 [1] : vector<20x24xf32> to vector<20xf32>
    %433 = vector.shape_cast %432 : vector<20xf32> to vector<20x1xf32>
    %434 = vector.broadcast %433 : vector<20x1xf32> to vector<20x24xf32>
    %435 = arith.subf %431, %434 : vector<20x24xf32>
    %436 = math.exp %435 : vector<20x24xf32>
    %cst_122 = arith.constant dense<0.000000e+00> : vector<20xf32>
    %437 = vector.multi_reduction <add>, %436, %cst_122 [1] : vector<20x24xf32> to vector<20xf32>
    %438 = vector.shape_cast %437 : vector<20xf32> to vector<20x1xf32>
    %439 = tpu.reciprocal %438 {approx = true} : vector<20x1xf32> -> vector<20x1xf32>
    %440 = vector.broadcast %439 : vector<20x1xf32> to vector<20x24xf32>
    %441 = arith.mulf %436, %440 : vector<20x24xf32>
    %442 = vector.extract_strided_slice %424 {offsets = [0, 0], sizes = [24, 8], strides = [1, 1]} : vector<24x32xf32> to vector<24x8xf32>
    %cst_123 = arith.constant dense<0.000000e+00> : vector<20x8xf32>
    %443 = tpu.matmul %441, %442, %cst_123 {dimension_numbers = #tpu.dot_dimension_numbers<[1], [0], [0], [1], [0, 0, 1, 1], [], []>} : vector<20x24xf32>, vector<24x8xf32>, vector<20x8xf32> -> vector<20x8xf32>
    %444 = vector.extract_strided_slice %416 {offsets = [0, 8], sizes = [20, 8], strides = [1, 1]} : vector<20x32xf32> to vector<20x8xf32>
    %445 = vector.extract_strided_slice %423 {offsets = [0, 8], sizes = [24, 8], strides = [1, 1]} : vector<24x32xf32> to vector<24x8xf32>
    %446 = tpu.transpose %445, [1, 0] : vector<24x8xf32> -> vector<8x24xf32>
    %cst_124 = arith.constant dense<0.000000e+00> : vector<20x24xf32>
    %447 = tpu.matmul %444, %446, %cst_124 {dimension_numbers = #tpu.dot_dimension_numbers<[1], [0], [0], [1], [0, 0, 1, 1], [], []>} : vector<20x8xf32>, vector<8x24xf32>, vector<20x24xf32> -> vector<20x24xf32>
    %cst_125 = arith.constant 0.353553385 : f32
    %448 = vector.broadcast %cst_125 : f32 to vector<20x24xf32>
    %449 = arith.mulf %447, %448 : vector<20x24xf32>
    %450 = arith.addf %449, %7 : vector<20x24xf32>
    %cst_126 = arith.constant dense<0xFF800000> : vector<20xf32>
    %451 = vector.multi_reduction <maximumf>, %450, %cst_126 [1] : vector<20x24xf32> to vector<20xf32>
    %452 = vector.shape_cast %451 : vector<20xf32> to vector<20x1xf32>
    %453 = vector.broadcast %452 : vector<20x1xf32> to vector<20x24xf32>
    %454 = arith.subf %450, %453 : vector<20x24xf32>
    %455 = math.exp %454 : vector<20x24xf32>
    %cst_127 = arith.constant dense<0.000000e+00> : vector<20xf32>
    %456 = vector.multi_reduction <add>, %455, %cst_127 [1] : vector<20x24xf32> to vector<20xf32>
    %457 = vector.shape_cast %456 : vector<20xf32> to vector<20x1xf32>
    %458 = tpu.reciprocal %457 {approx = true} : vector<20x1xf32> -> vector<20x1xf32>
    %459 = vector.broadcast %458 : vector<20x1xf32> to vector<20x24xf32>
    %460 = arith.mulf %455, %459 : vector<20x24xf32>
    %461 = vector.extract_strided_slice %424 {offsets = [0, 8], sizes = [24, 8], strides = [1, 1]} : vector<24x32xf32> to vector<24x8xf32>
    %cst_128 = arith.constant dense<0.000000e+00> : vector<20x8xf32>
    %462 = tpu.matmul %460, %461, %cst_128 {dimension_numbers = #tpu.dot_dimension_numbers<[1], [0], [0], [1], [0, 0, 1, 1], [], []>} : vector<20x24xf32>, vector<24x8xf32>, vector<20x8xf32> -> vector<20x8xf32>
    %463 = vector.extract_strided_slice %416 {offsets = [0, 16], sizes = [20, 8], strides = [1, 1]} : vector<20x32xf32> to vector<20x8xf32>
    %464 = vector.extract_strided_slice %423 {offsets = [0, 16], sizes = [24, 8], strides = [1, 1]} : vector<24x32xf32> to vector<24x8xf32>
    %465 = tpu.transpose %464, [1, 0] : vector<24x8xf32> -> vector<8x24xf32>
    %cst_129 = arith.constant dense<0.000000e+00> : vector<20x24xf32>
    %466 = tpu.matmul %463, %465, %cst_129 {dimension_numbers = #tpu.dot_dimension_numbers<[1], [0], [0], [1], [0, 0, 1, 1], [], []>} : vector<20x8xf32>, vector<8x24xf32>, vector<20x24xf32> -> vector<20x24xf32>
    %cst_130 = arith.constant 0.353553385 : f32
    %467 = vector.broadcast %cst_130 : f32 to vector<20x24xf32>
    %468 = arith.mulf %466, %467 : vector<20x24xf32>
    %469 = arith.addf %468, %7 : vector<20x24xf32>
    %cst_131 = arith.constant dense<0xFF800000> : vector<20xf32>
    %470 = vector.multi_reduction <maximumf>, %469, %cst_131 [1] : vector<20x24xf32> to vector<20xf32>
    %471 = vector.shape_cast %470 : vector<20xf32> to vector<20x1xf32>
    %472 = vector.broadcast %471 : vector<20x1xf32> to vector<20x24xf32>
    %473 = arith.subf %469, %472 : vector<20x24xf32>
    %474 = math.exp %473 : vector<20x24xf32>
    %cst_132 = arith.constant dense<0.000000e+00> : vector<20xf32>
    %475 = vector.multi_reduction <add>, %474, %cst_132 [1] : vector<20x24xf32> to vector<20xf32>
    %476 = vector.shape_cast %475 : vector<20xf32> to vector<20x1xf32>
    %477 = tpu.reciprocal %476 {approx = true} : vector<20x1xf32> -> vector<20x1xf32>
    %478 = vector.broadcast %477 : vector<20x1xf32> to vector<20x24xf32>
    %479 = arith.mulf %474, %478 : vector<20x24xf32>
    %480 = vector.extract_strided_slice %424 {offsets = [0, 16], sizes = [24, 8], strides = [1, 1]} : vector<24x32xf32> to vector<24x8xf32>
    %cst_133 = arith.constant dense<0.000000e+00> : vector<20x8xf32>
    %481 = tpu.matmul %479, %480, %cst_133 {dimension_numbers = #tpu.dot_dimension_numbers<[1], [0], [0], [1], [0, 0, 1, 1], [], []>} : vector<20x24xf32>, vector<24x8xf32>, vector<20x8xf32> -> vector<20x8xf32>
    %482 = vector.extract_strided_slice %416 {offsets = [0, 24], sizes = [20, 8], strides = [1, 1]} : vector<20x32xf32> to vector<20x8xf32>
    %483 = vector.extract_strided_slice %423 {offsets = [0, 24], sizes = [24, 8], strides = [1, 1]} : vector<24x32xf32> to vector<24x8xf32>
    %484 = tpu.transpose %483, [1, 0] : vector<24x8xf32> -> vector<8x24xf32>
    %cst_134 = arith.constant dense<0.000000e+00> : vector<20x24xf32>
    %485 = tpu.matmul %482, %484, %cst_134 {dimension_numbers = #tpu.dot_dimension_numbers<[1], [0], [0], [1], [0, 0, 1, 1], [], []>} : vector<20x8xf32>, vector<8x24xf32>, vector<20x24xf32> -> vector<20x24xf32>
    %cst_135 = arith.constant 0.353553385 : f32
    %486 = vector.broadcast %cst_135 : f32 to vector<20x24xf32>
    %487 = arith.mulf %485, %486 : vector<20x24xf32>
    %488 = arith.addf %487, %7 : vector<20x24xf32>
    %cst_136 = arith.constant dense<0xFF800000> : vector<20xf32>
    %489 = vector.multi_reduction <maximumf>, %488, %cst_136 [1] : vector<20x24xf32> to vector<20xf32>
    %490 = vector.shape_cast %489 : vector<20xf32> to vector<20x1xf32>
    %491 = vector.broadcast %490 : vector<20x1xf32> to vector<20x24xf32>
    %492 = arith.subf %488, %491 : vector<20x24xf32>
    %493 = math.exp %492 : vector<20x24xf32>
    %cst_137 = arith.constant dense<0.000000e+00> : vector<20xf32>
    %494 = vector.multi_reduction <add>, %493, %cst_137 [1] : vector<20x24xf32> to vector<20xf32>
    %495 = vector.shape_cast %494 : vector<20xf32> to vector<20x1xf32>
    %496 = tpu.reciprocal %495 {approx = true} : vector<20x1xf32> -> vector<20x1xf32>
    %497 = vector.broadcast %496 : vector<20x1xf32> to vector<20x24xf32>
    %498 = arith.mulf %493, %497 : vector<20x24xf32>
    %499 = vector.extract_strided_slice %424 {offsets = [0, 24], sizes = [24, 8], strides = [1, 1]} : vector<24x32xf32> to vector<24x8xf32>
    %cst_138 = arith.constant dense<0.000000e+00> : vector<20x8xf32>
    %500 = tpu.matmul %498, %499, %cst_138 {dimension_numbers = #tpu.dot_dimension_numbers<[1], [0], [0], [1], [0, 0, 1, 1], [], []>} : vector<20x24xf32>, vector<24x8xf32>, vector<20x8xf32> -> vector<20x8xf32>
    %501 = tpu.concatenate %443, %462, %481, %500 in 1 : vector<20x8xf32>, vector<20x8xf32>, vector<20x8xf32>, vector<20x8xf32> -> vector<20x32xf32>
    %502 = vector.extract_strided_slice %409 {offsets = [0, 96], sizes = [32, 32], strides = [1, 1]} : vector<32x128xbf16> to vector<32x32xbf16>
    %503 = arith.truncf %501 : vector<20x32xf32> to vector<20x32xbf16>
    %cst_139 = arith.constant dense<0.000000e+00> : vector<20x32xf32>
    %504 = tpu.matmul %503, %502, %cst_139 {dimension_numbers = #tpu.dot_dimension_numbers<[1], [0], [0], [1], [0, 0, 1, 1], [], []>} : vector<20x32xbf16>, vector<32x32xbf16>, vector<20x32xf32> -> vector<20x32xf32>
    %505 = vector.extract_strided_slice %410 {offsets = [0, 96], sizes = [1, 32], strides = [1, 1]} : vector<1x128xf32> to vector<1x32xf32>
    %506 = vector.broadcast %505 : vector<1x32xf32> to vector<20x32xf32>
    %507 = arith.addf %504, %506 : vector<20x32xf32>
    %508 = arith.addf %408, %507 : vector<20x32xf32>
    %509 = vector.extract_strided_slice %291 {offsets = [2, 0], sizes = [1, 32], strides = [1, 1]} : vector<6x32xf32> to vector<1x32xf32>
    %510 = vector.extract_strided_slice %291 {offsets = [3, 0], sizes = [1, 32], strides = [1, 1]} : vector<6x32xf32> to vector<1x32xf32>
    %cst_140 = arith.constant dense<0.000000e+00> : vector<20xf32>
    %511 = vector.multi_reduction <add>, %508, %cst_140 [1] : vector<20x32xf32> to vector<20xf32>
    %512 = vector.shape_cast %511 : vector<20xf32> to vector<20x1xf32>
    %cst_141 = arith.constant 3.200000e+01 : f32
    %513 = vector.broadcast %cst_141 : f32 to vector<20x1xf32>
    %514 = arith.divf %512, %513 : vector<20x1xf32>
    %515 = vector.broadcast %514 : vector<20x1xf32> to vector<20x32xf32>
    %516 = arith.subf %508, %515 : vector<20x32xf32>
    %517 = arith.mulf %516, %516 : vector<20x32xf32>
    %cst_142 = arith.constant dense<0.000000e+00> : vector<20xf32>
    %518 = vector.multi_reduction <add>, %517, %cst_142 [1] : vector<20x32xf32> to vector<20xf32>
    %519 = vector.shape_cast %518 : vector<20xf32> to vector<20x1xf32>
    %cst_143 = arith.constant 3.200000e+01 : f32
    %520 = vector.broadcast %cst_143 : f32 to vector<20x1xf32>
    %521 = arith.divf %519, %520 : vector<20x1xf32>
    %cst_144 = arith.constant 9.99999974E-6 : f32
    %522 = vector.broadcast %cst_144 : f32 to vector<20x1xf32>
    %523 = arith.addf %521, %522 : vector<20x1xf32>
    %524 = math.rsqrt %523 : vector<20x1xf32>
    %525 = vector.broadcast %524 : vector<20x1xf32> to vector<20x32xf32>
    %526 = arith.mulf %516, %525 : vector<20x32xf32>
    %527 = vector.broadcast %509 : vector<1x32xf32> to vector<20x32xf32>
    %528 = arith.mulf %526, %527 : vector<20x32xf32>
    %529 = vector.broadcast %510 : vector<1x32xf32> to vector<20x32xf32>
    %530 = arith.addf %528, %529 : vector<20x32xf32>
    %c256 = arith.constant 256 : index
    %c0_145 = arith.constant 0 : index
    %531 = vector.load %arg5[%c256, %c0_145] : memref<448x128xbf16, #tpu.memory_space<vmem>>, vector<32x64xbf16>
    %c33 = arith.constant 33 : index
    %c0_146 = arith.constant 0 : index
    %532 = vector.load %arg6[%c33, %c0_146] : memref<120x128xf32, #tpu.memory_space<vmem>>, vector<1x64xf32>
    %c352 = arith.constant 352 : index
    %c0_147 = arith.constant 0 : index
    %533 = vector.load %arg5[%c352, %c0_147] : memref<448x128xbf16, #tpu.memory_space<vmem>>, vector<64x32xbf16>
    %c41 = arith.constant 41 : index
    %c0_148 = arith.constant 0 : index
    %534 = vector.load %arg6[%c41, %c0_148] : memref<120x128xf32, #tpu.memory_space<vmem>>, vector<1x32xf32>
    %535 = arith.truncf %530 : vector<20x32xf32> to vector<20x32xbf16>
    %cst_149 = arith.constant dense<0.000000e+00> : vector<20x64xf32>
    %536 = tpu.matmul %535, %531, %cst_149 {dimension_numbers = #tpu.dot_dimension_numbers<[1], [0], [0], [1], [0, 0, 1, 1], [], []>} : vector<20x32xbf16>, vector<32x64xbf16>, vector<20x64xf32> -> vector<20x64xf32>
    %537 = vector.broadcast %532 : vector<1x64xf32> to vector<20x64xf32>
    %538 = arith.addf %536, %537 : vector<20x64xf32>
    %cst_150 = arith.constant 0.000000e+00 : f32
    %539 = vector.broadcast %cst_150 : f32 to vector<20x64xf32>
    %540 = arith.maximumf %538, %539 : vector<20x64xf32>
    %541 = arith.truncf %540 : vector<20x64xf32> to vector<20x64xbf16>
    %cst_151 = arith.constant dense<0.000000e+00> : vector<20x32xf32>
    %542 = tpu.matmul %541, %533, %cst_151 {dimension_numbers = #tpu.dot_dimension_numbers<[1], [0], [0], [1], [0, 0, 1, 1], [], []>} : vector<20x64xbf16>, vector<64x32xbf16>, vector<20x32xf32> -> vector<20x32xf32>
    %543 = vector.broadcast %534 : vector<1x32xf32> to vector<20x32xf32>
    %544 = arith.addf %542, %543 : vector<20x32xf32>
    %545 = arith.addf %530, %544 : vector<20x32xf32>
    %546 = vector.extract_strided_slice %291 {offsets = [4, 0], sizes = [1, 32], strides = [1, 1]} : vector<6x32xf32> to vector<1x32xf32>
    %547 = vector.extract_strided_slice %291 {offsets = [5, 0], sizes = [1, 32], strides = [1, 1]} : vector<6x32xf32> to vector<1x32xf32>
    %cst_152 = arith.constant dense<0.000000e+00> : vector<20xf32>
    %548 = vector.multi_reduction <add>, %545, %cst_152 [1] : vector<20x32xf32> to vector<20xf32>
    %549 = vector.shape_cast %548 : vector<20xf32> to vector<20x1xf32>
    %cst_153 = arith.constant 3.200000e+01 : f32
    %550 = vector.broadcast %cst_153 : f32 to vector<20x1xf32>
    %551 = arith.divf %549, %550 : vector<20x1xf32>
    %552 = vector.broadcast %551 : vector<20x1xf32> to vector<20x32xf32>
    %553 = arith.subf %545, %552 : vector<20x32xf32>
    %554 = arith.mulf %553, %553 : vector<20x32xf32>
    %cst_154 = arith.constant dense<0.000000e+00> : vector<20xf32>
    %555 = vector.multi_reduction <add>, %554, %cst_154 [1] : vector<20x32xf32> to vector<20xf32>
    %556 = vector.shape_cast %555 : vector<20xf32> to vector<20x1xf32>
    %cst_155 = arith.constant 3.200000e+01 : f32
    %557 = vector.broadcast %cst_155 : f32 to vector<20x1xf32>
    %558 = arith.divf %556, %557 : vector<20x1xf32>
    %cst_156 = arith.constant 9.99999974E-6 : f32
    %559 = vector.broadcast %cst_156 : f32 to vector<20x1xf32>
    %560 = arith.addf %558, %559 : vector<20x1xf32>
    %561 = math.rsqrt %560 : vector<20x1xf32>
    %562 = vector.broadcast %561 : vector<20x1xf32> to vector<20x32xf32>
    %563 = arith.mulf %553, %562 : vector<20x32xf32>
    %564 = vector.broadcast %546 : vector<1x32xf32> to vector<20x32xf32>
    %565 = arith.mulf %563, %564 : vector<20x32xf32>
    %566 = vector.broadcast %547 : vector<1x32xf32> to vector<20x32xf32>
    %567 = arith.addf %565, %566 : vector<20x32xf32>
    %c416 = arith.constant 416 : index
    %c0_157 = arith.constant 0 : index
    %568 = vector.load %arg5[%c416, %c0_157] : memref<448x128xbf16, #tpu.memory_space<vmem>>, vector<32x16xbf16>
    %c64 = arith.constant 64 : index
    %c0_158 = arith.constant 0 : index
    %569 = vector.load %arg6[%c64, %c0_158] : memref<120x128xf32, #tpu.memory_space<vmem>>, vector<1x16xf32>
    %570 = vector.extract_strided_slice %567 {offsets = [0, 0], sizes = [2, 32], strides = [1, 1]} : vector<20x32xf32> to vector<2x32xf32>
    %571 = vector.extract_strided_slice %567 {offsets = [10, 0], sizes = [2, 32], strides = [1, 1]} : vector<20x32xf32> to vector<2x32xf32>
    %572 = tpu.concatenate %570, %571 in 0 : vector<2x32xf32>, vector<2x32xf32> -> vector<4x32xf32>
    %573 = arith.truncf %572 : vector<4x32xf32> to vector<4x32xbf16>
    %cst_159 = arith.constant dense<0.000000e+00> : vector<4x16xf32>
    %574 = tpu.matmul %573, %568, %cst_159 {dimension_numbers = #tpu.dot_dimension_numbers<[1], [0], [0], [1], [0, 0, 1, 1], [], []>} : vector<4x32xbf16>, vector<32x16xbf16>, vector<4x16xf32> -> vector<4x16xf32>
    %575 = vector.broadcast %569 : vector<1x16xf32> to vector<4x16xf32>
    %576 = arith.addf %574, %575 : vector<4x16xf32>
    %577 = vector.extract_strided_slice %576 {offsets = [0, 0], sizes = [1, 8], strides = [1, 1]} : vector<4x16xf32> to vector<1x8xf32>
    %578 = vector.extract_strided_slice %576 {offsets = [2, 0], sizes = [1, 8], strides = [1, 1]} : vector<4x16xf32> to vector<1x8xf32>
    %579 = tpu.concatenate %577, %578 in 0 : vector<1x8xf32>, vector<1x8xf32> -> vector<2x8xf32>
    %580 = vector.extract_strided_slice %576 {offsets = [1, 8], sizes = [1, 8], strides = [1, 1]} : vector<4x16xf32> to vector<1x8xf32>
    %581 = vector.extract_strided_slice %576 {offsets = [3, 8], sizes = [1, 8], strides = [1, 1]} : vector<4x16xf32> to vector<1x8xf32>
    %582 = tpu.concatenate %580, %581 in 0 : vector<1x8xf32>, vector<1x8xf32> -> vector<2x8xf32>
    %cst_160 = arith.constant 5.000000e-01 : f32
    %583 = vector.broadcast %cst_160 : f32 to vector<2x8xf32>
    %584 = arith.mulf %583, %582 : vector<2x8xf32>
    %585 = math.exp %584 : vector<2x8xf32>
    %c0_161 = arith.constant 0 : index
    %c0_162 = arith.constant 0 : index
    %586 = vector.load %arg4[%c0_161, %c0_162] : memref<2x8xf32, #tpu.memory_space<vmem>>, vector<2x8xf32>
    %587 = arith.mulf %585, %586 : vector<2x8xf32>
    %588 = arith.addf %579, %587 : vector<2x8xf32>
    %589 = tpu.concatenate %579, %582, %588 in 1 : vector<2x8xf32>, vector<2x8xf32>, vector<2x8xf32> -> vector<2x24xf32>
    %c0_163 = arith.constant 0 : index
    %c0_164 = arith.constant 0 : index
    %590 = vector.load %arg7[%c0_163, %c0_164] : memref<2x24xf32, #tpu.memory_space<vmem>>, vector<2x24xf32>
    tpu.vector_store %arg7[%c0_163, %c0_164], %589 {strides = array<i32>} : memref<2x24xf32, #tpu.memory_space<vmem>>, vector<2x24xf32>,
    return
  }
  func.func @transform_0(%arg0: i32) -> (i32, i32) {
    %c0_i32 = arith.constant 0 : i32
    %c0_i32_0 = arith.constant 0 : i32
    %c0_i32_1 = arith.constant 0 : i32
    return %c0_i32, %c0_i32_0 : i32, i32
  }
  func.func @transform_1(%arg0: i32) -> (i32, i32) {
    %c0_i32 = arith.constant 0 : i32
    %c0_i32_0 = arith.constant 0 : i32
    %c0_i32_1 = arith.constant 0 : i32
    return %c0_i32, %c0_i32_0 : i32, i32
  }
  func.func @transform_2(%arg0: i32) -> (i32, i32) {
    %c0_i32 = arith.constant 0 : i32
    %c0_i32_0 = arith.constant 0 : i32
    %c0_i32_1 = arith.constant 0 : i32
    return %c0_i32, %c0_i32_0 : i32, i32
  }
  func.func @transform_3(%arg0: i32) -> (i32, i32) {
    %c0_i32 = arith.constant 0 : i32
    %c0_i32_0 = arith.constant 0 : i32
    %c0_i32_1 = arith.constant 0 : i32
    return %c0_i32, %c0_i32_0 : i32, i32
  }
  func.func @transform_4(%arg0: i32) -> (i32, i32) {
    %c0_i32 = arith.constant 0 : i32
    %c0_i32_0 = arith.constant 0 : i32
    %c0_i32_1 = arith.constant 0 : i32
    return %c0_i32, %c0_i32_0 : i32, i32
  }
  func.func @transform_5(%arg0: i32) -> (i32, i32) {
    %c0_i32 = arith.constant 0 : i32
    %c0_i32_0 = arith.constant 0 : i32
    %c0_i32_1 = arith.constant 0 : i32
    return %c0_i32, %c0_i32_0 : i32, i32
  }
  func.func @transform_6(%arg0: i32) -> (i32, i32) {
    %c0_i32 = arith.constant 0 : i32
    %c0_i32_0 = arith.constant 0 : i32
    %c0_i32_1 = arith.constant 0 : i32
    return %c0_i32, %c0_i32_0 : i32, i32
  }
}

</mosaic_0001>

<bundles_post_ra>
// kernel: data_encoder_forward.1
= control target key start
LH: loop header
LB: loop body
LE: loop exit
PB: predicated region body
PF: predicated region fallthrough
CT: control target
= control target key end

     0   :  { %11 = vsyncpa [#allocation3], 0  ;;  %s4298_s24 = smov [#allocation2]   ;;  %s4299_s26 = smov 64   ;;  %s5530_s0 = inlined_call_operand.vmem [shape: f32[20,69], index: 0, kind: input, shape index: {}]   ;;  %s5531_s1 = inlined_call_operand.vmem [shape: f32[24,32], index: 1, kind: input, shape index: {}]   ;;  %s5532_s2 = inlined_call_operand.vmem [shape: f32[1,24], index: 2, kind: input, shape index: {}]   ;;  %s5533_s3 = inlined_call_operand.vmem [shape: f32[2,8], index: 3, kind: input, shape index: {}]   ;;  %s5534_s4 = inlined_call_operand.hbm [shape: bf16[448,128], index: 4, kind: input, shape index: {}]   ;;  %s5535_s5 = inlined_call_operand.vmem [shape: f32[120,128], index: 5, kind: input, shape index: {}]   ;;  %s5536_s6 = inlined_call_operand.vmem [shape: f32[2,24], index: 6, kind: output, shape index: {}]  }
   0x1   :  { %s24_s23 = sshll.u32 %s5534_s4, 4  ;;  %s26_s25 = sshll.u32 %s4298_s24, 4  ;;  %s25_s23 = int_to_ptr.hbm [resolvable:$true] %s24_s23  ;;  %s27_s25 = int_to_ptr.vmem [resolvable:$true] %s26_s25 }
   0x2   :  { %s4300_s27 = smov 4  }
   0x3   :  { %32 = dma.hbm_to_vmem [thread:$0]  %s25_s23, 3584, %s27_s25, [#allocation3], %s4299_s26, %s4299_s26, %s4300_s27  }
   0x4   :  { %4296 = dma.done.wait [#allocation3], 3584  }
   0x5   :  { %4297 = vsyncadd [#allocation3], 4294963712  ;;  %vm5537_vm0 = vcmask 1041408   ;;  %vm106_vm1 = vcmask 1042432   ;;  %v4301_v0 = vmov 65535   ;;  %v3843_v7 = vld [vmem:[#allocation2 + $0x18] sm:$0xff] }
   0x6   :  { %v107_v1 = vsel %vm5537_vm0, 4294967295, %v4301_v0  ;;  %v68_v2 = vld [vmem:[#allocation2 + $0x20] sm:$0x7]  ;;  %v3842_v8 = vld [vmem:[#allocation2 + $0x10] sm:$0xff]  ;;  %v3841_v9 = vld [vmem:[#allocation2 + $0x8] sm:$0xff]  ;;  %vm98_vm2 = vcmask 564224  }
   0x7   :  { %v88_v3 = vunpack.c.l.b16 %v68_v2  ;;  %v108_v4 = vsel %vm106_vm1, %v107_v1, 0  ;;  %v3840_v10 = vld [vmem:[#allocation2] sm:$0xff]  ;;  %v58_v12 = vld [vmem:[%s5530_s0 + $0x8] sm:$0xff]  ;;  %v59_v14 = vld [vmem:[%s5530_s0 + $0x10] sm:$0xf]  ;;  %vm154_vm3 = vcmask 261120  }
   0x8   :  { %v57_v11 = vld [vmem:[%s5530_s0] sm:$0xff]  ;;  %v70_v15 = vpack.c.bf16 %v59_v14, %v59_v14  ;;  %v4367_v16 = vld [vmem:[#allocation2 + $0x38] sm:$0xff]  ;;  %v4370_v17 = vld [vmem:[#allocation2 + $0x30] sm:$0xff]  ;;  %s4302_s16 = smov 96   ;;  %s4303_s17 = smov 88   ;;  %vm285_vm4 = vcmask 1043456  }
   0x9   :  { %v93_v5 = vpack.c.b16 %v88_v3, %v88_v3  ;;  %v69_v13 = vpack.c.bf16 %v58_v12, %v57_v11  ;;  %167 = vmatpush.bf16.msra.mxu1 %v4367_v16  ;;  %v40_v19 = vld [vmem:[%s5535_s5] sm:$0xff]  ;;  %v41_v20 = vld [vmem:[%s5535_s5 + $0x8] sm:$0xff]  ;;  %v42_v26 = vld [vmem:[%s5535_s5 + $0x10] sm:$0xf]  ;;  %vm188_vm5 = vcmask 64512   ;;  %vm233_vm6 = vcmask 162816  }
   0xa   :  { %v4397_v30 = vld [vmem:[%s5535_s5 + $0x18] ss:$0 sm:$0xff]  ;;  %v4433_v43 = vld [vmem:[%s5535_s5 + $0x48] sm:$0xff]  ;;  %v4440_v48 = vld [vmem:[%s5535_s5 + $0x50] sm:$0xff]  ;;  %vm240_vm7 = vcmask 158720   ;;  %s4304_s24 = smov 120  }
   0xb   :  { %v110_v6 = vand.u32 %v108_v4, %v93_v5  ;;  %v4447_v53 = vld [vmem:[%s5535_s5 + $0x58] sm:$0xf]  ;;  %s4305_s25 = smov 72   ;;  %s4306_s27 = smov 80   ;;  %vm755_vm8 = vcmask 130048   ;;  %vm759_vm9 = vcmask 195584  }
   0xc   :  { %s4307_s4 = smov 104   ;;  %s4308_s28 = smov 112   ;;  %vm808_vm10 = vcmask 257024  }
   0xd   :  { %115 = vmatpush.bf16.msra.mxu0 %v110_v6  ;;  %168 = vmatpush.bf16.msra.mxu1 %v4370_v17  ;;  %s4309_s29 = smov 40   ;;  %s4310_s30 = smov 56  }
   0xe   :  { %s4311_s7 = smov 48   ;;  %s4312_s8 = smov 32  }
   0xf   :  { %s4313_s9 = smov 8   ;;  %s4314_s10 = smov 16  }
  0x10   :  { %s4315_s11 = smov 24  }
  0x11   :  { %116 = vmatpush.bf16.msra.mxu0 %v3843_v7 }
  0x15   :  { %117 = vmatpush.bf16.msra.mxu0 %v3842_v8 }
  0x19   :  { %118 = vmatpush.bf16.msra.mxu0 %v3841_v9 }
  0x1d   :  { %119 = vmatpush.bf16.msra.mxu0 %v3840_v10 }
  0x20   :  { %3569 = vmatmul.msk.bf16.vlgmr.msra.gmra.mxu0 %vm98_vm2, %v69_v13 }
  0x30   :  { %3570 = vmatmul.msk.bf16.gmra.mxu0 %vm98_vm2, %v70_v15 }
  0x9d   :  { %v121_v18 = vpop.f32.mrf.mxu0 }
  0x9e   :  { %v4379_v22 = vadd.f32 %v121_v18, %v40_v19 }
  0xa5   :  { %v123_v21 = vpop.f32.mrf.mxu0 }
  0xa6   :  { %v4381_v23 = vadd.f32 %v123_v21, %v41_v20 }
  0xa8   :  { %v139_v24 = vpack.c.bf16 %v4381_v23, %v4379_v22 }
  0xaa   :  { %3579 = vmatmul.msk.bf16.vlgmr.msra.gmra.mxu1 %vm154_vm3, %v139_v24 }
  0xad   :  { %v126_v25 = vpop.f32.mrf.mxu0 }
  0xae   :  { %v4389_v27 = vadd.f32 %v126_v25, %v42_v26 }
  0xb0   :  { %v140_v29 = vpack.c.bf16 %v4389_v27, %v4389_v27 }
  0xb5   :  { %v128_v28 = vpop.f32.mrf.mxu0 }
  0xba   :  { %3580 = vmatmul.msk.bf16.gmra.mxu1 %vm154_vm3, %v140_v29 }
 0x127   :  { %v170_v31 = vpop.f32.mrf.mxu1 }
 0x128   :  { %v4400_v32 = vadd.f32 %v4397_v30, %v170_v31 }
 0x12a   :  { %182 = vrot.lane.b32.xlu1 %v4400_v32, %s4302_s16 }
 0x12f   :  { %v172_v33 = vpop.f32.mrf.mxu1 }
 0x130   :  { %v4412_v37 = vadd.f32 %v4397_v30, %v172_v33 }
 0x132   :  { %v4457_v57 = vpack.i.bf16 %v4400_v32, %v4412_v37 }
 0x137   :  { %v175_v34 = vpop.f32.mrf.mxu1 }
 0x138   :  { %v4405_v35 = vadd.f32 %v4397_v30, %v175_v34 }
 0x13a   :  { %272 = vrot.lane.b32.xlu2 %v4405_v35, %s4299_s26  ;;  %186 = vrot.lane.b32.xlu0 %v4405_v35, %s4302_s16 }
 0x13f   :  { %v177_v36 = vpop.f32.mrf.mxu1 }
 0x142   :  { %184 = vrot.lane.b32.xlu0 %v4412_v37, %s4302_s16 }
 0x14a   :  { %324 = vrot.lane.b32.xlu0 %v4405_v35, %s4303_s17 }
 0x152   :  { %320 = vrot.lane.b32.xlu0 %v4400_v32, %s4303_s17 }
 0x194   :  { %v273_v38 = vpop.permute.xlu2 %272 }
 0x195   :  { %3587 = vmatpush.msk.msra.mxu3 %vm285_vm4, %v273_v38 }
 0x19c   :  { %v183_v41 = vpop.permute.xlu1 %182 }
 0x1ac   :  { %v187_v39 = vpop.permute.xlu0 %186 }
 0x1ad   :  { %3581 = vmatpush.xpose.msk.msra.mxu2 %vm188_vm5, %v187_v39 }
 0x1b4   :  { %v185_v40 = vpop.permute.xlu0 %184 }
 0x1b5   :  { %3582 = vmatpush.xpose.msk.msra.mxu2 %vm188_vm5, %v185_v40 }
 0x1b9   :  { %3583 = vmatpush.xpose.msk.msra.mxu2 %vm188_vm5, %v183_v41 }
 0x1bc   :  { %3584 = vmatmul.msk.f32.vlgmr.msra.gmra.mxu2 %vm188_vm5, %v4400_v32  ;;  %v325_v10 = vpop.permute.xlu0 %324 }
 0x1c4   :  { %3585 = vmatmul.msk.f32.gmra.mxu2 %vm188_vm5, %v4412_v37  ;;  %v321_v14 = vpop.permute.xlu0 %320 }
 0x1cc   :  { %3586 = vmatmul.msk.f32.gmra.mxu2 %vm188_vm5, %v4405_v35 }
 0x23f   :  { %v218_v42 = vpop.f32.mrf.mxu2 }
 0x240   :  { %v227_v44 = vmul.f32 0.35355338, %v218_v42 }
 0x242   :  { %v230_v45 = vadd.f32 %v227_v44, %v4433_v43 }
 0x244   :  { %v234_v46 = vsel %vm233_vm6, %v230_v45, -inf }
 0x245   :  { %235 = vmax.xlane.f32.xlu1 %v234_v46 }
 0x247   :  { %v221_v47 = vpop.f32.mrf.mxu2 }
 0x248   :  { %v228_v49 = vmul.f32 0.35355338, %v221_v47 }
 0x24a   :  { %v231_v50 = vadd.f32 %v228_v49, %v4440_v48 }
 0x24c   :  { %v237_v51 = vsel %vm233_vm6, %v231_v50, -inf }
 0x24d   :  { %238 = vmax.xlane.f32.xlu2 %v237_v51 }
 0x24f   :  { %v224_v52 = vpop.f32.mrf.mxu2 }
 0x250   :  { %v229_v54 = vmul.f32 0.35355338, %v224_v52 }
 0x252   :  { %v232_v55 = vadd.f32 %v229_v54, %v4447_v53 }
 0x254   :  { %v241_v56 = vsel %vm240_vm7, %v232_v55, -inf }
 0x255   :  { %242 = vmax.xlane.f32.xlu2 %v241_v56 }
 0x25e   :  { %322 = vrot.lane.b32.xlu1 %v4412_v37, %s4303_s17 }
 0x266   :  { %314 = vrot.lane.b32.xlu1 %v4400_v32, %s4304_s24 }
 0x26d   :  { %3889 = vrot.lane.b32.xlu2 %v4457_v57, %s4299_s26 }
 0x26e   :  { %318 = vrot.lane.b32.xlu1 %v4405_v35, %s4304_s24 }
 0x276   :  { %588 = vrot.lane.b32.xlu1 %v4400_v32, %s4305_s25 }
 0x2b8   :  { %v236_v58 = vpop.xlane.xlu1 %235 }
 0x2b9   :  { %v244_v59 = vsub.f32 %v230_v45, %v236_v58 }
 0x2bb   :  { %v247_v60 = vmul.f32 1.442695, %v244_v59 }
 0x2bd   :  { %4037 = vpow2.f32 %v247_v60 }
 0x2c0   :  { %v239_v61 = vpop.xlane.xlu2 %238 }
 0x2c1   :  { %v245_v62 = vsub.f32 %v231_v50, %v239_v61 }
 0x2c3   :  { %v4038_v63 = vpop.eup %4037  ;;  %v249_v0 = vmul.f32 1.442695, %v245_v62 }
 0x2c4   :  { %v253_v1 = vsel %vm233_vm6, %v4038_v63, 0.0 }
 0x2c5   :  { %4039 = vpow2.f32 %v249_v0  ;;  %254 = vadd.xlane.f32.xlu0 %v253_v1 }
 0x2c8   :  { %v243_v2 = vpop.xlane.xlu2 %242 }
 0x2c9   :  { %v246_v3 = vsub.f32 %v232_v55, %v243_v2 }
 0x2cb   :  { %v4040_v4 = vpop.eup %4039  ;;  %v251_v5 = vmul.f32 1.442695, %v246_v3 }
 0x2cc   :  { %v256_v6 = vsel %vm233_vm6, %v4040_v4, 0.0 }
 0x2cd   :  { %4041 = vpow2.f32 %v251_v5  ;;  %257 = vadd.xlane.f32.xlu2 %v256_v6 }
 0x2d0   :  { %v3890_v7 = vpop.permute.xlu2 %3889  ;;  %v323_v13 = vpop.permute.xlu1 %322 }
 0x2d1   :  { %v3891_v8 = vunpack.i.l.bf16 %v3890_v7  ;;  %v3892_v11 = vunpack.i.h.bf16 %v3890_v7 }
 0x2d3   :  { %v4042_v9 = vpop.eup %4041  ;;  %302 = vmatpush.msra.mxu3 %v3891_v8 }
 0x2d4   :  { %v259_v12 = vsel %vm240_vm7, %v4042_v9, 0.0 }
 0x2d5   :  { %260 = vadd.xlane.f32.xlu1 %v259_v12  ;;  %303 = vmatpush.msra.mxu3 %v3892_v11 }
 0x2d7   :  { %3591 = vmatpush.xpose.msk.msrb.mxu3 %vm188_vm5, %v325_v10 }
 0x2d8   :  { %v315_v15 = vpop.permute.xlu1 %314 }
 0x2d9   :  { %316 = vrot.lane.b32.xlu0 %v4412_v37, %s4304_s24 }
 0x2db   :  { %3592 = vmatpush.xpose.msk.msrb.mxu3 %vm188_vm5, %v323_v13 }
 0x2df   :  { %3593 = vmatpush.xpose.msk.msrb.mxu3 %vm188_vm5, %v321_v14 }
 0x2e0   :  { %v319_v18 = vpop.permute.xlu1 %318 }
 0x2e1   :  { %590 = vrot.lane.b32.xlu0 %v4412_v37, %s4305_s25 }
 0x2e5   :  { %592 = vrot.lane.b32.xlu2 %v4405_v35, %s4305_s25 }
 0x2e8   :  { %v589_v21 = vpop.permute.xlu1 %588 }
 0x2e9   :  { %458 = vrot.lane.b32.xlu0 %v4405_v35, %s4306_s27 }
 0x2ed   :  { %454 = vrot.lane.b32.xlu2 %v4400_v32, %s4306_s27 }
 0x2ee   :  { %582 = vrot.lane.b32.xlu1 %v4400_v32, %s4307_s4 }
 0x2f1   :  { %456 = vrot.lane.b32.xlu0 %v4412_v37, %s4306_s27 }
 0x2f5   :  { %450 = vrot.lane.b32.xlu2 %v4412_v37, %s4308_s28 }
 0x2f6   :  { %584 = vrot.lane.b32.xlu1 %v4412_v37, %s4307_s4 }
 0x2f9   :  { %448 = vrot.lane.b32.xlu0 %v4400_v32, %s4308_s28 }
 0x2fe   :  { %586 = vrot.lane.b32.xlu1 %v4405_v35, %s4307_s4 }
 0x301   :  { %452 = vrot.lane.b32.xlu0 %v4405_v35, %s4308_s28 }
 0x338   :  { %v255_v19 = vpop.xlane.xlu0 %254 }
 0x339   :  { %4043 = vrcp.f32 %v255_v19 }
 0x33f   :  { %v4044_v20 = vpop.eup %4043 }
 0x340   :  { %v258_v24 = vpop.xlane.xlu2 %257  ;;  %v265_v25 = vmul.f32 %v4044_v20, %v4038_v63 }
 0x341   :  { %4045 = vrcp.f32 %v258_v24 }
 0x342   :  { %3588 = vmatmul.msk.f32.vlgmr.msra.gmra.mxu3 %vm233_vm6, %v265_v25 }
 0x347   :  { %v4046_v26 = vpop.eup %4045 }
 0x348   :  { %v261_v28 = vpop.xlane.xlu1 %260  ;;  %v593_v29 = vpop.permute.xlu2 %592  ;;  %v266_v31 = vmul.f32 %v4046_v26, %v4040_v4 }
 0x349   :  { %4047 = vrcp.f32 %v261_v28  ;;  %3611 = vmatpush.xpose.msk.msra.mxu3 %vm188_vm5, %v593_v29 }
 0x34a   :  { %3589 = vmatmul.msk.f32.gmra.mxu3 %vm233_vm6, %v266_v31 }
 0x34b   :  { %v317_v32 = vpop.permute.xlu0 %316 }
 0x34f   :  { %v4048_v33 = vpop.eup %4047 }
 0x350   :  { %v267_v34 = vmul.f32 %v4048_v33, %v4042_v9  ;;  %v455_v38 = vpop.permute.xlu2 %454 }
 0x352   :  { %3590 = vmatmul.msk.f32.gmra.mxu3 %vm233_vm6, %v267_v34 }
 0x353   :  { %v591_v36 = vpop.permute.xlu0 %590 }
 0x354   :  { %3612 = vmatpush.xpose.msk.msra.mxu3 %vm188_vm5, %v591_v36 }
 0x358   :  { %3613 = vmatpush.xpose.msk.msra.mxu3 %vm188_vm5, %v589_v21  ;;  %v451_v40 = vpop.permute.xlu2 %450 }
 0x35a   :  { %3594 = vmatmul.msk.f32.vlgmr.msrb.gmra.mxu3 %vm188_vm5, %v315_v15 }
 0x35b   :  { %v459_v37 = vpop.permute.xlu0 %458 }
 0x35c   :  { %3601 = vmatpush.xpose.msk.msrb.mxu0 %vm188_vm5, %v459_v37  ;;  %3866 = vmatpush.xpose.msk.msrb.mxu1 %vm188_vm5, %v459_v37 }
 0x360   :  { %v583_v42 = vpop.permute.xlu1 %582 }
 0x362   :  { %3595 = vmatmul.msk.f32.gmra.mxu3 %vm188_vm5, %v317_v32 }
 0x363   :  { %v457_v39 = vpop.permute.xlu0 %456 }
 0x364   :  { %3602 = vmatpush.xpose.msk.msrb.mxu0 %vm188_vm5, %v457_v39  ;;  %3867 = vmatpush.xpose.msk.msrb.mxu1 %vm188_vm5, %v457_v39 }
 0x368   :  { %3603 = vmatpush.xpose.msk.msrb.mxu0 %vm188_vm5, %v455_v38  ;;  %3868 = vmatpush.xpose.msk.msrb.mxu1 %vm188_vm5, %v455_v38  ;;  %v585_v45 = vpop.permute.xlu1 %584 }
 0x36a   :  { %3596 = vmatmul.msk.f32.gmra.mxu3 %vm188_vm5, %v319_v18 }
 0x36b   :  { %v449_v41 = vpop.permute.xlu0 %448  ;;  %3605 = vmatmul.msk.f32.vlgmr.msrb.gmra.mxu1 %vm188_vm5, %v451_v40 }
 0x36c   :  { %3604 = vmatmul.msk.f32.vlgmr.msrb.gmra.mxu0 %vm188_vm5, %v449_v41 }
 0x370   :  { %v587_v46 = vpop.permute.xlu1 %586 }
 0x372   :  { %3614 = vmatmul.msk.f32.vlgmr.msra.gmra.mxu3 %vm188_vm5, %v583_v42 }
 0x373   :  { %v453_v44 = vpop.permute.xlu0 %452 }
 0x374   :  { %3606 = vmatmul.msk.f32.gmra.mxu1 %vm188_vm5, %v453_v44 }
 0x37a   :  { %3615 = vmatmul.msk.f32.gmra.mxu3 %vm188_vm5, %v585_v45 }
 0x382   :  { %3616 = vmatmul.msk.f32.gmra.mxu3 %vm188_vm5, %v587_v46 }
 0x3c5   :  { %v4516_v47 = vpop.f32.mrf.mxu3 }
 0x3cd   :  { %v4518_v49 = vpop.f32.mrf.mxu3 }
 0x3d5   :  { %v4520_v50 = vpop.f32.mrf.mxu3 }
 0x3dd   :  { %v355_v51 = vpop.f32.mrf.mxu3 }
 0x3de   :  { %v364_v61 = vmul.f32 0.35355338, %v355_v51 }
 0x3e0   :  { %v367_v2 = vadd.f32 %v364_v61, %v4433_v43 }
 0x3e2   :  { %v370_v6 = vsel %vm233_vm6, %v367_v2, -inf }
 0x3e5   :  { %v358_v58 = vpop.f32.mrf.mxu3 }
 0x3e6   :  { %v365_v63 = vmul.f32 0.35355338, %v358_v58 }
 0x3e8   :  { %v492_v52 = vpop.f32.mrf.mxu1  ;;  %v368_v4 = vadd.f32 %v365_v63, %v4440_v48 }
 0x3e9   :  { %v499_v54 = vmul.f32 0.35355338, %v492_v52  ;;  %v489_v55 = vpop.f32.mrf.mxu0 }
 0x3ea   :  { %v498_v56 = vmul.f32 0.35355338, %v489_v55  ;;  %v373_v8 = vsel %vm233_vm6, %v368_v4, -inf }
 0x3eb   :  { %v4523_v59 = vadd.f32 %v499_v54, %v4440_v48 }
 0x3ec   :  { %v501_v60 = vadd.f32 %v498_v56, %v4433_v43 }
 0x3ed   :  { %v507_v62 = vsel %vm233_vm6, %v4523_v59, -inf  ;;  %v361_v9 = vpop.f32.mrf.mxu3 }
 0x3ee   :  { %508 = vmax.xlane.f32.xlu2 %v507_v62  ;;  %v504_v0 = vsel %vm233_vm6, %v501_v60, -inf  ;;  %v366_v11 = vmul.f32 0.35355338, %v361_v9 }
 0x3ef   :  { %505 = vmax.xlane.f32.xlu1 %v504_v0 }
 0x3f0   :  { %v369_v14 = vadd.f32 %v366_v11, %v4447_v53 }
 0x3f1   :  { %v495_v1 = vpop.f32.mrf.mxu1 }
 0x3f2   :  { %v500_v3 = vmul.f32 0.35355338, %v495_v1  ;;  %v376_v19 = vsel %vm240_vm7, %v369_v14, -inf }
 0x3f4   :  { %v4532_v5 = vadd.f32 %v500_v3, %v4447_v53 }
 0x3f5   :  { %v623_v10 = vpop.f32.mrf.mxu3 }
 0x3f6   :  { %371 = vmax.xlane.f32.xlu2 %v370_v6  ;;  %v510_v7 = vsel %vm240_vm7, %v4532_v5, -inf  ;;  %v632_v12 = vmul.f32 0.35355338, %v623_v10 }
 0x3f7   :  { %511 = vmax.xlane.f32.xlu0 %v510_v7  ;;  %374 = vmax.xlane.f32.xlu1 %v373_v8 }
 0x3f8   :  { %v635_v15 = vadd.f32 %v632_v12, %v4433_v43 }
 0x3fa   :  { %v638_v20 = vsel %vm233_vm6, %v635_v15, -inf }
 0x3fd   :  { %v626_v13 = vpop.f32.mrf.mxu3 }
 0x3fe   :  { %v633_v18 = vmul.f32 0.35355338, %v626_v13 }
 0x400   :  { %v4549_v21 = vadd.f32 %v633_v18, %v4440_v48 }
 0x402   :  { %v641_v26 = vsel %vm233_vm6, %v4549_v21, -inf }
 0x405   :  { %v629_v24 = vpop.f32.mrf.mxu3 }
 0x406   :  { %v634_v25 = vmul.f32 0.35355338, %v629_v24 }
 0x408   :  { %v637_v28 = vadd.f32 %v634_v25, %v4447_v53 }
 0x40a   :  { %v644_v43 = vsel %vm240_vm7, %v637_v28, -inf }
 0x40b   :  { %675 = vrot.lane.b32.xlu0 %v4405_v35, %s4309_s29 }
 0x40e   :  { %407 = vrot.lane.b32.xlu2 %v4405_v35, %s4310_s30 }
 0x410   :  { %3894 = vrot.lane.b32.xlu1 %v4457_v57, %s4310_s30 }
 0x435   :  { %377 = vmax.xlane.f32.xlu0 %v376_v19 }
 0x437   :  { %639 = vmax.xlane.f32.xlu2 %v638_v20 }
 0x43d   :  { %642 = vmax.xlane.f32.xlu0 %v641_v26 }
 0x445   :  { %645 = vmax.xlane.f32.xlu0 %v644_v43 }
 0x461   :  { %v4555_v29 = vpop.xlane.xlu2 %508 }
 0x462   :  { %v506_v31 = vpop.xlane.xlu1 %505 }
 0x463   :  { %v513_v32 = vsub.f32 %v501_v60, %v506_v31 }
 0x465   :  { %v516_v33 = vmul.f32 1.442695, %v513_v32 }
 0x467   :  { %4049 = vpow2.f32 %v516_v33 }
 0x469   :  { %v372_v34 = vpop.xlane.xlu2 %371 }
 0x46a   :  { %v379_v48 = vsub.f32 %v367_v2, %v372_v34  ;;  %v375_v36 = vpop.xlane.xlu1 %374  ;;  %v512_v51 = vpop.xlane.xlu0 %511 }
 0x46b   :  { %v380_v37 = vsub.f32 %v368_v4, %v375_v36  ;;  %v515_v18 = vsub.f32 %v4532_v5, %v512_v51 }
 0x46c   :  { %v382_v38 = vmul.f32 1.442695, %v379_v48 }
 0x46d   :  { %v4557_v39 = vpop.eup %4049  ;;  %v384_v40 = vmul.f32 1.442695, %v380_v37  ;;  %v520_v24 = vmul.f32 1.442695, %v515_v18 }
 0x46e   :  { %4051 = vpow2.f32 %v382_v38  ;;  %v522_v53 = vsel %vm233_vm6, %v4557_v39, 0.0 }
 0x46f   :  { %523 = vadd.xlane.f32.xlu1 %v522_v53  ;;  %4053 = vpow2.f32 %v384_v40 }
 0x471   :  { %v408_v41 = vpop.permute.xlu2 %407 }
 0x472   :  { %3597 = vmatpush.msk.msrb.mxu2 %vm285_vm4, %v408_v41 }
 0x474   :  { %v4052_v42 = vpop.eup %4051 }
 0x475   :  { %v388_v44 = vsel %vm233_vm6, %v4052_v42, 0.0  ;;  %v4563_v45 = vpop.eup %4053 }
 0x476   :  { %v391_v46 = vsel %vm233_vm6, %v4563_v45, 0.0 }
 0x477   :  { %389 = vadd.xlane.f32.xlu1 %v388_v44  ;;  %392 = vadd.xlane.f32.xlu0 %v391_v46 }
 0x47d   :  { %v676_v56 = vpop.permute.xlu0 %675 }
 0x482   :  { %v3895_v52 = vpop.permute.xlu1 %3894 }
 0x483   :  { %v3896_v54 = vunpack.i.l.bf16 %v3895_v52  ;;  %v3897_v55 = vunpack.i.h.bf16 %v3895_v52 }
 0x485   :  { %436 = vmatpush.msrb.mxu2 %v3896_v54 }
 0x487   :  { %437 = vmatpush.msrb.mxu2 %v3897_v55 }
 0x489   :  { %3617 = vmatpush.msk.msra.mxu2 %vm285_vm4, %v676_v56 }
 0x490   :  { %3904 = vrot.lane.b32.xlu1 %v4457_v57, %s4311_s7 }
 0x4a8   :  { %v378_v58 = vpop.xlane.xlu0 %377 }
 0x4a9   :  { %v381_v60 = vsub.f32 %v369_v14, %v378_v58 }
 0x4aa   :  { %v640_v61 = vpop.xlane.xlu2 %639 }
 0x4ab   :  { %v386_v62 = vmul.f32 1.442695, %v381_v60  ;;  %v647_v63 = vsub.f32 %v635_v15, %v640_v61  ;;  %v514_v15 = vsub.f32 %v4523_v59, %v4555_v29 }
 0x4ad   :  { %4055 = vpow2.f32 %v386_v62  ;;  %v650_v0 = vmul.f32 1.442695, %v647_v63  ;;  %v518_v19 = vmul.f32 1.442695, %v514_v15 }
 0x4af   :  { %4057 = vpow2.f32 %v650_v0 }
 0x4b0   :  { %v643_v1 = vpop.xlane.xlu0 %642 }
 0x4b1   :  { %v648_v12 = vsub.f32 %v4549_v21, %v643_v1 }
 0x4b3   :  { %v4056_v2 = vpop.eup %4055  ;;  %v652_v14 = vmul.f32 1.442695, %v648_v12 }
 0x4b4   :  { %v394_v3 = vsel %vm240_vm7, %v4056_v2, 0.0 }
 0x4b5   :  { %v4571_v4 = vpop.eup %4057  ;;  %395 = vadd.xlane.f32.xlu0 %v394_v3 }
 0x4b6   :  { %v656_v6 = vsel %vm233_vm6, %v4571_v4, 0.0 }
 0x4b7   :  { %657 = vadd.xlane.f32.xlu2 %v656_v6 }
 0x4b8   :  { %v646_v7 = vpop.xlane.xlu0 %645 }
 0x4b9   :  { %v649_v8 = vsub.f32 %v637_v28, %v646_v7 }
 0x4bb   :  { %v654_v9 = vmul.f32 1.442695, %v649_v8 }
 0x4bd   :  { %4059 = vpow2.f32 %v654_v9 }
 0x4be   :  { %4061 = vpow2.f32 %v652_v14 }
 0x4c3   :  { %v4575_v10 = vpop.eup %4059 }
 0x4c4   :  { %v662_v11 = vsel %vm240_vm7, %v4575_v10, 0.0 }
 0x4c5   :  { %663 = vadd.xlane.f32.xlu1 %v662_v11 }
 0x4c9   :  { %3899 = vrot.lane.b32.xlu0 %v4457_v57, %s4309_s29  ;;  %v4062_v57 = vpop.eup %4061 }
 0x4cf   :  { %541 = vrot.lane.b32.xlu2 %v4405_v35, %s4311_s7  ;;  %v659_v35 = vsel %vm233_vm6, %v4062_v57, 0.0 }
 0x4de   :  { %765 = vrot.lane.b32.xlu1 %v4370_v17, %s4312_s8 }
 0x4e2   :  { %v524_v13 = vpop.xlane.xlu1 %523 }
 0x4ea   :  { %v390_v20 = vpop.xlane.xlu1 %389  ;;  %v393_v25 = vpop.xlane.xlu0 %392 }
 0x4eb   :  { %4063 = vrcp.f32 %v390_v20 }
 0x4ec   :  { %4065 = vpow2.f32 %v518_v19 }
 0x4ed   :  { %4067 = vpow2.f32 %v520_v24 }
 0x4ee   :  { %4069 = vrcp.f32 %v393_v25 }
 0x4f1   :  { %v4064_v26 = vpop.eup %4063 }
 0x4f2   :  { %v400_v21 = vmul.f32 %v4064_v26, %v4052_v42  ;;  %v4066_v28 = vpop.eup %4065 }
 0x4f3   :  { %660 = vadd.xlane.f32.xlu0 %v659_v35  ;;  %v4068_v59 = vpop.eup %4067  ;;  %v525_v43 = vsel %vm233_vm6, %v4066_v28, 0.0 }
 0x4f4   :  { %3598 = vmatmul.msk.f32.vlgmr.msrb.gmra.mxu2 %vm233_vm6, %v400_v21  ;;  %v4070_v5 = vpop.eup %4069  ;;  %v528_v29 = vsel %vm240_vm7, %v4068_v59, 0.0 }
 0x4f5   :  { %v401_v31 = vmul.f32 %v4070_v5, %v4563_v45 }
 0x4f8   :  { %526 = vadd.xlane.f32.xlu2 %v525_v43 }
 0x4fb   :  { %529 = vadd.xlane.f32.xlu0 %v528_v29 }
 0x4fc   :  { %3599 = vmatmul.msk.f32.gmra.mxu2 %vm233_vm6, %v401_v31 }
 0x502   :  { %v3905_v48 = vpop.permute.xlu1 %3904 }
 0x503   :  { %v3906_v38 = vunpack.i.l.bf16 %v3905_v48  ;;  %v3907_v40 = vunpack.i.h.bf16 %v3905_v48 }
 0x50f   :  { %767 = vrot.lane.b32.xlu0 %v4367_v16, %s4312_s8 }
 0x528   :  { %v396_v32 = vpop.xlane.xlu0 %395 }
 0x529   :  { %4071 = vrcp.f32 %v396_v32 }
 0x52a   :  { %v658_v33 = vpop.xlane.xlu2 %657  ;;  %4073 = vrcp.f32 %v524_v13 }
 0x52b   :  { %4075 = vrcp.f32 %v658_v33 }
 0x52f   :  { %v4072_v34 = vpop.eup %4071 }
 0x530   :  { %v402_v36 = vmul.f32 %v4072_v34, %v4056_v2  ;;  %v4074_v17 = vpop.eup %4073 }
 0x531   :  { %v534_v53 = vmul.f32 %v4074_v17, %v4557_v39  ;;  %v4076_v41 = vpop.eup %4075 }
 0x532   :  { %v542_v37 = vpop.permute.xlu2 %541  ;;  %3600 = vmatmul.msk.f32.gmra.mxu2 %vm233_vm6, %v402_v36  ;;  %v668_v45 = vmul.f32 %v4076_v41, %v4571_v4 }
 0x533   :  { %3607 = vmatpush.msk.msra.mxu0 %vm285_vm4, %v542_v37  ;;  %v4630_v37 = vld [vmem:[#allocation2 + $0x48] sm:$0xff] }
 0x535   :  { %570 = vmatpush.msra.mxu0 %v3906_v38 }
 0x537   :  { %571 = vmatpush.msra.mxu0 %v3907_v40 }
 0x538   :  { %3608 = vmatmul.msk.f32.vlgmr.msra.gmra.mxu0 %vm233_vm6, %v534_v53  ;;  %v664_v51 = vpop.xlane.xlu1 %663  ;;  %v4634_v53 = vld [vmem:[#allocation2 + $0x40] sm:$0xff] }
 0x539   :  { %916 = vmatpush.bf16.msrb.mxu0 %v4630_v37 }
 0x53b   :  { %v3900_v16 = vpop.permute.xlu0 %3899 }
 0x53c   :  { %v3901_v42 = vunpack.i.l.bf16 %v3900_v16  ;;  %v3902_v44 = vunpack.i.h.bf16 %v3900_v16 }
 0x53d   :  { %917 = vmatpush.bf16.msrb.mxu0 %v4634_v53 }
 0x53e   :  { %704 = vmatpush.msra.mxu2 %v3901_v42 }
 0x540   :  { %705 = vmatpush.msra.mxu2 %v3902_v44 }
 0x541   :  { %3618 = vmatmul.msk.f32.vlgmr.msra.gmra.mxu2 %vm233_vm6, %v668_v45 }
 0x550   :  { %v766_v14 = vpop.permute.xlu1 %765 }
 0x566   :  { %v661_v46 = vpop.xlane.xlu0 %660 }
 0x567   :  { %4077 = vrcp.f32 %v661_v46 }
 0x56b   :  { %v527_v52 = vpop.xlane.xlu2 %526 }
 0x56c   :  { %4079 = vrcp.f32 %v527_v52 }
 0x56d   :  { %v4078_v39 = vpop.eup %4077  ;;  %4081 = vrcp.f32 %v664_v51 }
 0x56e   :  { %v669_v54 = vmul.f32 %v4078_v39, %v4062_v57  ;;  %v530_v55 = vpop.xlane.xlu0 %529  ;;  %v4316_v39 = vmov 32.0  }
 0x56f   :  { %4083 = vrcp.f32 %v530_v55 }
 0x570   :  { %3619 = vmatmul.msk.f32.gmra.mxu2 %vm233_vm6, %v669_v54  ;;  %4085 = vrcp.f32 %v4316_v39 }
 0x572   :  { %v4080_v56 = vpop.eup %4079 }
 0x573   :  { %v4082_v58 = vpop.eup %4081  ;;  %v535_v60 = vmul.f32 %v4080_v56, %v4066_v28 }
 0x574   :  { %v670_v61 = vmul.f32 %v4082_v58, %v4575_v10 }
 0x575   :  { %3609 = vmatmul.msk.f32.gmra.mxu0 %vm233_vm6, %v535_v60  ;;  %v4084_v63 = vpop.eup %4083 }
 0x576   :  { %v536_v0 = vmul.f32 %v4084_v63, %v4068_v59 }
 0x577   :  { %v439_v62 = vpop.f32.mrf.mxu2 }
 0x578   :  { %3620 = vmatmul.msk.f32.gmra.mxu2 %vm233_vm6, %v670_v61 }
 0x57d   :  { %3610 = vmatmul.msk.f32.gmra.mxu0 %vm233_vm6, %v536_v0 }
 0x57f   :  { %v442_v1 = vpop.f32.mrf.mxu2 }
 0x580   :  { %v3913_v2 = vpack.i.bf16 %v442_v1, %v439_v62 }
 0x581   :  { %v768_v3 = vpop.permute.xlu0 %767 }
 0x582   :  { %3914 = vrot.lane.b32.xlu0 %v3913_v2, %s4313_s9  ;;  %787 = vmatpush.bf16.msra.mxu1 %v768_v3 }
 0x586   :  { %788 = vmatpush.bf16.msra.mxu1 %v766_v14 }
 0x5b5   :  { %v445_v4 = vpop.f32.mrf.mxu2  ;;  %v573_v6 = vpop.f32.mrf.mxu0 }
 0x5c4   :  { %v707_v7 = vpop.f32.mrf.mxu2 }
 0x5f2   :  { %v576_v8 = vpop.f32.mrf.mxu0 }
 0x5f3   :  { %v3908_v9 = vpack.i.bf16 %v576_v8, %v573_v6  ;;  %v710_v10 = vpop.f32.mrf.mxu2 }
 0x5f4   :  { %v3918_v11 = vpack.i.bf16 %v710_v10, %v707_v7  ;;  %v3915_v15 = vpop.permute.xlu0 %3914 }
 0x5f5   :  { %3909 = vrot.lane.b32.xlu2 %v3908_v9, %s4314_s10  ;;  %v3917_v19 = vunpack.i.h.bf16 %v3915_v15  ;;  %v3916_v20 = vunpack.i.l.bf16 %v3915_v15 }
 0x5f6   :  { %3919 = vrot.lane.b32.xlu0 %v3918_v11, %s4315_s11 }
 0x5f7   :  { %v753_v26 = vsel %vm188_vm5, %v4518_v49, %v3917_v19  ;;  %v752_v35 = vsel %vm188_vm5, %v4516_v47, %v3916_v20  ;;  %v132_v19 = vld [vmem:[%s5531_s1 + $0x10] sm:$0xff] }
 0x5f8   :  { %v4671_v20 = vpack.c.bf16 %v132_v19, %v132_v19 }
 0x5fa   :  { %v579_v13 = vpop.f32.mrf.mxu0 }
 0x5fb   :  { %v713_v12 = vpop.f32.mrf.mxu2 }
 0x5fd   :  { %747 = vrot.lane.b32.xlu2 %v713_v12, %s4315_s11  ;;  %v130_v12 = vld [vmem:[%s5531_s1] sm:$0xff] }
 0x5fe   :  { %723 = vrot.lane.b32.xlu0 %v445_v4, %s4313_s9 }
 0x606   :  { %735 = vrot.lane.b32.xlu0 %v579_v13, %s4314_s10  ;;  %v131_v13 = vld [vmem:[%s5531_s1 + $0x8] sm:$0xff] }
 0x60e   :  { %772 = vrot.lane.b32.xlu0 %v4397_v30, %s4312_s8 }
 0x64f   :  { %v3910_v18 = vpop.permute.xlu2 %3909 }
 0x650   :  { %v3912_v24 = vunpack.i.h.bf16 %v3910_v18  ;;  %v3911_v25 = vunpack.i.l.bf16 %v3910_v18  ;;  %v4664_v18 = vpack.c.bf16 %v131_v13, %v130_v12 }
 0x652   :  { %v756_v30 = vsel %vm755_vm8, %v752_v35, %v3911_v25  ;;  %v757_v59 = vsel %vm755_vm8, %v753_v26, %v3912_v24  ;;  %v4678_v24 = vld [vmem:[%s5535_s5 + $0x19] ss:$0 sm:$0xff] }
 0x657   :  { %v748_v33 = vpop.permute.xlu2 %747 }
 0x668   :  { %v3920_v57 = vpop.permute.xlu0 %3919 }
 0x669   :  { %v3922_v21 = vunpack.i.h.bf16 %v3920_v57  ;;  %v3921_v28 = vunpack.i.l.bf16 %v3920_v57 }
 0x66b   :  { %v761_v5 = vsel %vm759_vm9, %v757_v59, %v3922_v21  ;;  %v760_v43 = vsel %vm759_vm9, %v756_v30, %v3921_v28 }
 0x66c   :  { %v763_v29 = vpack.c.bf16 %v761_v5, %v760_v43 }
 0x66e   :  { %3621 = vmatmul.msk.bf16.vlgmr.msra.gmra.mxu1 %vm154_vm3, %v763_v29 }
 0x670   :  { %v724_v31 = vpop.permute.xlu0 %723 }
 0x671   :  { %v754_v49 = vsel %vm188_vm5, %v4520_v50, %v724_v31 }
 0x678   :  { %v736_v32 = vpop.permute.xlu0 %735 }
 0x679   :  { %v758_v47 = vsel %vm755_vm8, %v754_v49, %v736_v32 }
 0x67a   :  { %v762_v34 = vsel %vm759_vm9, %v758_v47, %v748_v33 }
 0x67b   :  { %v764_v48 = vpack.c.bf16 %v762_v34, %v762_v34 }
 0x67e   :  { %3622 = vmatmul.msk.bf16.gmra.mxu1 %vm154_vm3, %v764_v48 }
 0x680   :  { %v773_v36 = vpop.permute.xlu0 %772 }
 0x6eb   :  { %v790_v17 = vpop.f32.mrf.mxu1 }
 0x6ec   :  { %v791_v38 = vadd.f32 %v790_v17, %v773_v36 }
 0x6ee   :  { %v799_v40 = vadd.f32 %v791_v38, %v4379_v22 }
 0x6f0   :  { %v802_v50 = vsel %vm154_vm3, %v799_v40, 0.0 }
 0x6f1   :  { %803 = vadd.xlane.f32.xlu1 %v802_v50 }
 0x6f3   :  { %v792_v16 = vpop.f32.mrf.mxu1 }
 0x6f4   :  { %v793_v41 = vadd.f32 %v792_v16, %v773_v36 }
 0x6f6   :  { %v800_v42 = vadd.f32 %v793_v41, %v4381_v23  ;;  %v4086_v23 = vpop.eup %4085 }
 0x6f7   :  { %v813_v54 = vmul.f32 32.0, %v4086_v23  ;;  %vm817_vm11 = vweird.f32 %v4086_v23 }
 0x6f8   :  { %v805_v44 = vsel %vm154_vm3, %v800_v42, 0.0 }
 0x6f9   :  { %806 = vadd.xlane.f32.xlu2 %v805_v44  ;;  %v814_v55 = vsub.f32 1.0, %v813_v54 }
 0x6fb   :  { %v795_v45 = vpop.f32.mrf.mxu1  ;;  %v815_v56 = vmul.f32 %v4086_v23, %v814_v55 }
 0x6fc   :  { %v796_v46 = vadd.f32 %v795_v45, %v773_v36  ;;  %v4688_v36 = vld [vmem:[%s5535_s5 + $0x30] sm:$0x3f] }
 0x6fd   :  { %v816_v58 = vadd.f32 %v4086_v23, %v815_v56  ;;  %v876_v16 = vperm.slane %v4688_v36, 0 }
 0x6fe   :  { %v801_v51 = vadd.f32 %v796_v46, %v4389_v27 }
 0x6ff   :  { %v4646_v60 = vsel %vm817_vm11, %v4086_v23, %v816_v58 }
 0x700   :  { %v809_v22 = vsel %vm808_vm10, %v801_v51, 0.0 }
 0x701   :  { %810 = vadd.xlane.f32.xlu0 %v809_v22 }
 0x703   :  { %v797_v52 = vpop.f32.mrf.mxu1 }
 0x704   :  { %v880_v52 = vperm.slane %v4688_v36, 1 }
 0x70a   :  { %930 = vrot.lane.b32.xlu1 %v4634_v53, %s4302_s16 }
 0x711   :  { %932 = vrot.lane.b32.xlu2 %v4630_v37, %s4302_s16 }
 0x719   :  { %937 = vrot.lane.b32.xlu2 %v4678_v24, %s4302_s16 }
 0x764   :  { %v804_v27 = vpop.xlane.xlu1 %803 }
 0x765   :  { %v819_v61 = vmul.f32 %v4646_v60, %v804_v27 }
 0x767   :  { %v822_v62 = vsub.f32 %v799_v40, %v819_v61 }
 0x769   :  { %v825_v63 = vmul.f32 %v822_v62, %v822_v62 }
 0x76b   :  { %v828_v0 = vsel %vm154_vm3, %v825_v63, 0.0 }
 0x76c   :  { %829 = vadd.xlane.f32.xlu0 %v828_v0  ;;  %v807_v1 = vpop.xlane.xlu2 %806 }
 0x76d   :  { %v820_v2 = vmul.f32 %v4646_v60, %v807_v1 }
 0x76f   :  { %v823_v3 = vsub.f32 %v800_v42, %v820_v2 }
 0x771   :  { %v826_v4 = vmul.f32 %v823_v3, %v823_v3 }
 0x773   :  { %v831_v6 = vsel %vm154_vm3, %v826_v4, 0.0 }
 0x774   :  { %v811_v7 = vpop.xlane.xlu0 %810  ;;  %832 = vadd.xlane.f32.xlu0 %v831_v6  ;;  %v933_v8 = vpop.permute.xlu2 %932 }
 0x775   :  { %v821_v9 = vmul.f32 %v4646_v60, %v811_v7  ;;  %952 = vmatpush.bf16.msrb.mxu3 %v933_v8 }
 0x777   :  { %v4653_v10 = vsub.f32 %v801_v51, %v821_v9 }
 0x779   :  { %v827_v11 = vmul.f32 %v4653_v10, %v4653_v10 }
 0x77b   :  { %v834_v14 = vsel %vm808_vm10, %v827_v11, 0.0 }
 0x77c   :  { %835 = vadd.xlane.f32.xlu0 %v834_v14  ;;  %v931_v15 = vpop.permute.xlu1 %930  ;;  %v938_v7 = vpop.permute.xlu2 %937 }
 0x77d   :  { %953 = vmatpush.bf16.msrb.mxu3 %v931_v15 }
 0x780   :  { %3633 = vmatmul.msk.bf16.vlgmr.msrb.gmra.mxu3 %vm154_vm3, %v4664_v18 }
 0x790   :  { %3634 = vmatmul.msk.bf16.gmra.mxu3 %vm154_vm3, %v4671_v20 }
 0x7df   :  { %v830_v25 = vpop.xlane.xlu0 %829 }
 0x7e0   :  { %v837_v57 = vmul.f32 %v830_v25, %v4646_v60 }
 0x7e2   :  { %v840_v26 = vadd.f32 1e-05, %v837_v57 }
 0x7e4   :  { %4087 = vrsqrt.f32 %v840_v26  ;;  %vm849_vm13 = vweird.f32 %v840_v26 }
 0x7e7   :  { %v833_v35 = vpop.xlane.xlu0 %832 }
 0x7e8   :  { %v838_v21 = vmul.f32 %v833_v35, %v4646_v60 }
 0x7ea   :  { %v4088_v28 = vpop.eup %4087  ;;  %v841_v30 = vadd.f32 1e-05, %v838_v21 }
 0x7eb   :  { %v844_v59 = vmul.f32 %v4088_v28, %v840_v26  ;;  %vm850_vm12 = vweird.f32 %v4088_v28 }
 0x7ec   :  { %4089 = vrsqrt.f32 %v841_v30  ;;  %vm851_vm14 = vmor %vm849_vm13, %vm850_vm12  ;;  %vm859_vm1 = vweird.f32 %v841_v30 }
 0x7ed   :  { %v845_v5 = vmul.f32 %v4088_v28, %v844_v59 }
 0x7ef   :  { %v846_v43 = vmul.f32 0.5, %v845_v5  ;;  %v836_v29 = vpop.xlane.xlu0 %835 }
 0x7f0   :  { %v839_v31 = vmul.f32 %v836_v29, %v4646_v60 }
 0x7f1   :  { %v847_v49 = vsub.f32 1.5, %v846_v43 }
 0x7f2   :  { %v4090_v32 = vpop.eup %4089  ;;  %v842_v33 = vadd.f32 1e-05, %v839_v31 }
 0x7f3   :  { %v848_v47 = vmul.f32 %v4088_v28, %v847_v49  ;;  %v854_v34 = vmul.f32 %v4090_v32, %v841_v30  ;;  %vm860_vm15 = vweird.f32 %v4090_v32 }
 0x7f4   :  { %4091 = vrsqrt.f32 %v842_v33  ;;  %vm861_vm2 = vmor %vm859_vm1, %vm860_vm15  ;;  %vm869_vm12 = vweird.f32 %v842_v33 }
 0x7f5   :  { %v855_v48 = vmul.f32 %v4090_v32, %v854_v34  ;;  %v852_v17 = vsel %vm851_vm14, %v4088_v28, %v848_v47  ;;  %vm1020_vm14 = vcmask 191488  }
 0x7f6   :  { %v873_v41 = vmul.f32 %v852_v17, %v822_v62 }
 0x7f7   :  { %v856_v38 = vmul.f32 0.5, %v855_v48 }
 0x7f8   :  { %v877_v51 = vmul.f32 %v876_v16, %v873_v41 }
 0x7f9   :  { %v857_v40 = vsub.f32 1.5, %v856_v38  ;;  %v46_v38 = vld [vmem:[%s5535_s5 + $0x60] sm:$0xff] }
 0x7fa   :  { %v4092_v50 = vpop.eup %4091  ;;  %v4692_v55 = vadd.f32 %v880_v52, %v877_v51 }
 0x7fb   :  { %v858_v42 = vmul.f32 %v4090_v32, %v857_v40  ;;  %v864_v44 = vmul.f32 %v4092_v50, %v842_v33  ;;  %vm870_vm11 = vweird.f32 %v4092_v50 }
 0x7fc   :  { %vm871_vm13 = vmor %vm869_vm12, %vm870_vm11 }
 0x7fd   :  { %v862_v45 = vsel %vm861_vm2, %v4090_v32, %v858_v42  ;;  %v865_v46 = vmul.f32 %v4092_v50, %v864_v44  ;;  %v49_v32 = vld [vmem:[%s5532_s2] sm:$0x1] }
 0x7fe   :  { %v874_v22 = vmul.f32 %v862_v45, %v823_v3  ;;  %v50_v34 = vmul.f32 -1e+09, %v49_v32 }
 0x7ff   :  { %v866_v39 = vmul.f32 0.5, %v865_v46 }
 0x800   :  { %v878_v23 = vmul.f32 %v876_v16, %v874_v22  ;;  %v52_v17 = vperm.slane %v50_v34, 0 }
 0x801   :  { %v867_v54 = vsub.f32 1.5, %v866_v39 }
 0x802   :  { %v4694_v56 = vadd.f32 %v880_v52, %v878_v23 }
 0x803   :  { %v868_v58 = vmul.f32 %v4092_v50, %v867_v54  ;;  %v955_v27 = vpop.f32.mrf.mxu3 }
 0x804   :  { %v889_v61 = vpack.c.bf16 %v4694_v56, %v4692_v55  ;;  %v4705_v8 = vadd.f32 %v955_v27, %v938_v7 }
 0x805   :  { %v872_v62 = vsel %vm871_vm13, %v4092_v50, %v868_v58 }
 0x806   :  { %3631 = vmatmul.msk.bf16.vlgmr.msrb.gmra.mxu0 %vm154_vm3, %v889_v61  ;;  %v875_v63 = vmul.f32 %v872_v62, %v4653_v10  ;;  %1098 = vrot.lane.b32.xlu2 %v4705_v8, %s4304_s24  ;;  %v48_v62 = vld [vmem:[%s5535_s5 + $0x70] sm:$0xf] }
 0x808   :  { %v879_v1 = vmul.f32 %v876_v16, %v875_v63  ;;  %v4766_v16 = vadd.f32 %v52_v17, %v46_v38 }
 0x80a   :  { %v4700_v2 = vadd.f32 %v880_v52, %v879_v1  ;;  %v47_v52 = vld [vmem:[%s5535_s5 + $0x68] sm:$0xff]  ;;  %v4785_v1 = vadd.f32 %v52_v17, %v48_v62 }
 0x80b   :  { %v957_v0 = vpop.f32.mrf.mxu3  ;;  %v4776_v54 = vadd.f32 %v52_v17, %v47_v52 }
 0x80c   :  { %v890_v4 = vpack.c.bf16 %v4700_v2, %v4700_v2  ;;  %v958_v9 = vadd.f32 %v957_v0, %v938_v7 }
 0x80e   :  { %1100 = vrot.lane.b32.xlu0 %v958_v9, %s4304_s24 }
 0x813   :  { %v960_v3 = vpop.f32.mrf.mxu3 }
 0x814   :  { %v961_v11 = vadd.f32 %v960_v3, %v938_v7 }
 0x816   :  { %3632 = vmatmul.msk.bf16.gmra.mxu0 %vm154_vm3, %v890_v4  ;;  %1102 = vrot.lane.b32.xlu1 %v961_v11, %s4304_s24  ;;  %v4746_v59 = vpack.i.bf16 %v958_v9, %v961_v11 }
 0x817   :  { %3635 = vmatpush.xpose.msk.msrb.mxu2 %vm188_vm5, %v961_v11  ;;  %1233 = vrot.lane.b32.xlu0 %v958_v9, %s4308_s28 }
 0x818   :  { %1368 = vrot.lane.b32.xlu2 %v961_v11, %s4307_s4 }
 0x81b   :  { %v962_v6 = vpop.f32.mrf.mxu3  ;;  %3636 = vmatpush.xpose.msk.msrb.mxu2 %vm188_vm5, %v958_v9 }
 0x81e   :  { %1235 = vrot.lane.b32.xlu1 %v961_v11, %s4308_s28 }
 0x81f   :  { %3637 = vmatpush.xpose.msk.msrb.mxu2 %vm188_vm5, %v4705_v8  ;;  %1364 = vrot.lane.b32.xlu0 %v4705_v8, %s4307_s4 }
 0x860   :  { %v1099_v57 = vpop.permute.xlu2 %1098 }
 0x872   :  { %v1369_v21 = vpop.permute.xlu2 %1368 }
 0x880   :  { %v1101_v35 = vpop.permute.xlu0 %1100 }
 0x883   :  { %v919_v10 = vpop.f32.mrf.mxu0 }
 0x884   :  { %v920_v12 = vadd.f32 %v4678_v24, %v919_v10 }
 0x886   :  { %1092 = vrot.lane.b32.xlu1 %v920_v12, %s4304_s24  ;;  %3638 = vmatmul.msk.f32.vlgmr.msrb.gmra.mxu2 %vm188_vm5, %v920_v12 }
 0x888   :  { %v1103_v25 = vpop.permute.xlu1 %1102 }
 0x889   :  { %3644 = vmatpush.xpose.msk.msra.mxu0 %vm188_vm5, %v1103_v25  ;;  %v1234_v30 = vpop.permute.xlu0 %1233 }
 0x88b   :  { %v921_v13 = vpop.f32.mrf.mxu0 }
 0x88c   :  { %v922_v14 = vadd.f32 %v4678_v24, %v921_v13 }
 0x88d   :  { %3645 = vmatpush.xpose.msk.msra.mxu0 %vm188_vm5, %v1101_v35 }
 0x88e   :  { %1227 = vrot.lane.b32.xlu0 %v922_v14, %s4308_s28  ;;  %1231 = vrot.lane.b32.xlu1 %v4705_v8, %s4308_s28 }
 0x88f   :  { %1094 = vrot.lane.b32.xlu2 %v922_v14, %s4304_s24  ;;  %3639 = vmatmul.msk.f32.gmra.mxu2 %vm188_vm5, %v922_v14 }
 0x890   :  { %v1236_v28 = vpop.permute.xlu1 %1235 }
 0x891   :  { %3653 = vmatpush.xpose.msk.msra.mxu3 %vm188_vm5, %v1236_v28  ;;  %3646 = vmatpush.xpose.msk.msra.mxu0 %vm188_vm5, %v1099_v57  ;;  %v1365_v29 = vpop.permute.xlu0 %1364 }
 0x893   :  { %v924_v15 = vpop.f32.mrf.mxu0 }
 0x894   :  { %v925_v19 = vadd.f32 %v4678_v24, %v924_v15 }
 0x895   :  { %3662 = vmatpush.xpose.msk.msrb.mxu0 %vm188_vm5, %v1369_v21  ;;  %3654 = vmatpush.xpose.msk.msra.mxu3 %vm188_vm5, %v1234_v30 }
 0x896   :  { %1362 = vrot.lane.b32.xlu0 %v925_v19, %s4307_s4  ;;  %1096 = vrot.lane.b32.xlu1 %v925_v19, %s4304_s24 }
 0x897   :  { %1366 = vrot.lane.b32.xlu2 %v958_v9, %s4307_s4  ;;  %3640 = vmatmul.msk.f32.gmra.mxu2 %vm188_vm5, %v925_v19 }
 0x89b   :  { %v926_v26 = vpop.f32.mrf.mxu0 }
 0x89e   :  { %1181 = vrot.lane.b32.xlu0 %v4705_v8, %s4303_s17  ;;  %1358 = vrot.lane.b32.xlu1 %v920_v12, %s4307_s4 }
 0x89f   :  { %1225 = vrot.lane.b32.xlu2 %v920_v12, %s4308_s28 }
 0x8a6   :  { %1229 = vrot.lane.b32.xlu1 %v925_v19, %s4308_s28 }
 0x8a7   :  { %1360 = vrot.lane.b32.xlu2 %v922_v14, %s4307_s4 }
 0x8ae   :  { %3929 = vrot.lane.b32.xlu1 %v4746_v59, %s4302_s16 }
 0x8af   :  { %3924 = vrot.lane.b32.xlu2 %v4746_v59, %s4303_s17 }
 0x8b7   :  { %1048 = vrot.lane.b32.xlu2 %v4705_v8, %s4302_s16 }
 0x8e9   :  { %v1095_v5 = vpop.permute.xlu2 %1094 }
 0x8f1   :  { %v1367_v43 = vpop.permute.xlu2 %1366 }
 0x8f2   :  { %3663 = vmatpush.xpose.msk.msrb.mxu0 %vm188_vm5, %v1367_v43 }
 0x8f6   :  { %3664 = vmatpush.xpose.msk.msrb.mxu0 %vm188_vm5, %v1365_v29 }
 0x8f8   :  { %v1093_v31 = vpop.permute.xlu1 %1092 }
 0x8f9   :  { %v1226_v49 = vpop.permute.xlu2 %1225  ;;  %3647 = vmatmul.msk.f32.vlgmr.msra.gmra.mxu0 %vm188_vm5, %v1093_v31 }
 0x900   :  { %v1228_v33 = vpop.permute.xlu0 %1227  ;;  %v1232_v47 = vpop.permute.xlu1 %1231 }
 0x901   :  { %v1361_v48 = vpop.permute.xlu2 %1360  ;;  %3648 = vmatmul.msk.f32.gmra.mxu0 %vm188_vm5, %v1095_v5  ;;  %3655 = vmatpush.xpose.msk.msra.mxu3 %vm188_vm5, %v1232_v47 }
 0x904   :  { %3656 = vmatmul.msk.f32.vlgmr.msra.gmra.mxu3 %vm188_vm5, %v1226_v49 }
 0x908   :  { %v1363_v40 = vpop.permute.xlu0 %1362  ;;  %v1097_v50 = vpop.permute.xlu1 %1096 }
 0x909   :  { %v3925_v41 = vpop.permute.xlu2 %3924  ;;  %v999_v42 = vpop.f32.mrf.mxu2  ;;  %3649 = vmatmul.msk.f32.gmra.mxu0 %vm188_vm5, %v1097_v50 }
 0x90a   :  { %v3926_v44 = vunpack.i.l.bf16 %v3925_v41  ;;  %v1008_v45 = vmul.f32 0.35355338, %v999_v42  ;;  %v3927_v46 = vunpack.i.h.bf16 %v3925_v41 }
 0x90c   :  { %1212 = vmatpush.msra.mxu2 %v3926_v44  ;;  %3657 = vmatmul.msk.f32.gmra.mxu3 %vm188_vm5, %v1228_v33  ;;  %v1011_v51 = vadd.f32 %v1008_v45, %v4766_v16 }
 0x90e   :  { %1213 = vmatpush.msra.mxu2 %v3927_v46  ;;  %v1014_v22 = vsel %vm759_vm9, %v1011_v51, -inf }
 0x90f   :  { %1015 = vmax.xlane.f32.xlu1 %v1014_v22 }
 0x910   :  { %v1182_v39 = vpop.permute.xlu0 %1181  ;;  %v1359_v23 = vpop.permute.xlu1 %1358 }
 0x911   :  { %1214 = vmatpush.msra.mxu2 %v1182_v39  ;;  %3665 = vmatmul.msk.f32.vlgmr.msrb.gmra.mxu0 %vm188_vm5, %v1359_v23  ;;  %v1049_v12 = vpop.permute.xlu2 %1048 }
 0x912   :  { %v1002_v58 = vpop.f32.mrf.mxu2 }
 0x913   :  { %v1009_v27 = vmul.f32 0.35355338, %v1002_v58 }
 0x915   :  { %v1012_v61 = vadd.f32 %v1009_v27, %v4776_v54 }
 0x917   :  { %v1017_v63 = vsel %vm759_vm9, %v1012_v61, -inf }
 0x918   :  { %1018 = vmax.xlane.f32.xlu2 %v1017_v63  ;;  %v1230_v0 = vpop.permute.xlu1 %1229 }
 0x919   :  { %3658 = vmatmul.msk.f32.gmra.mxu3 %vm188_vm5, %v1230_v0  ;;  %3666 = vmatmul.msk.f32.gmra.mxu0 %vm188_vm5, %v1361_v48 }
 0x91a   :  { %v1005_v3 = vpop.f32.mrf.mxu2 }
 0x91b   :  { %v1010_v4 = vmul.f32 0.35355338, %v1005_v3 }
 0x91d   :  { %v4788_v6 = vadd.f32 %v1010_v4, %v4785_v1 }
 0x91f   :  { %v1021_v7 = vsel %vm1020_vm14, %v4788_v6, -inf }
 0x920   :  { %1022 = vmax.xlane.f32.xlu0 %v1021_v7  ;;  %v3930_v9 = vpop.permute.xlu1 %3929 }
 0x921   :  { %v3931_v11 = vunpack.i.l.bf16 %v3930_v9  ;;  %3667 = vmatmul.msk.f32.gmra.mxu0 %vm188_vm5, %v1363_v40  ;;  %v3932_v10 = vunpack.i.h.bf16 %v3930_v9 }
 0x923   :  { %1079 = vmatpush.msrb.mxu1 %v3931_v11 }
 0x925   :  { %1080 = vmatpush.msrb.mxu1 %v3932_v10 }
 0x927   :  { %1081 = vmatpush.msrb.mxu1 %v1049_v12 }
 0x976   :  { %v1133_v13 = vpop.f32.mrf.mxu0 }
 0x977   :  { %v1142_v14 = vmul.f32 0.35355338, %v1133_v13 }
 0x979   :  { %v4794_v15 = vadd.f32 %v1142_v14, %v4766_v16 }
 0x97b   :  { %v1148_v19 = vsel %vm759_vm9, %v4794_v15, -inf }
 0x97c   :  { %1149 = vmax.xlane.f32.xlu2 %v1148_v19 }
 0x97e   :  { %v1136_v25 = vpop.f32.mrf.mxu0 }
 0x97f   :  { %v1143_v57 = vmul.f32 0.35355338, %v1136_v25 }
 0x981   :  { %v4799_v26 = vadd.f32 %v1143_v57, %v4776_v54 }
 0x982   :  { %v1016_v35 = vpop.xlane.xlu1 %1015 }
 0x983   :  { %v1024_v21 = vsub.f32 %v1011_v51, %v1016_v35  ;;  %v1151_v28 = vsel %vm759_vm9, %v4799_v26, -inf }
 0x984   :  { %1152 = vmax.xlane.f32.xlu0 %v1151_v28 }
 0x985   :  { %v1027_v30 = vmul.f32 1.442695, %v1024_v21 }
 0x986   :  { %v1139_v5 = vpop.f32.mrf.mxu0 }
 0x987   :  { %4093 = vpow2.f32 %v1027_v30  ;;  %v1266_v43 = vpop.f32.mrf.mxu3  ;;  %v1144_v49 = vmul.f32 0.35355338, %v1139_v5 }
 0x988   :  { %v1275_v29 = vmul.f32 0.35355338, %v1266_v43 }
 0x989   :  { %v4810_v38 = vadd.f32 %v1144_v49, %v4785_v1 }
 0x98a   :  { %v1278_v31 = vadd.f32 %v1275_v29, %v4766_v16 }
 0x98b   :  { %v1154_v41 = vsel %vm1020_vm14, %v4810_v38, -inf  ;;  %v1019_v44 = vpop.xlane.xlu2 %1018 }
 0x98c   :  { %v1281_v32 = vsel %vm759_vm9, %v1278_v31, -inf  ;;  %v1025_v46 = vsub.f32 %v1012_v61, %v1019_v44 }
 0x98d   :  { %v4805_v33 = vpop.eup %4093  ;;  %1282 = vmax.xlane.f32.xlu1 %v1281_v32 }
 0x98e   :  { %v1399_v47 = vpop.f32.mrf.mxu0  ;;  %v1033_v34 = vsel %vm759_vm9, %v4805_v33, 0.0  ;;  %v1029_v22 = vmul.f32 1.442695, %v1025_v46 }
 0x98f   :  { %v1269_v48 = vpop.f32.mrf.mxu3  ;;  %1034 = vadd.xlane.f32.xlu0 %v1033_v34  ;;  %v1408_v50 = vmul.f32 0.35355338, %v1399_v47 }
 0x990   :  { %v1276_v17 = vmul.f32 0.35355338, %v1269_v48  ;;  %4095 = vpow2.f32 %v1029_v22 }
 0x991   :  { %v1411_v51 = vadd.f32 %v1408_v50, %v4766_v16 }
 0x992   :  { %v4813_v40 = vadd.f32 %v1276_v17, %v4776_v54 }
 0x993   :  { %v1414_v39 = vsel %vm759_vm9, %v1411_v51, -inf  ;;  %v1023_v3 = vpop.xlane.xlu0 %1022 }
 0x994   :  { %v1284_v42 = vsel %vm759_vm9, %v4813_v40, -inf  ;;  %v1026_v7 = vsub.f32 %v4788_v6, %v1023_v3 }
 0x995   :  { %1155 = vmax.xlane.f32.xlu1 %v1154_v41  ;;  %1285 = vmax.xlane.f32.xlu2 %v1284_v42 }
 0x996   :  { %v1402_v45 = vpop.f32.mrf.mxu0  ;;  %v4096_v4 = vpop.eup %4095  ;;  %v1031_v10 = vmul.f32 1.442695, %v1026_v7 }
 0x997   :  { %v1409_v9 = vmul.f32 0.35355338, %v1402_v45  ;;  %v1036_v11 = vsel %vm759_vm9, %v4096_v4, 0.0 }
 0x998   :  { %4097 = vpow2.f32 %v1031_v10 }
 0x999   :  { %v1412_v12 = vadd.f32 %v1409_v9, %v4776_v54 }
 0x99b   :  { %v1417_v13 = vsel %vm759_vm9, %v1412_v12, -inf }
 0x99c   :  { %v1272_v52 = vpop.f32.mrf.mxu3 }
 0x99d   :  { %v1277_v23 = vmul.f32 0.35355338, %v1272_v52  ;;  %1415 = vmax.xlane.f32.xlu2 %v1414_v39 }
 0x99e   :  { %v1405_v58 = vpop.f32.mrf.mxu0  ;;  %v4835_v14 = vpop.eup %4097 }
 0x99f   :  { %v1410_v27 = vmul.f32 0.35355338, %v1405_v58  ;;  %v4822_v62 = vadd.f32 %v1277_v23, %v4785_v1  ;;  %v1039_v19 = vsel %vm1020_vm14, %v4835_v14, 0.0 }
 0x9a1   :  { %v1287_v63 = vsel %vm1020_vm14, %v4822_v62, -inf  ;;  %v4827_v0 = vadd.f32 %v1410_v27, %v4785_v1 }
 0x9a2   :  { %1288 = vmax.xlane.f32.xlu0 %v1287_v63 }
 0x9a3   :  { %v1420_v61 = vsel %vm1020_vm14, %v4827_v0, -inf }
 0x9a4   :  { %1421 = vmax.xlane.f32.xlu1 %v1420_v61 }
 0x9aa   :  { %1037 = vadd.xlane.f32.xlu0 %v1036_v11 }
 0x9b2   :  { %1418 = vmax.xlane.f32.xlu0 %v1417_v13 }
 0x9ba   :  { %1040 = vadd.xlane.f32.xlu0 %v1039_v19 }
 0x9ce   :  { %3939 = vrot.lane.b32.xlu0 %v4746_v59, %s4306_s27 }
 0x9ef   :  { %v1150_v6 = vpop.xlane.xlu2 %1149 }
 0x9f0   :  { %v1157_v25 = vsub.f32 %v4794_v15, %v1150_v6 }
 0x9f2   :  { %v1160_v57 = vmul.f32 1.442695, %v1157_v25 }
 0x9f4   :  { %4099 = vpow2.f32 %v1160_v57 }
 0x9f7   :  { %v1153_v21 = vpop.xlane.xlu0 %1152 }
 0x9f8   :  { %v1158_v29 = vsub.f32 %v4799_v26, %v1153_v21 }
 0x9fa   :  { %v4842_v35 = vpop.eup %4099  ;;  %v1162_v32 = vmul.f32 1.442695, %v1158_v29 }
 0x9fb   :  { %v1166_v28 = vsel %vm759_vm9, %v4842_v35, 0.0 }
 0x9fc   :  { %1167 = vadd.xlane.f32.xlu1 %v1166_v28 }
 0xa00   :  { %v1283_v30 = vpop.xlane.xlu1 %1282 }
 0xa01   :  { %v1290_v5 = vsub.f32 %v1278_v31, %v1283_v30 }
 0xa02   :  { %v1035_v43 = vpop.xlane.xlu0 %1034 }
 0xa03   :  { %v1293_v49 = vmul.f32 1.442695, %v1290_v5  ;;  %4101 = vrcp.f32 %v1035_v43 }
 0xa05   :  { %4103 = vpow2.f32 %v1293_v49 }
 0xa06   :  { %4105 = vpow2.f32 %v1162_v32 }
 0xa08   :  { %v1156_v47 = vpop.xlane.xlu1 %1155  ;;  %v1286_v15 = vpop.xlane.xlu2 %1285 }
 0xa09   :  { %v4102_v34 = vpop.eup %4101  ;;  %v1159_v48 = vsub.f32 %v4810_v38, %v1156_v47  ;;  %v1291_v57 = vsub.f32 %v4813_v40, %v1286_v15 }
 0xa0a   :  { %v1045_v17 = vmul.f32 %v4102_v34, %v4805_v33 }
 0xa0b   :  { %v4849_v50 = vpop.eup %4103  ;;  %v1164_v41 = vmul.f32 1.442695, %v1159_v48 }
 0xa0c   :  { %3641 = vmatmul.msk.f32.vlgmr.msrb.gmra.mxu1 %vm759_vm9, %v1045_v17  ;;  %v1299_v26 = vsel %vm759_vm9, %v4849_v50, 0.0  ;;  %v4854_v42 = vpop.eup %4105 }
 0xa0d   :  { %4107 = vpow2.f32 %v1164_v41  ;;  %1300 = vadd.xlane.f32.xlu1 %v1299_v26  ;;  %v1169_v46 = vsel %vm759_vm9, %v4854_v42, 0.0 }
 0xa10   :  { %v1416_v31 = vpop.xlane.xlu2 %1415 }
 0xa11   :  { %v1423_v44 = vsub.f32 %v1411_v51, %v1416_v31 }
 0xa13   :  { %v4856_v45 = vpop.eup %4107  ;;  %v1426_v38 = vmul.f32 1.442695, %v1423_v44 }
 0xa14   :  { %v1172_v33 = vsel %vm1020_vm14, %v4856_v45, 0.0 }
 0xa15   :  { %4109 = vpow2.f32 %v1426_v38  ;;  %1173 = vadd.xlane.f32.xlu2 %v1172_v33  ;;  %1170 = vadd.xlane.f32.xlu1 %v1169_v46  ;;  %v1289_v22 = vpop.xlane.xlu0 %1288 }
 0xa16   :  { %v1292_v5 = vsub.f32 %v4822_v62, %v1289_v22 }
 0xa17   :  { %v1422_v13 = vpop.xlane.xlu1 %1421 }
 0xa18   :  { %v1425_v6 = vsub.f32 %v4827_v0, %v1422_v13  ;;  %v1297_v0 = vmul.f32 1.442695, %v1292_v5 }
 0xa1a   :  { %v1430_v25 = vmul.f32 1.442695, %v1425_v6 }
 0xa1b   :  { %v4862_v52 = vpop.eup %4109 }
 0xa1c   :  { %v1432_v39 = vsel %vm759_vm9, %v4862_v52, 0.0 }
 0xa1d   :  { %1433 = vadd.xlane.f32.xlu2 %v1432_v39  ;;  %v1038_v51 = vpop.xlane.xlu0 %1037 }
 0xa1e   :  { %4111 = vrcp.f32 %v1038_v51 }
 0xa24   :  { %v4112_v23 = vpop.eup %4111 }
 0xa25   :  { %v1419_v58 = vpop.xlane.xlu0 %1418  ;;  %v1046_v27 = vmul.f32 %v4112_v23, %v4096_v4 }
 0xa26   :  { %v1424_v63 = vsub.f32 %v1412_v12, %v1419_v58 }
 0xa27   :  { %3642 = vmatmul.msk.f32.gmra.mxu1 %vm759_vm9, %v1046_v27 }
 0xa28   :  { %v1428_v61 = vmul.f32 1.442695, %v1424_v63 }
 0xa2a   :  { %4113 = vpow2.f32 %v1428_v61 }
 0xa2d   :  { %v1041_v3 = vpop.xlane.xlu0 %1040 }
 0xa2e   :  { %4115 = vrcp.f32 %v1041_v3  ;;  %1447 = vrot.lane.b32.xlu1 %v4705_v8, %s4305_s25 }
 0xa2f   :  { %4117 = vpow2.f32 %v1430_v25 }
 0xa30   :  { %v4869_v7 = vpop.eup %4113 }
 0xa31   :  { %v1435_v9 = vsel %vm759_vm9, %v4869_v7, 0.0 }
 0xa32   :  { %1436 = vadd.xlane.f32.xlu0 %v1435_v9 }
 0xa34   :  { %v4116_v11 = vpop.eup %4115 }
 0xa35   :  { %3934 = vrot.lane.b32.xlu2 %v4746_v59, %s4305_s25  ;;  %v1047_v4 = vmul.f32 %v4116_v11, %v4835_v14  ;;  %v1295_v59 = vmul.f32 1.442695, %v1291_v57  ;;  %v4118_v21 = vpop.eup %4117 }
 0xa36   :  { %v1438_v14 = vsel %vm1020_vm14, %v4118_v21, 0.0 }
 0xa37   :  { %3643 = vmatmul.msk.f32.gmra.mxu1 %vm759_vm9, %v1047_v4  ;;  %4119 = vpow2.f32 %v1295_v59 }
 0xa38   :  { %4121 = vpow2.f32 %v1297_v0 }
 0xa3d   :  { %v4120_v28 = vpop.eup %4119 }
 0xa3e   :  { %v1302_v30 = vsel %vm759_vm9, %v4120_v28, 0.0  ;;  %v4122_v43 = vpop.eup %4121 }
 0xa3f   :  { %v1305_v29 = vsel %vm1020_vm14, %v4122_v43, 0.0 }
 0xa40   :  { %v3940_v10 = vpop.permute.xlu0 %3939 }
 0xa41   :  { %v3941_v12 = vunpack.i.l.bf16 %v3940_v10  ;;  %v3942_v19 = vunpack.i.h.bf16 %v3940_v10 }
 0xa43   :  { %1345 = vmatpush.msra.mxu1 %v3941_v12 }
 0xa45   :  { %1346 = vmatpush.msra.mxu1 %v3942_v19 }
 0xa46   :  { %1314 = vrot.lane.b32.xlu0 %v4705_v8, %s4306_s27 }
 0xa58   :  { %1439 = vadd.xlane.f32.xlu1 %v1438_v14 }
 0xa5e   :  { %1303 = vadd.xlane.f32.xlu2 %v1302_v30 }
 0xa6f   :  { %v1168_v8 = vpop.xlane.xlu1 %1167 }
 0xa70   :  { %4123 = vrcp.f32 %v1168_v8  ;;  %1306 = vadd.xlane.f32.xlu0 %v1305_v29 }
 0xa76   :  { %v4124_v40 = vpop.eup %4123  ;;  %1540 = vrot.lane.b32.xlu2 %v4630_v37, %s4312_s8 }
 0xa77   :  { %v1178_v49 = vmul.f32 %v4124_v40, %v4842_v35 }
 0xa79   :  { %3650 = vmatmul.msk.f32.vlgmr.msra.gmra.mxu2 %vm759_vm9, %v1178_v49 }
 0xa80   :  { %v1301_v32 = vpop.xlane.xlu1 %1300 }
 0xa88   :  { %v1174_v47 = vpop.xlane.xlu2 %1173  ;;  %v1171_v62 = vpop.xlane.xlu1 %1170 }
 0xa89   :  { %4125 = vrcp.f32 %v1171_v62  ;;  %v1083_v19 = vpop.f32.mrf.mxu1 }
 0xa8a   :  { %4127 = vrcp.f32 %v1174_v47 }
 0xa8f   :  { %v4126_v15 = vpop.eup %4125 }
 0xa90   :  { %v1434_v34 = vpop.xlane.xlu2 %1433  ;;  %v1179_v48 = vmul.f32 %v4126_v15, %v4854_v42  ;;  %v4128_v17 = vpop.eup %4127 }
 0xa91   :  { %4129 = vrcp.f32 %v1434_v34  ;;  %v1180_v37 = vmul.f32 %v4128_v17, %v4856_v45 }
 0xa92   :  { %3651 = vmatmul.msk.f32.gmra.mxu2 %vm759_vm9, %v1179_v48 }
 0xa97   :  { %v4130_v31 = vpop.eup %4129 }
 0xa98   :  { %v3935_v41 = vpop.permute.xlu2 %3934  ;;  %v1444_v38 = vmul.f32 %v4130_v31, %v4862_v52 }
 0xa99   :  { %v3936_v26 = vunpack.i.l.bf16 %v3935_v41  ;;  %v3937_v35 = vunpack.i.h.bf16 %v3935_v41 }
 0xa9a   :  { %3652 = vmatmul.msk.f32.gmra.mxu2 %vm759_vm9, %v1180_v37 }
 0xa9b   :  { %1478 = vmatpush.msrb.mxu2 %v3936_v26 }
 0xa9d   :  { %1479 = vmatpush.msrb.mxu2 %v3937_v35 }
 0xaa0   :  { %v1448_v44 = vpop.permute.xlu1 %1447 }
 0xaa1   :  { %1480 = vmatpush.msrb.mxu2 %v1448_v44 }
 0xaa2   :  { %3668 = vmatmul.msk.f32.vlgmr.msrb.gmra.mxu2 %vm759_vm9, %v1444_v38 }
 0xaa4   :  { %v1086_v6 = vpop.f32.mrf.mxu1 }
 0xaa5   :  { %v1437_v42 = vpop.xlane.xlu0 %1436 }
 0xaa6   :  { %4131 = vrcp.f32 %v1437_v42 }
 0xaa7   :  { %4133 = vrcp.f32 %v1301_v32 }
 0xaac   :  { %v4132_v33 = vpop.eup %4131 }
 0xaad   :  { %v1445_v46 = vmul.f32 %v4132_v33, %v4869_v7  ;;  %v4134_v45 = vpop.eup %4133 }
 0xaae   :  { %v1311_v22 = vmul.f32 %v4134_v45, %v4849_v50 }
 0xaaf   :  { %3669 = vmatmul.msk.f32.gmra.mxu2 %vm759_vm9, %v1445_v46 }
 0xab4   :  { %v1089_v25 = vpop.f32.mrf.mxu1 }
 0xab8   :  { %v1315_v39 = vpop.permute.xlu0 %1314 }
 0xab9   :  { %1347 = vmatpush.msra.mxu1 %v1315_v39 }
 0xaba   :  { %3659 = vmatmul.msk.f32.vlgmr.msra.gmra.mxu1 %vm759_vm9, %v1311_v22 }
 0xacb   :  { %v1440_v51 = vpop.xlane.xlu1 %1439 }
 0xacc   :  { %4135 = vrcp.f32 %v1440_v51 }
 0xad1   :  { %v1304_v52 = vpop.xlane.xlu2 %1303 }
 0xad2   :  { %v4136_v23 = vpop.eup %4135  ;;  %4137 = vrcp.f32 %v1304_v52 }
 0xad3   :  { %v1446_v58 = vmul.f32 %v4136_v23, %v4118_v21 }
 0xad5   :  { %3670 = vmatmul.msk.f32.gmra.mxu2 %vm759_vm9, %v1446_v58 }
 0xad8   :  { %v4138_v27 = vpop.eup %4137 }
 0xad9   :  { %v1312_v63 = vmul.f32 %v4138_v27, %v4120_v28  ;;  %v1541_v57 = vpop.permute.xlu2 %1540 }
 0xada   :  { %1559 = vmatpush.bf16.msrb.mxu3 %v1541_v57 }
 0xadb   :  { %3660 = vmatmul.msk.f32.gmra.mxu1 %vm759_vm9, %v1312_v63 }
 0xae3   :  { %v1307_v61 = vpop.xlane.xlu0 %1306 }
 0xae4   :  { %4139 = vrcp.f32 %v1307_v61 }
 0xaea   :  { %v4140_v3 = vpop.eup %4139 }
 0xaeb   :  { %v1313_v50 = vmul.f32 %v4140_v3, %v4122_v43 }
 0xaed   :  { %3661 = vmatmul.msk.f32.gmra.mxu1 %vm759_vm9, %v1313_v50 }
 0xafc   :  { %v1216_v7 = vpop.f32.mrf.mxu2 }
 0xb15   :  { %v1219_v9 = vpop.f32.mrf.mxu2 }
 0xb16   :  { %v3943_v11 = vpack.i.bf16 %v1219_v9, %v1216_v7 }
 0xb18   :  { %3944 = vrot.lane.b32.xlu1 %v3943_v11, %s4313_s9 }
 0xb1d   :  { %v1222_v4 = vpop.f32.mrf.mxu2 }
 0xb20   :  { %1538 = vrot.lane.b32.xlu1 %v4634_v53, %s4312_s8 }
 0xb25   :  { %v1482_v10 = vpop.f32.mrf.mxu2 }
 0xb32   :  { %v1485_v12 = vpop.f32.mrf.mxu2 }
 0xb33   :  { %v3953_v13 = vpack.i.bf16 %v1485_v12, %v1482_v10 }
 0xb35   :  { %3954 = vrot.lane.b32.xlu2 %v3953_v13, %s4315_s11 }
 0xb37   :  { %v1349_v59 = vpop.f32.mrf.mxu1 }
 0xb3d   :  { %1498 = vrot.lane.b32.xlu2 %v1222_v4, %s4313_s9 }
 0xb45   :  { %1544 = vrot.lane.b32.xlu2 %v4678_v24, %s4312_s8 }
 0xb58   :  { %v1352_v21 = vpop.f32.mrf.mxu1  ;;  %v1488_v14 = vpop.f32.mrf.mxu2 }
 0xb59   :  { %v3948_v28 = vpack.i.bf16 %v1352_v21, %v1349_v59  ;;  %1522 = vrot.lane.b32.xlu1 %v1488_v14, %s4315_s11  ;;  %v3849_v21 = vld [vmem:[#allocation2 + $0x78] sm:$0xff] }
 0xb5a   :  { %1689 = vmatpush.bf16.msrb.mxu1 %v3849_v21 }
 0xb5b   :  { %3949 = vrot.lane.b32.xlu0 %v3948_v28, %s4314_s10 }
 0xb6a   :  { %v1355_v53 = vpop.f32.mrf.mxu1 }
 0xb6b   :  { %1510 = vrot.lane.b32.xlu0 %v1355_v53, %s4314_s10 }
 0xb8a   :  { %v3945_v30 = vpop.permute.xlu1 %3944 }
 0xb8b   :  { %v3947_v0 = vunpack.i.h.bf16 %v3945_v30  ;;  %v3946_v43 = vunpack.i.l.bf16 %v3945_v30  ;;  %v3848_v30 = vld [vmem:[#allocation2 + $0x70] sm:$0xff] }
 0xb8c   :  { %1690 = vmatpush.bf16.msrb.mxu1 %v3848_v30  ;;  %v4031_v30 = vld [vmem:[%s5535_s5 + $0x28] ss:$0 sm:$0xff] }
 0xb8d   :  { %v1527_v49 = vsel %vm188_vm5, %v1083_v19, %v3946_v43  ;;  %v1528_v32 = vsel %vm188_vm5, %v1086_v6, %v3947_v0 }
 0xb8f   :  { %v3955_v24 = vpop.permute.xlu2 %3954 }
 0xb90   :  { %v3957_v47 = vunpack.i.h.bf16 %v3955_v24  ;;  %v3956_v62 = vunpack.i.l.bf16 %v3955_v24 }
 0xb92   :  { %v1539_v5 = vpop.permute.xlu1 %1538 }
 0xb93   :  { %1560 = vmatpush.bf16.msrb.mxu3 %v1539_v5 }
 0xb97   :  { %v1499_v26 = vpop.permute.xlu2 %1498 }
 0xb98   :  { %v1529_v37 = vsel %vm188_vm5, %v1089_v25, %v1499_v26 }
 0xb9f   :  { %v1545_v33 = vpop.permute.xlu2 %1544 }
 0xbcb   :  { %v1523_v31 = vpop.permute.xlu1 %1522 }
 0xbcd   :  { %v3950_v8 = vpop.permute.xlu0 %3949 }
 0xbce   :  { %v3952_v29 = vunpack.i.h.bf16 %v3950_v8  ;;  %v3951_v40 = vunpack.i.l.bf16 %v3950_v8 }
 0xbd0   :  { %v1531_v15 = vsel %vm755_vm8, %v1528_v32, %v3952_v29  ;;  %v1530_v34 = vsel %vm755_vm8, %v1527_v49, %v3951_v40 }
 0xbd1   :  { %v1534_v48 = vsel %vm759_vm9, %v1531_v15, %v3957_v47  ;;  %v1533_v17 = vsel %vm759_vm9, %v1530_v34, %v3956_v62 }
 0xbd2   :  { %v1536_v41 = vpack.c.bf16 %v1534_v48, %v1533_v17 }
 0xbd4   :  { %3671 = vmatmul.msk.bf16.vlgmr.msrb.gmra.mxu3 %vm154_vm3, %v1536_v41 }
 0xbdd   :  { %v1511_v35 = vpop.permute.xlu0 %1510 }
 0xbde   :  { %v1532_v44 = vsel %vm755_vm8, %v1529_v37, %v1511_v35 }
 0xbdf   :  { %v1535_v38 = vsel %vm759_vm9, %v1532_v44, %v1523_v31  ;;  %v1640_v31 = vperm.slane %v4688_v36, 2 }
 0xbe0   :  { %v1537_v42 = vpack.c.bf16 %v1535_v38, %v1535_v38 }
 0xbe4   :  { %3672 = vmatmul.msk.bf16.gmra.mxu3 %vm154_vm3, %v1537_v42 }
 0xc57   :  { %v1562_v46 = vpop.f32.mrf.mxu3 }
 0xc58   :  { %v1563_v45 = vadd.f32 %v1562_v46, %v1545_v33 }
 0xc5a   :  { %v1571_v22 = vadd.f32 %v1563_v45, %v4692_v55 }
 0xc5c   :  { %v1574_v39 = vsel %vm154_vm3, %v1571_v22, 0.0 }
 0xc5d   :  { %1575 = vadd.xlane.f32.xlu0 %v1574_v39  ;;  %v1644_v39 = vperm.slane %v4688_v36, 3  ;;  %v3853_v36 = vld [vmem:[#allocation2 + $0xa8] sm:$0xff] }
 0xc5e   :  { %1742 = vmatpush.bf16.msra.mxu0 %v3853_v36 }
 0xc5f   :  { %v1564_v51 = vpop.f32.mrf.mxu3 }
 0xc60   :  { %v1565_v52 = vadd.f32 %v1564_v51, %v1545_v33 }
 0xc62   :  { %v1572_v23 = vadd.f32 %v1565_v52, %v4694_v56 }
 0xc64   :  { %v1577_v58 = vsel %vm154_vm3, %v1572_v23, 0.0 }
 0xc65   :  { %1578 = vadd.xlane.f32.xlu1 %v1577_v58 }
 0xc67   :  { %v1567_v27 = vpop.f32.mrf.mxu3 }
 0xc68   :  { %v1568_v63 = vadd.f32 %v1567_v27, %v1545_v33 }
 0xc6a   :  { %v1573_v61 = vadd.f32 %v1568_v63, %v4700_v2 }
 0xc6c   :  { %v1580_v3 = vsel %vm808_vm10, %v1573_v61, 0.0 }
 0xc6d   :  { %1581 = vadd.xlane.f32.xlu2 %v1580_v3 }
 0xc6f   :  { %v1569_v50 = vpop.f32.mrf.mxu3 }
 0xcd0   :  { %v1576_v7 = vpop.xlane.xlu0 %1575 }
 0xcd1   :  { %v1583_v55 = vmul.f32 %v1576_v7, %v4646_v60 }
 0xcd3   :  { %v1586_v9 = vsub.f32 %v1571_v22, %v1583_v55 }
 0xcd5   :  { %v1589_v11 = vmul.f32 %v1586_v9, %v1586_v9 }
 0xcd7   :  { %v1592_v4 = vsel %vm154_vm3, %v1589_v11, 0.0  ;;  %v3852_v11 = vld [vmem:[#allocation2 + $0xa0] sm:$0xff] }
 0xcd8   :  { %v1579_v10 = vpop.xlane.xlu1 %1578  ;;  %1593 = vadd.xlane.f32.xlu0 %v1592_v4  ;;  %1743 = vmatpush.bf16.msra.mxu0 %v3852_v11  ;;  %v3851_v4 = vld [vmem:[#allocation2 + $0x98] sm:$0xff] }
 0xcd9   :  { %v1584_v56 = vmul.f32 %v1579_v10, %v4646_v60  ;;  %v3850_v10 = vld [vmem:[#allocation2 + $0x90] sm:$0xff] }
 0xcdb   :  { %v1587_v12 = vsub.f32 %v1572_v23, %v1584_v56 }
 0xcdc   :  { %1744 = vmatpush.bf16.msra.mxu0 %v3851_v4 }
 0xcdd   :  { %v1590_v13 = vmul.f32 %v1587_v12, %v1587_v12 }
 0xcdf   :  { %v1595_v19 = vsel %vm154_vm3, %v1590_v13, 0.0 }
 0xce0   :  { %1596 = vadd.xlane.f32.xlu2 %v1595_v19  ;;  %v1582_v2 = vpop.xlane.xlu2 %1581  ;;  %1745 = vmatpush.bf16.msra.mxu0 %v3850_v10 }
 0xce1   :  { %v1585_v6 = vmul.f32 %v1582_v2, %v4646_v60 }
 0xce3   :  { %v1588_v25 = vsub.f32 %v1573_v61, %v1585_v6 }
 0xce5   :  { %v1591_v57 = vmul.f32 %v1588_v25, %v1588_v25 }
 0xce7   :  { %v1598_v59 = vsel %vm808_vm10, %v1591_v57, 0.0 }
 0xce8   :  { %1599 = vadd.xlane.f32.xlu1 %v1598_v59 }
 0xd4b   :  { %v1594_v14 = vpop.xlane.xlu0 %1593 }
 0xd4c   :  { %v1601_v28 = vmul.f32 %v1594_v14, %v4646_v60 }
 0xd4e   :  { %v1604_v53 = vadd.f32 1e-05, %v1601_v28 }
 0xd50   :  { %4141 = vrsqrt.f32 %v1604_v53  ;;  %vm1613_vm1 = vweird.f32 %v1604_v53 }
 0xd53   :  { %v1597_v5 = vpop.xlane.xlu2 %1596 }
 0xd54   :  { %v1602_v0 = vmul.f32 %v1597_v5, %v4646_v60 }
 0xd56   :  { %v4142_v43 = vpop.eup %4141  ;;  %v1605_v24 = vadd.f32 1e-05, %v1602_v0 }
 0xd57   :  { %v1608_v8 = vmul.f32 %v4142_v43, %v1604_v53  ;;  %vm1614_vm15 = vweird.f32 %v4142_v43 }
 0xd58   :  { %4143 = vrsqrt.f32 %v1605_v24  ;;  %vm1615_vm2 = vmor %vm1613_vm1, %vm1614_vm15  ;;  %vm1623_vm12 = vweird.f32 %v1605_v24 }
 0xd59   :  { %v1609_v29 = vmul.f32 %v4142_v43, %v1608_v8 }
 0xd5b   :  { %v1610_v40 = vmul.f32 0.5, %v1609_v29  ;;  %v1600_v49 = vpop.xlane.xlu1 %1599 }
 0xd5c   :  { %v1603_v32 = vmul.f32 %v1600_v49, %v4646_v60 }
 0xd5d   :  { %v1611_v47 = vsub.f32 1.5, %v1610_v40 }
 0xd5e   :  { %v4144_v62 = vpop.eup %4143  ;;  %v1606_v15 = vadd.f32 1e-05, %v1603_v32 }
 0xd5f   :  { %v1612_v34 = vmul.f32 %v4142_v43, %v1611_v47  ;;  %v1618_v48 = vmul.f32 %v4144_v62, %v1605_v24  ;;  %vm1624_vm11 = vweird.f32 %v4144_v62 }
 0xd60   :  { %4145 = vrsqrt.f32 %v1606_v15  ;;  %vm1625_vm13 = vmor %vm1623_vm12, %vm1624_vm11  ;;  %vm1633_vm1 = vweird.f32 %v1606_v15  ;;  %vm1731_vm11 = vcmask 523264  }
 0xd61   :  { %v1619_v17 = vmul.f32 %v4144_v62, %v1618_v48  ;;  %v1616_v41 = vsel %vm1615_vm2, %v4142_v43, %v1612_v34 }
 0xd62   :  { %v1637_v44 = vmul.f32 %v1616_v41, %v1586_v9 }
 0xd63   :  { %v1620_v26 = vmul.f32 0.5, %v1619_v17 }
 0xd64   :  { %v1641_v45 = vmul.f32 %v1640_v31, %v1637_v44 }
 0xd65   :  { %v1621_v37 = vsub.f32 1.5, %v1620_v26 }
 0xd66   :  { %v4146_v35 = vpop.eup %4145  ;;  %v1645_v58 = vadd.f32 %v1644_v39, %v1641_v45 }
 0xd67   :  { %v1622_v38 = vmul.f32 %v4144_v62, %v1621_v37  ;;  %v1628_v42 = vmul.f32 %v4146_v35, %v1606_v15  ;;  %vm1634_vm15 = vweird.f32 %v4146_v35 }
 0xd68   :  { %vm1635_vm2 = vmor %vm1633_vm1, %vm1634_vm15 }
 0xd69   :  { %v1626_v33 = vsel %vm1625_vm13, %v4144_v62, %v1622_v38  ;;  %v1629_v46 = vmul.f32 %v4146_v35, %v1628_v42 }
 0xd6a   :  { %v1638_v22 = vmul.f32 %v1626_v33, %v1587_v12  ;;  %v4030_v12 = vld [vmem:[%s5535_s5 + $0x20] ss:$0 sm:$0xff] }
 0xd6b   :  { %v1630_v51 = vmul.f32 0.5, %v1629_v46 }
 0xd6c   :  { %v1642_v52 = vmul.f32 %v1640_v31, %v1638_v22 }
 0xd6d   :  { %v1631_v23 = vsub.f32 1.5, %v1630_v51  ;;  %v4959_v51 = vld [vmem:[#allocation2 + $0x58] sm:$0xff] }
 0xd6e   :  { %v1646_v27 = vadd.f32 %v1644_v39, %v1642_v52  ;;  %1866 = vmatpush.bf16.msra.mxu2 %v4959_v51 }
 0xd6f   :  { %v1632_v63 = vmul.f32 %v4146_v35, %v1631_v23 }
 0xd70   :  { %v1662_v61 = vpack.c.bf16 %v1646_v27, %v1645_v58 }
 0xd71   :  { %v1636_v3 = vsel %vm1635_vm2, %v4146_v35, %v1632_v63 }
 0xd72   :  { %3681 = vmatmul.msk.bf16.vlgmr.msrb.gmra.mxu1 %vm154_vm3, %v1662_v61  ;;  %v1639_v50 = vmul.f32 %v1636_v3, %v1588_v25 }
 0xd74   :  { %v1643_v7 = vmul.f32 %v1640_v31, %v1639_v50 }
 0xd76   :  { %v1647_v55 = vadd.f32 %v1644_v39, %v1643_v7 }
 0xd78   :  { %v1663_v9 = vpack.c.bf16 %v1647_v55, %v1647_v55 }
 0xd82   :  { %3682 = vmatmul.msk.bf16.gmra.mxu1 %vm154_vm3, %v1663_v9 }
 0xdef   :  { %v1692_v56 = vpop.f32.mrf.mxu1 }
 0xdf0   :  { %v1693_v13 = vadd.f32 %v4030_v12, %v1692_v56 }
 0xdf2   :  { %v1701_v6 = vmax.f32 %v1693_v13, 0.0 }
 0xdf7   :  { %v1694_v19 = vpop.f32.mrf.mxu1 }
 0xdf8   :  { %v1695_v2 = vadd.f32 %v4030_v12, %v1694_v19 }
 0xdfa   :  { %v1702_v25 = vmax.f32 %v1695_v2, 0.0 }
 0xdfc   :  { %v1704_v57 = vpack.c.bf16 %v1702_v25, %v1701_v6 }
 0xdfe   :  { %3699 = vmatmul.msk.bf16.vlgmr.msra.gmra.mxu0 %vm1731_vm11, %v1704_v57 }
 0xdff   :  { %v1697_v59 = vpop.f32.mrf.mxu1 }
 0xe00   :  { %v1698_v21 = vadd.f32 %v4030_v12, %v1697_v59  ;;  %v4267_v59 = vld [vmem:[%s5535_s5 + $0x30] sm:$0x3f] }
 0xe02   :  { %v1703_v28 = vmax.f32 %v1698_v21, 0.0  ;;  %v1825_v21 = vperm.slane %v4267_v59, 4 }
 0xe04   :  { %v1705_v53 = vpack.c.bf16 %v1703_v28, %v1703_v28 }
 0xe07   :  { %v1699_v14 = vpop.f32.mrf.mxu1 }
 0xe0e   :  { %3700 = vmatmul.msk.bf16.gmra.mxu0 %vm1731_vm11, %v1705_v53 }
 0xe7b   :  { %v1747_v5 = vpop.f32.mrf.mxu0 }
 0xe7c   :  { %v1748_v0 = vadd.f32 %v4031_v30, %v1747_v5 }
 0xe7e   :  { %v1756_v43 = vadd.f32 %v1748_v0, %v1645_v58 }
 0xe80   :  { %v1759_v24 = vsel %vm154_vm3, %v1756_v43, 0.0 }
 0xe81   :  { %1760 = vadd.xlane.f32.xlu0 %v1759_v24 }
 0xe83   :  { %v1749_v8 = vpop.f32.mrf.mxu0 }
 0xe84   :  { %v1750_v29 = vadd.f32 %v4031_v30, %v1749_v8 }
 0xe86   :  { %v1757_v40 = vadd.f32 %v1750_v29, %v1646_v27  ;;  %v4963_v27 = vld [vmem:[#allocation2 + $0x50] sm:$0xff] }
 0xe87   :  { %1867 = vmatpush.bf16.msra.mxu2 %v4963_v27 }
 0xe88   :  { %v1762_v49 = vsel %vm154_vm3, %v1757_v40, 0.0 }
 0xe89   :  { %1763 = vadd.xlane.f32.xlu2 %v1762_v49 }
 0xe8b   :  { %v1752_v32 = vpop.f32.mrf.mxu0 }
 0xe8c   :  { %v1753_v47 = vadd.f32 %v4031_v30, %v1752_v32 }
 0xe8e   :  { %v1758_v62 = vadd.f32 %v1753_v47, %v1647_v55 }
 0xe90   :  { %v1765_v15 = vsel %vm808_vm10, %v1758_v62, 0.0 }
 0xe91   :  { %1766 = vadd.xlane.f32.xlu1 %v1765_v15 }
 0xe93   :  { %v1754_v34 = vpop.f32.mrf.mxu0 }
 0xef4   :  { %v1761_v48 = vpop.xlane.xlu0 %1760 }
 0xef5   :  { %v1768_v17 = vmul.f32 %v1761_v48, %v4646_v60 }
 0xef7   :  { %v1771_v41 = vsub.f32 %v1756_v43, %v1768_v17  ;;  %v1829_v43 = vperm.slane %v4267_v59, 5 }
 0xef9   :  { %v1774_v26 = vmul.f32 %v1771_v41, %v1771_v41 }
 0xefb   :  { %v1777_v37 = vsel %vm154_vm3, %v1774_v26, 0.0 }
 0xefc   :  { %v1764_v35 = vpop.xlane.xlu2 %1763  ;;  %1778 = vadd.xlane.f32.xlu0 %v1777_v37  ;;  %v4986_v37 = vld [vmem:[%s5535_s5 + $0x1a] ss:$0 sm:$0xff] }
 0xefd   :  { %v1769_v31 = vmul.f32 %v1764_v35, %v4646_v60 }
 0xeff   :  { %v1772_v44 = vsub.f32 %v1757_v40, %v1769_v31 }
 0xf01   :  { %v1775_v38 = vmul.f32 %v1772_v44, %v1772_v44 }
 0xf03   :  { %v1780_v42 = vsel %vm154_vm3, %v1775_v38, 0.0 }
 0xf04   :  { %v1767_v33 = vpop.xlane.xlu1 %1766  ;;  %1781 = vadd.xlane.f32.xlu2 %v1780_v42 }
 0xf05   :  { %v1770_v46 = vmul.f32 %v1767_v33, %v4646_v60 }
 0xf07   :  { %v1773_v45 = vsub.f32 %v1758_v62, %v1770_v46 }
 0xf09   :  { %v1776_v22 = vmul.f32 %v1773_v45, %v1773_v45 }
 0xf0b   :  { %v1783_v39 = vsel %vm808_vm10, %v1776_v22, 0.0 }
 0xf0c   :  { %1784 = vadd.xlane.f32.xlu1 %v1783_v39 }
 0xf6f   :  { %v1779_v52 = vpop.xlane.xlu0 %1778 }
 0xf70   :  { %v1786_v23 = vmul.f32 %v1779_v52, %v4646_v60 }
 0xf72   :  { %v1789_v58 = vadd.f32 1e-05, %v1786_v23 }
 0xf74   :  { %4147 = vrsqrt.f32 %v1789_v58  ;;  %vm1798_vm13 = vweird.f32 %v1789_v58 }
 0xf77   :  { %v1782_v63 = vpop.xlane.xlu2 %1781 }
 0xf78   :  { %v1787_v61 = vmul.f32 %v1782_v63, %v4646_v60 }
 0xf7a   :  { %v4148_v3 = vpop.eup %4147  ;;  %v1790_v50 = vadd.f32 1e-05, %v1787_v61 }
 0xf7b   :  { %v1793_v7 = vmul.f32 %v4148_v3, %v1789_v58  ;;  %vm1799_vm12 = vweird.f32 %v4148_v3 }
 0xf7c   :  { %4149 = vrsqrt.f32 %v1790_v50  ;;  %vm1800_vm15 = vmor %vm1798_vm13, %vm1799_vm12  ;;  %vm1808_vm2 = vweird.f32 %v1790_v50 }
 0xf7d   :  { %v1794_v55 = vmul.f32 %v4148_v3, %v1793_v7 }
 0xf7f   :  { %v1795_v9 = vmul.f32 0.5, %v1794_v55  ;;  %v1785_v36 = vpop.xlane.xlu1 %1784 }
 0xf80   :  { %v1788_v11 = vmul.f32 %v1785_v36, %v4646_v60 }
 0xf81   :  { %v1796_v4 = vsub.f32 1.5, %v1795_v9 }
 0xf82   :  { %v4150_v10 = vpop.eup %4149  ;;  %v1791_v56 = vadd.f32 1e-05, %v1788_v11 }
 0xf83   :  { %v1797_v12 = vmul.f32 %v4148_v3, %v1796_v4  ;;  %v1803_v13 = vmul.f32 %v4150_v10, %v1790_v50  ;;  %vm1809_vm1 = vweird.f32 %v4150_v10 }
 0xf84   :  { %4151 = vrsqrt.f32 %v1791_v56  ;;  %vm1810_vm0 = vmor %vm1808_vm2, %vm1809_vm1  ;;  %vm1818_vm13 = vweird.f32 %v1791_v56 }
 0xf85   :  { %v1804_v19 = vmul.f32 %v4150_v10, %v1803_v13  ;;  %v1801_v2 = vsel %vm1800_vm15, %v4148_v3, %v1797_v12 }
 0xf86   :  { %v1822_v14 = vmul.f32 %v1801_v2, %v1771_v41 }
 0xf87   :  { %v1805_v6 = vmul.f32 0.5, %v1804_v19 }
 0xf88   :  { %v1826_v0 = vmul.f32 %v1825_v21, %v1822_v14 }
 0xf89   :  { %v1806_v25 = vsub.f32 1.5, %v1805_v6 }
 0xf8a   :  { %v4152_v57 = vpop.eup %4151  ;;  %v4973_v32 = vadd.f32 %v1829_v43, %v1826_v0  ;;  %v4268_v0 = vld [vmem:[%s5535_s5 + $0x48] sm:$0xff] }
 0xf8b   :  { %v1807_v28 = vmul.f32 %v4150_v10, %v1806_v25  ;;  %v1813_v53 = vmul.f32 %v4152_v57, %v1791_v56  ;;  %vm1819_vm12 = vweird.f32 %v4152_v57 }
 0xf8c   :  { %vm1820_vm15 = vmor %vm1818_vm13, %vm1819_vm12 }
 0xf8d   :  { %v1811_v30 = vsel %vm1810_vm0, %v4150_v10, %v1807_v28  ;;  %v1814_v5 = vmul.f32 %v4152_v57, %v1813_v53 }
 0xf8e   :  { %v1823_v24 = vmul.f32 %v1811_v30, %v1772_v44 }
 0xf8f   :  { %v1815_v8 = vmul.f32 0.5, %v1814_v5 }
 0xf90   :  { %v1827_v29 = vmul.f32 %v1825_v21, %v1823_v24 }
 0xf91   :  { %v1816_v40 = vsub.f32 1.5, %v1815_v8 }
 0xf92   :  { %v4971_v49 = vadd.f32 %v1829_v43, %v1827_v29 }
 0xf93   :  { %v1817_v47 = vmul.f32 %v4152_v57, %v1816_v40 }
 0xf94   :  { %v1839_v62 = vpack.c.bf16 %v4971_v49, %v4973_v32 }
 0xf95   :  { %v1821_v15 = vsel %vm1820_vm15, %v4152_v57, %v1817_v47 }
 0xf96   :  { %3709 = vmatmul.msk.bf16.vlgmr.msra.gmra.mxu2 %vm154_vm3, %v1839_v62  ;;  %v1824_v34 = vmul.f32 %v1821_v15, %v1773_v45  ;;  %v4269_v62 = vld [vmem:[%s5535_s5 + $0x50] sm:$0xff] }
 0xf98   :  { %v1828_v48 = vmul.f32 %v1825_v21, %v1824_v34 }
 0xf9a   :  { %v4978_v17 = vadd.f32 %v1829_v43, %v1828_v48 }
 0xf9c   :  { %v1840_v41 = vpack.c.bf16 %v4978_v17, %v4978_v17 }
 0xfa6   :  { %3710 = vmatmul.msk.bf16.gmra.mxu2 %vm154_vm3, %v1840_v41 }
0x1019   :  { %v1869_v26 = vpop.f32.mrf.mxu2 }
0x101a   :  { %v1870_v42 = vadd.f32 %v4986_v37, %v1869_v26 }
0x1021   :  { %v1871_v35 = vpop.f32.mrf.mxu2 }
0x1022   :  { %v1872_v31 = vadd.f32 %v4986_v37, %v1871_v35 }
0x1024   :  { %2017 = vrot.lane.b32.xlu0 %v1872_v31, %s4303_s17  ;;  %1883 = vrot.lane.b32.xlu1 %v1872_v31, %s4302_s16  ;;  %v5023_v46 = vpack.i.bf16 %v1870_v42, %v1872_v31 }
0x1029   :  { %v1874_v44 = vpop.f32.mrf.mxu2 }
0x102a   :  { %v4992_v38 = vadd.f32 %v4986_v37, %v1874_v44 }
0x102c   :  { %2019 = vrot.lane.b32.xlu2 %v4992_v38, %s4303_s17  ;;  %1885 = vrot.lane.b32.xlu0 %v4992_v38, %s4302_s16 }
0x102d   :  { %2009 = vrot.lane.b32.xlu1 %v1870_v42, %s4304_s24 }
0x1031   :  { %v1876_v33 = vpop.f32.mrf.mxu2 }
0x1034   :  { %2015 = vrot.lane.b32.xlu2 %v1870_v42, %s4303_s17  ;;  %1881 = vrot.lane.b32.xlu0 %v1870_v42, %s4302_s16 }
0x1035   :  { %2287 = vrot.lane.b32.xlu1 %v4992_v38, %s4305_s25 }
0x103c   :  { %2153 = vrot.lane.b32.xlu2 %v4992_v38, %s4306_s27  ;;  %2011 = vrot.lane.b32.xlu0 %v1872_v31, %s4304_s24 }
0x103d   :  { %2285 = vrot.lane.b32.xlu1 %v1872_v31, %s4305_s25 }
0x1044   :  { %2151 = vrot.lane.b32.xlu2 %v1872_v31, %s4306_s27  ;;  %2149 = vrot.lane.b32.xlu0 %v1870_v42, %s4306_s27 }
0x1045   :  { %2143 = vrot.lane.b32.xlu1 %v1870_v42, %s4308_s28 }
0x104c   :  { %2283 = vrot.lane.b32.xlu2 %v1870_v42, %s4305_s25  ;;  %2013 = vrot.lane.b32.xlu0 %v4992_v38, %s4304_s24 }
0x104d   :  { %2279 = vrot.lane.b32.xlu1 %v1872_v31, %s4307_s4 }
0x1054   :  { %2145 = vrot.lane.b32.xlu2 %v1872_v31, %s4308_s28  ;;  %2277 = vrot.lane.b32.xlu0 %v1870_v42, %s4307_s4 }
0x1055   :  { %1968 = vrot.lane.b32.xlu1 %v4992_v38, %s4299_s26 }
0x105c   :  { %2281 = vrot.lane.b32.xlu2 %v4992_v38, %s4307_s4  ;;  %2147 = vrot.lane.b32.xlu0 %v4992_v38, %s4308_s28 }
0x1064   :  { %3959 = vrot.lane.b32.xlu2 %v5023_v46, %s4310_s30  ;;  %3964 = vrot.lane.b32.xlu0 %v5023_v46, %s4299_s26 }
0x106c   :  { %2370 = vrot.lane.b32.xlu2 %v4992_v38, %s4309_s29  ;;  %2102 = vrot.lane.b32.xlu0 %v4992_v38, %s4310_s30 }
0x1086   :  { %v2020_v45 = vpop.permute.xlu2 %2019 }
0x1087   :  { %3721 = vmatpush.xpose.msk.msrb.mxu0 %vm188_vm5, %v2020_v45 }
0x108e   :  { %v2016_v22 = vpop.permute.xlu2 %2015 }
0x1096   :  { %v2018_v39 = vpop.permute.xlu0 %2017  ;;  %v1884_v52 = vpop.permute.xlu1 %1883 }
0x1097   :  { %3722 = vmatpush.xpose.msk.msrb.mxu0 %vm188_vm5, %v2018_v39  ;;  %v2154_v58 = vpop.permute.xlu2 %2153  ;;  %v4270_v39 = vld [vmem:[%s5535_s5 + $0x58] sm:$0xf] }
0x109b   :  { %3723 = vmatpush.xpose.msk.msrb.mxu0 %vm188_vm5, %v2016_v22 }
0x109e   :  { %v1886_v23 = vpop.permute.xlu0 %1885 }
0x109f   :  { %v2010_v63 = vpop.permute.xlu1 %2009  ;;  %3711 = vmatpush.xpose.msk.msra.mxu3 %vm188_vm5, %v1886_v23  ;;  %v2152_v50 = vpop.permute.xlu2 %2151 }
0x10a0   :  { %3724 = vmatmul.msk.f32.vlgmr.msrb.gmra.mxu0 %vm188_vm5, %v2010_v63 }
0x10a3   :  { %3712 = vmatpush.xpose.msk.msra.mxu3 %vm188_vm5, %v1884_v52 }
0x10a6   :  { %v1882_v61 = vpop.permute.xlu0 %1881 }
0x10a7   :  { %v2288_v3 = vpop.permute.xlu1 %2287  ;;  %3713 = vmatpush.xpose.msk.msra.mxu3 %vm188_vm5, %v1882_v61  ;;  %v2284_v9 = vpop.permute.xlu2 %2283 }
0x10a8   :  { %3741 = vmatpush.xpose.msk.msra.mxu0 %vm188_vm5, %v2288_v3 }
0x10aa   :  { %3714 = vmatmul.msk.f32.vlgmr.msra.gmra.mxu3 %vm188_vm5, %v1870_v42 }
0x10ab   :  { %3731 = vmatpush.xpose.msk.msrb.mxu3 %vm188_vm5, %v2154_v58 }
0x10ae   :  { %v2012_v7 = vpop.permute.xlu0 %2011 }
0x10af   :  { %3732 = vmatpush.xpose.msk.msrb.mxu3 %vm188_vm5, %v2152_v50  ;;  %v2286_v55 = vpop.permute.xlu1 %2285  ;;  %3725 = vmatmul.msk.f32.gmra.mxu0 %vm188_vm5, %v2012_v7  ;;  %v2146_v56 = vpop.permute.xlu2 %2145 }
0x10b0   :  { %3742 = vmatpush.xpose.msk.msra.mxu0 %vm188_vm5, %v2286_v55 }
0x10b2   :  { %3715 = vmatmul.msk.f32.gmra.mxu3 %vm188_vm5, %v1872_v31 }
0x10b4   :  { %3743 = vmatpush.xpose.msk.msra.mxu0 %vm188_vm5, %v2284_v9 }
0x10b6   :  { %v2150_v36 = vpop.permute.xlu0 %2149 }
0x10b7   :  { %v2144_v11 = vpop.permute.xlu1 %2143  ;;  %3733 = vmatpush.xpose.msk.msrb.mxu3 %vm188_vm5, %v2150_v36  ;;  %v2282_v2 = vpop.permute.xlu2 %2281 }
0x10ba   :  { %3716 = vmatmul.msk.f32.gmra.mxu3 %vm188_vm5, %v4992_v38 }
0x10be   :  { %v2014_v4 = vpop.permute.xlu0 %2013 }
0x10bf   :  { %v2280_v10 = vpop.permute.xlu1 %2279  ;;  %3726 = vmatmul.msk.f32.gmra.mxu0 %vm188_vm5, %v2014_v4  ;;  %v3960_v57 = vpop.permute.xlu2 %3959 }
0x10c0   :  { %v3961_v14 = vunpack.i.l.bf16 %v3960_v57  ;;  %v3962_v28 = vunpack.i.h.bf16 %v3960_v57 }
0x10c2   :  { %3734 = vmatmul.msk.f32.vlgmr.msrb.gmra.mxu3 %vm188_vm5, %v2144_v11 }
0x10c6   :  { %v2278_v12 = vpop.permute.xlu0 %2277 }
0x10c7   :  { %v1969_v13 = vpop.permute.xlu1 %1968  ;;  %3744 = vmatmul.msk.f32.vlgmr.msra.gmra.mxu0 %vm188_vm5, %v2278_v12  ;;  %v2371_v53 = vpop.permute.xlu2 %2370 }
0x10c8   :  { %3717 = vmatpush.msk.msra.mxu1 %vm285_vm4, %v1969_v13 }
0x10ca   :  { %3735 = vmatmul.msk.f32.gmra.mxu3 %vm188_vm5, %v2146_v56 }
0x10ce   :  { %v2148_v19 = vpop.permute.xlu0 %2147 }
0x10cf   :  { %3745 = vmatmul.msk.f32.gmra.mxu0 %vm188_vm5, %v2280_v10 }
0x10d2   :  { %3736 = vmatmul.msk.f32.gmra.mxu3 %vm188_vm5, %v2148_v19 }
0x10d6   :  { %v3965_v6 = vpop.permute.xlu0 %3964 }
0x10d7   :  { %v3966_v25 = vunpack.i.l.bf16 %v3965_v6  ;;  %3746 = vmatmul.msk.f32.gmra.mxu0 %vm188_vm5, %v2282_v2  ;;  %v3967_v59 = vunpack.i.h.bf16 %v3965_v6 }
0x10d9   :  { %1997 = vmatpush.msra.mxu1 %v3966_v25 }
0x10db   :  { %1998 = vmatpush.msra.mxu1 %v3967_v59 }
0x10de   :  { %v2103_v21 = vpop.permute.xlu0 %2102 }
0x10df   :  { %3727 = vmatpush.msk.msrb.mxu2 %vm285_vm4, %v2103_v21 }
0x10e1   :  { %2131 = vmatpush.msrb.mxu2 %v3961_v14 }
0x10e3   :  { %2132 = vmatpush.msrb.mxu2 %v3962_v28 }
0x10e5   :  { %3747 = vmatpush.msk.msra.mxu2 %vm285_vm4, %v2371_v53 }
0x111d   :  { %v2050_v30 = vpop.f32.mrf.mxu0 }
0x111e   :  { %v2059_v5 = vmul.f32 0.35355338, %v2050_v30 }
0x1120   :  { %v2062_v43 = vadd.f32 %v4268_v0, %v2059_v5 }
0x1122   :  { %v2065_v24 = vsel %vm233_vm6, %v2062_v43, -inf }
0x1123   :  { %2066 = vmax.xlane.f32.xlu1 %v2065_v24 }
0x112c   :  { %v2053_v8 = vpop.f32.mrf.mxu0 }
0x112d   :  { %v2060_v29 = vmul.f32 0.35355338, %v2053_v8  ;;  %v1916_v40 = vpop.f32.mrf.mxu3 }
0x112e   :  { %v1925_v47 = vmul.f32 0.35355338, %v1916_v40 }
0x112f   :  { %v5068_v15 = vadd.f32 %v4269_v62, %v2060_v29 }
0x1130   :  { %v1928_v34 = vadd.f32 %v4268_v0, %v1925_v47 }
0x1131   :  { %v2068_v48 = vsel %vm233_vm6, %v5068_v15, -inf }
0x1132   :  { %2069 = vmax.xlane.f32.xlu2 %v2068_v48  ;;  %v1931_v41 = vsel %vm233_vm6, %v1928_v34, -inf }
0x1133   :  { %1932 = vmax.xlane.f32.xlu0 %v1931_v41 }
0x1135   :  { %v1919_v26 = vpop.f32.mrf.mxu3 }
0x1136   :  { %v1926_v35 = vmul.f32 0.35355338, %v1919_v26 }
0x1138   :  { %v1929_v31 = vadd.f32 %v4269_v62, %v1926_v35 }
0x113a   :  { %v1934_v44 = vsel %vm233_vm6, %v1929_v31, -inf }
0x113b   :  { %1935 = vmax.xlane.f32.xlu1 %v1934_v44 }
0x113c   :  { %v2056_v42 = vpop.f32.mrf.mxu0 }
0x113d   :  { %v2061_v33 = vmul.f32 0.35355338, %v2056_v42  ;;  %v1922_v45 = vpop.f32.mrf.mxu3 }
0x113e   :  { %v1927_v22 = vmul.f32 0.35355338, %v1922_v45 }
0x113f   :  { %v5077_v52 = vadd.f32 %v4270_v39, %v2061_v33 }
0x1140   :  { %v5079_v23 = vadd.f32 %v4270_v39, %v1927_v22 }
0x1141   :  { %v2071_v58 = vsel %vm240_vm7, %v5077_v52, -inf }
0x1142   :  { %2072 = vmax.xlane.f32.xlu0 %v2071_v58  ;;  %v1937_v63 = vsel %vm240_vm7, %v5079_v23, -inf }
0x1143   :  { %1938 = vmax.xlane.f32.xlu2 %v1937_v63 }
0x1144   :  { %v2318_v61 = vpop.f32.mrf.mxu0 }
0x1145   :  { %v2327_v3 = vmul.f32 0.35355338, %v2318_v61  ;;  %v2184_v50 = vpop.f32.mrf.mxu3 }
0x1146   :  { %v2193_v7 = vmul.f32 0.35355338, %v2184_v50 }
0x1147   :  { %v5085_v55 = vadd.f32 %v4268_v0, %v2327_v3 }
0x1148   :  { %v5087_v9 = vadd.f32 %v4268_v0, %v2193_v7 }
0x1149   :  { %v2333_v36 = vsel %vm233_vm6, %v5085_v55, -inf }
0x114a   :  { %2334 = vmax.xlane.f32.xlu1 %v2333_v36  ;;  %v2199_v11 = vsel %vm233_vm6, %v5087_v9, -inf }
0x114b   :  { %2200 = vmax.xlane.f32.xlu0 %v2199_v11 }
0x114c   :  { %v2321_v4 = vpop.f32.mrf.mxu0 }
0x114d   :  { %v2328_v10 = vmul.f32 0.35355338, %v2321_v4  ;;  %v2187_v56 = vpop.f32.mrf.mxu3 }
0x114e   :  { %v2194_v12 = vmul.f32 0.35355338, %v2187_v56 }
0x114f   :  { %v5093_v13 = vadd.f32 %v4269_v62, %v2328_v10 }
0x1150   :  { %v5095_v19 = vadd.f32 %v4269_v62, %v2194_v12 }
0x1151   :  { %v2336_v2 = vsel %vm233_vm6, %v5093_v13, -inf }
0x1152   :  { %2337 = vmax.xlane.f32.xlu2 %v2336_v2  ;;  %v2202_v6 = vsel %vm233_vm6, %v5095_v19, -inf }
0x1153   :  { %2203 = vmax.xlane.f32.xlu1 %v2202_v6 }
0x1154   :  { %v2324_v25 = vpop.f32.mrf.mxu0 }
0x1155   :  { %v2329_v57 = vmul.f32 0.35355338, %v2324_v25  ;;  %v2190_v59 = vpop.f32.mrf.mxu3 }
0x1156   :  { %v2195_v21 = vmul.f32 0.35355338, %v2190_v59 }
0x1157   :  { %v5101_v14 = vadd.f32 %v4270_v39, %v2329_v57 }
0x1158   :  { %v5103_v28 = vadd.f32 %v4270_v39, %v2195_v21 }
0x1159   :  { %v2339_v53 = vsel %vm240_vm7, %v5101_v14, -inf }
0x115a   :  { %2340 = vmax.xlane.f32.xlu2 %v2339_v53  ;;  %v2205_v30 = vsel %vm240_vm7, %v5103_v28, -inf }
0x115b   :  { %2206 = vmax.xlane.f32.xlu1 %v2205_v30 }
0x1196   :  { %v2067_v5 = vpop.xlane.xlu1 %2066 }
0x1197   :  { %v2074_v0 = vsub.f32 %v2062_v43, %v2067_v5 }
0x1199   :  { %v2077_v24 = vmul.f32 1.442695, %v2074_v0 }
0x119b   :  { %4153 = vpow2.f32 %v2077_v24 }
0x11a1   :  { %v5109_v8 = vpop.eup %4153 }
0x11a2   :  { %v2083_v29 = vsel %vm233_vm6, %v5109_v8, 0.0 }
0x11a3   :  { %2084 = vadd.xlane.f32.xlu0 %v2083_v29 }
0x11a5   :  { %v2070_v40 = vpop.xlane.xlu2 %2069 }
0x11a6   :  { %v1933_v47 = vpop.xlane.xlu0 %1932  ;;  %v2075_v48 = vsub.f32 %v5068_v15, %v2070_v40 }
0x11a7   :  { %v1940_v62 = vsub.f32 %v1928_v34, %v1933_v47 }
0x11a8   :  { %v2079_v26 = vmul.f32 1.442695, %v2075_v48 }
0x11a9   :  { %v1943_v41 = vmul.f32 1.442695, %v1940_v62 }
0x11ab   :  { %4155 = vpow2.f32 %v1943_v41 }
0x11ac   :  { %4157 = vpow2.f32 %v2079_v26 }
0x11ae   :  { %v1936_v35 = vpop.xlane.xlu1 %1935 }
0x11af   :  { %v1941_v44 = vsub.f32 %v1929_v31, %v1936_v35 }
0x11b1   :  { %v5114_v42 = vpop.eup %4155  ;;  %v1945_v43 = vmul.f32 1.442695, %v1941_v44 }
0x11b2   :  { %v1949_v33 = vsel %vm233_vm6, %v5114_v42, 0.0  ;;  %v5119_v39 = vpop.eup %4157 }
0x11b3   :  { %4159 = vpow2.f32 %v1945_v43  ;;  %1950 = vadd.xlane.f32.xlu1 %v1949_v33  ;;  %v2086_v3 = vsel %vm233_vm6, %v5119_v39, 0.0 }
0x11b5   :  { %v2073_v45 = vpop.xlane.xlu0 %2072 }
0x11b6   :  { %v2076_v22 = vsub.f32 %v5077_v52, %v2073_v45  ;;  %v1939_v34 = vpop.xlane.xlu2 %1938 }
0x11b7   :  { %v1942_v15 = vsub.f32 %v5079_v23, %v1939_v34 }
0x11b8   :  { %v2081_v58 = vmul.f32 1.442695, %v2076_v22 }
0x11b9   :  { %v5122_v63 = vpop.eup %4159  ;;  %v1947_v31 = vmul.f32 1.442695, %v1942_v15 }
0x11ba   :  { %4161 = vpow2.f32 %v2081_v58  ;;  %v1952_v61 = vsel %vm233_vm6, %v5122_v63, 0.0 }
0x11bb   :  { %4163 = vpow2.f32 %v1947_v31  ;;  %1953 = vadd.xlane.f32.xlu2 %v1952_v61  ;;  %2087 = vadd.xlane.f32.xlu1 %v2086_v3 }
0x11bd   :  { %v2335_v52 = vpop.xlane.xlu1 %2334 }
0x11be   :  { %v2342_v50 = vsub.f32 %v5085_v55, %v2335_v52 }
0x11c0   :  { %v5129_v7 = vpop.eup %4161  ;;  %v2345_v23 = vmul.f32 1.442695, %v2342_v50 }
0x11c1   :  { %v5131_v36 = vpop.eup %4163  ;;  %v2089_v11 = vsel %vm240_vm7, %v5129_v7, 0.0 }
0x11c2   :  { %4165 = vpow2.f32 %v2345_v23  ;;  %2090 = vadd.xlane.f32.xlu0 %v2089_v11  ;;  %v1955_v4 = vsel %vm240_vm7, %v5131_v36, 0.0 }
0x11c3   :  { %1956 = vadd.xlane.f32.xlu1 %v1955_v4 }
0x11c5   :  { %v2338_v10 = vpop.xlane.xlu2 %2337 }
0x11c6   :  { %v2343_v56 = vsub.f32 %v5093_v13, %v2338_v10  ;;  %v2201_v13 = vpop.xlane.xlu0 %2200  ;;  %v2204_v21 = vpop.xlane.xlu1 %2203 }
0x11c7   :  { %v2208_v57 = vsub.f32 %v5087_v9, %v2201_v13  ;;  %v2209_v53 = vsub.f32 %v5095_v19, %v2204_v21 }
0x11c8   :  { %v5138_v12 = vpop.eup %4165  ;;  %v2347_v55 = vmul.f32 1.442695, %v2343_v56 }
0x11c9   :  { %v2351_v2 = vsel %vm233_vm6, %v5138_v12, 0.0  ;;  %v2211_v59 = vmul.f32 1.442695, %v2208_v57  ;;  %v2213_v0 = vmul.f32 1.442695, %v2209_v53 }
0x11ca   :  { %4167 = vpow2.f32 %v2347_v55  ;;  %2352 = vadd.xlane.f32.xlu2 %v2351_v2 }
0x11cb   :  { %4169 = vpow2.f32 %v2211_v59 }
0x11cc   :  { %4171 = vpow2.f32 %v2213_v0 }
0x11cd   :  { %v2341_v30 = vpop.xlane.xlu2 %2340 }
0x11ce   :  { %v2344_v5 = vsub.f32 %v5101_v14, %v2341_v30  ;;  %v2207_v40 = vpop.xlane.xlu1 %2206 }
0x11d0   :  { %v5142_v6 = vpop.eup %4167  ;;  %v2349_v29 = vmul.f32 1.442695, %v2344_v5 }
0x11d1   :  { %v2354_v25 = vsel %vm233_vm6, %v5142_v6, 0.0  ;;  %v5155_v24 = vpop.eup %4169 }
0x11d2   :  { %2355 = vadd.xlane.f32.xlu1 %v2354_v25  ;;  %4173 = vpow2.f32 %v2349_v29  ;;  %v5160_v9 = vpop.eup %4171 }
0x11d3   :  { %v2220_v14 = vsel %vm233_vm6, %v5160_v9, 0.0 }
0x11d6   :  { %3969 = vrot.lane.b32.xlu0 %v5023_v46, %s4309_s29 }
0x11d8   :  { %v5162_v47 = vpop.eup %4173 }
0x11d9   :  { %v2357_v62 = vsel %vm240_vm7, %v5162_v47, 0.0 }
0x11e2   :  { %3974 = vrot.lane.b32.xlu2 %v5023_v46, %s4311_s7  ;;  %v2217_v46 = vsel %vm233_vm6, %v5155_v24, 0.0 }
0x11eb   :  { %2236 = vrot.lane.b32.xlu1 %v4992_v38, %s4311_s7  ;;  %v2210_v38 = vsub.f32 %v5103_v28, %v2207_v40 }
0x11ed   :  { %v2215_v19 = vmul.f32 1.442695, %v2210_v38 }
0x11ef   :  { %4175 = vpow2.f32 %v2215_v19 }
0x11f5   :  { %v5168_v48 = vpop.eup %4175 }
0x11f6   :  { %v2223_v41 = vsel %vm240_vm7, %v5168_v48, 0.0 }
0x1200   :  { %2218 = vadd.xlane.f32.xlu0 %v2217_v46 }
0x1208   :  { %2221 = vadd.xlane.f32.xlu0 %v2220_v14 }
0x120b   :  { %2358 = vadd.xlane.f32.xlu2 %v2357_v62 }
0x1215   :  { %2224 = vadd.xlane.f32.xlu1 %v2223_v41 }
0x1216   :  { %v2085_v28 = vpop.xlane.xlu0 %2084 }
0x1217   :  { %4177 = vrcp.f32 %v2085_v28 }
0x121c   :  { %2460 = vrot.lane.b32.xlu0 %v4959_v51, %s4312_s8 }
0x121d   :  { %v4178_v26 = vpop.eup %4177 }
0x121e   :  { %v2095_v35 = vmul.f32 %v4178_v26, %v5109_v8 }
0x1220   :  { %3728 = vmatmul.msk.f32.vlgmr.msrb.gmra.mxu2 %vm233_vm6, %v2095_v35 }
0x1226   :  { %v1951_v44 = vpop.xlane.xlu1 %1950 }
0x1227   :  { %4179 = vrcp.f32 %v1951_v44 }
0x122d   :  { %v4180_v43 = vpop.eup %4179 }
0x122e   :  { %v1961_v33 = vmul.f32 %v4180_v43, %v5114_v42  ;;  %v1954_v45 = vpop.xlane.xlu2 %1953  ;;  %v2088_v22 = vpop.xlane.xlu1 %2087 }
0x122f   :  { %4181 = vrcp.f32 %v1954_v45 }
0x1230   :  { %4183 = vrcp.f32 %v2088_v22  ;;  %3718 = vmatmul.msk.f32.vlgmr.msra.gmra.mxu1 %vm233_vm6, %v1961_v33 }
0x1235   :  { %v4182_v34 = vpop.eup %4181  ;;  %v2091_v15 = vpop.xlane.xlu0 %2090 }
0x1236   :  { %v4184_v58 = vpop.eup %4183  ;;  %4185 = vrcp.f32 %v2091_v15  ;;  %v1957_v51 = vpop.xlane.xlu1 %1956  ;;  %v1962_v8 = vmul.f32 %v4182_v34, %v5122_v63 }
0x1237   :  { %4187 = vrcp.f32 %v1957_v51  ;;  %v2096_v31 = vmul.f32 %v4184_v58, %v5119_v39 }
0x1238   :  { %3719 = vmatmul.msk.f32.gmra.mxu1 %vm233_vm6, %v1962_v8 }
0x1239   :  { %3729 = vmatmul.msk.f32.gmra.mxu2 %vm233_vm6, %v2096_v31 }
0x123c   :  { %v4186_v42 = vpop.eup %4185 }
0x123d   :  { %v4188_v61 = vpop.eup %4187  ;;  %v2097_v3 = vmul.f32 %v4186_v42, %v5129_v7  ;;  %v2353_v50 = vpop.xlane.xlu2 %2352 }
0x123e   :  { %v1963_v52 = vmul.f32 %v4188_v61, %v5131_v36  ;;  %4189 = vrcp.f32 %v2353_v50 }
0x1240   :  { %3720 = vmatmul.msk.f32.gmra.mxu1 %vm233_vm6, %v1963_v52 }
0x1241   :  { %3730 = vmatmul.msk.f32.gmra.mxu2 %vm233_vm6, %v2097_v3 }
0x1244   :  { %v4190_v11 = vpop.eup %4189 }
0x1245   :  { %v2356_v63 = vpop.xlane.xlu1 %2355  ;;  %v2363_v10 = vmul.f32 %v4190_v11, %v5138_v12  ;;  %v3975_v56 = vpop.permute.xlu2 %3974 }
0x1246   :  { %4191 = vrcp.f32 %v2356_v63  ;;  %v3976_v2 = vunpack.i.l.bf16 %v3975_v56  ;;  %v3977_v25 = vunpack.i.h.bf16 %v3975_v56 }
0x1248   :  { %v3970_v23 = vpop.permute.xlu0 %3969 }
0x1249   :  { %v3971_v39 = vunpack.i.l.bf16 %v3970_v23  ;;  %v3972_v4 = vunpack.i.h.bf16 %v3970_v23 }
0x124b   :  { %2399 = vmatpush.msra.mxu2 %v3971_v39 }
0x124c   :  { %v4192_v7 = vpop.eup %4191 }
0x124d   :  { %2400 = vmatpush.msra.mxu2 %v3972_v4  ;;  %v2364_v36 = vmul.f32 %v4192_v7, %v5142_v6 }
0x124e   :  { %3748 = vmatmul.msk.f32.vlgmr.msra.gmra.mxu2 %vm233_vm6, %v2363_v10 }
0x1256   :  { %3749 = vmatmul.msk.f32.gmra.mxu2 %vm233_vm6, %v2364_v36 }
0x125d   :  { %v2237_v55 = vpop.permute.xlu1 %2236 }
0x125e   :  { %3737 = vmatpush.msk.msrb.mxu1 %vm285_vm4, %v2237_v55 }
0x1260   :  { %2265 = vmatpush.msrb.mxu1 %v3976_v2 }
0x1262   :  { %2266 = vmatpush.msrb.mxu1 %v3977_v25 }
0x1273   :  { %v2219_v13 = vpop.xlane.xlu0 %2218 }
0x1274   :  { %4193 = vrcp.f32 %v2219_v13 }
0x127a   :  { %v4194_v57 = vpop.eup %4193 }
0x127b   :  { %v2229_v12 = vmul.f32 %v4194_v57, %v5155_v24  ;;  %v2222_v59 = vpop.xlane.xlu0 %2221 }
0x127c   :  { %4195 = vrcp.f32 %v2222_v59 }
0x127d   :  { %3738 = vmatmul.msk.f32.vlgmr.msrb.gmra.mxu1 %vm233_vm6, %v2229_v12 }
0x127e   :  { %v2359_v6 = vpop.xlane.xlu2 %2358 }
0x127f   :  { %4197 = vrcp.f32 %v2359_v6 }
0x1282   :  { %v4196_v21 = vpop.eup %4195 }
0x1283   :  { %v2230_v53 = vmul.f32 %v4196_v21, %v5160_v9 }
0x1285   :  { %v4198_v30 = vpop.eup %4197  ;;  %3739 = vmatmul.msk.f32.gmra.mxu1 %vm233_vm6, %v2230_v53 }
0x1286   :  { %v2365_v5 = vmul.f32 %v4198_v30, %v5162_v47 }
0x1288   :  { %v2225_v0 = vpop.xlane.xlu1 %2224  ;;  %3750 = vmatmul.msk.f32.gmra.mxu2 %vm233_vm6, %v2365_v5 }
0x1289   :  { %4199 = vrcp.f32 %v2225_v0 }
0x128e   :  { %v2461_v33 = vpop.permute.xlu0 %2460 }
0x128f   :  { %v4200_v29 = vpop.eup %4199  ;;  %2480 = vmatpush.bf16.msra.mxu3 %v2461_v33 }
0x1290   :  { %v2231_v24 = vmul.f32 %v4200_v29, %v5168_v48 }
0x1292   :  { %3740 = vmatmul.msk.f32.gmra.mxu1 %vm233_vm6, %v2231_v24 }
0x12a3   :  { %v2134_v46 = vpop.f32.mrf.mxu2 }
0x12ad   :  { %v2000_v62 = vpop.f32.mrf.mxu1 }
0x12b5   :  { %v2003_v41 = vpop.f32.mrf.mxu1 }
0x12bc   :  { %v2137_v40 = vpop.f32.mrf.mxu2 }
0x12bd   :  { %v3978_v38 = vpack.i.bf16 %v2137_v40, %v2134_v46  ;;  %v2006_v28 = vpop.f32.mrf.mxu1  ;;  %v5227_v46 = vld [vmem:[#allocation2 + $0x68] sm:$0xff] }
0x12be   :  { %2601 = vmatpush.bf16.msra.mxu1 %v5227_v46 }
0x12bf   :  { %3979 = vrot.lane.b32.xlu2 %v3978_v38, %s4313_s9  ;;  %v5232_v38 = vld [vmem:[#allocation2 + $0x60] sm:$0xff] }
0x12c2   :  { %2602 = vmatpush.bf16.msra.mxu1 %v5232_v38 }
0x12c4   :  { %v2140_v9 = vpop.f32.mrf.mxu2 }
0x12c7   :  { %2418 = vrot.lane.b32.xlu2 %v2140_v9, %s4313_s9 }
0x12d1   :  { %v2402_v19 = vpop.f32.mrf.mxu2 }
0x12d9   :  { %v2405_v14 = vpop.f32.mrf.mxu2 }
0x12da   :  { %v3988_v47 = vpack.i.bf16 %v2405_v14, %v2402_v19 }
0x12dc   :  { %3989 = vrot.lane.b32.xlu1 %v3988_v47, %s4315_s11 }
0x12fa   :  { %v2268_v26 = vpop.f32.mrf.mxu1 }
0x1302   :  { %v2271_v48 = vpop.f32.mrf.mxu1 }
0x1303   :  { %v3983_v35 = vpack.i.bf16 %v2271_v48, %v2268_v26 }
0x1305   :  { %3984 = vrot.lane.b32.xlu0 %v3983_v35, %s4314_s10 }
0x130b   :  { %v2408_v44 = vpop.f32.mrf.mxu2 }
0x130c   :  { %2442 = vrot.lane.b32.xlu2 %v2408_v44, %s4315_s11 }
0x130d   :  { %2458 = vrot.lane.b32.xlu0 %v4963_v27, %s4312_s8 }
0x130f   :  { %v2274_v43 = vpop.f32.mrf.mxu1 }
0x1315   :  { %2430 = vrot.lane.b32.xlu0 %v2274_v43, %s4314_s10 }
0x1319   :  { %v3980_v45 = vpop.permute.xlu2 %3979 }
0x131a   :  { %v3982_v22 = vunpack.i.h.bf16 %v3980_v45  ;;  %v3981_v34 = vunpack.i.l.bf16 %v3980_v45 }
0x131c   :  { %v2447_v31 = vsel %vm188_vm5, %v2000_v62, %v3981_v34  ;;  %v2448_v42 = vsel %vm188_vm5, %v2003_v41, %v3982_v22  ;;  %v5250_v22 = vld [vmem:[%s5535_s5 + $0x1b] ss:$0 sm:$0xff] }
0x131d   :  { %2465 = vrot.lane.b32.xlu0 %v4986_v37, %s4312_s8 }
0x1321   :  { %v2419_v11 = vpop.permute.xlu2 %2418 }
0x1322   :  { %v2449_v4 = vsel %vm188_vm5, %v2006_v28, %v2419_v11  ;;  %v5259_v11 = vld [vmem:[%s5535_s5 + $0x38] sm:$0x3f] }
0x134e   :  { %v3990_v8 = vpop.permute.xlu1 %3989 }
0x134f   :  { %v3992_v3 = vunpack.i.h.bf16 %v3990_v8  ;;  %v3991_v52 = vunpack.i.l.bf16 %v3990_v8 }
0x1366   :  { %v2443_v7 = vpop.permute.xlu2 %2442 }
0x1377   :  { %v3985_v15 = vpop.permute.xlu0 %3984 }
0x1378   :  { %v3987_v58 = vunpack.i.h.bf16 %v3985_v15  ;;  %v3986_v51 = vunpack.i.l.bf16 %v3985_v15 }
0x137a   :  { %v2451_v27 = vsel %vm755_vm8, %v2448_v42, %v3987_v58  ;;  %v2450_v61 = vsel %vm755_vm8, %v2447_v31, %v3986_v51 }
0x137b   :  { %v2454_v37 = vsel %vm759_vm9, %v2451_v27, %v3992_v3  ;;  %v2453_v50 = vsel %vm759_vm9, %v2450_v61, %v3991_v52 }
0x137c   :  { %v2456_v23 = vpack.c.bf16 %v2454_v37, %v2453_v50 }
0x137f   :  { %v2459_v63 = vpop.permute.xlu0 %2458 }
0x1380   :  { %2481 = vmatpush.bf16.msra.mxu3 %v2459_v63 }
0x1383   :  { %3751 = vmatmul.msk.bf16.vlgmr.msra.gmra.mxu3 %vm154_vm3, %v2456_v23 }
0x1387   :  { %v2431_v39 = vpop.permute.xlu0 %2430 }
0x1388   :  { %v2452_v10 = vsel %vm755_vm8, %v2449_v4, %v2431_v39 }
0x1389   :  { %v2455_v36 = vsel %vm759_vm9, %v2452_v10, %v2443_v7 }
0x138a   :  { %v2457_v56 = vpack.c.bf16 %v2455_v36, %v2455_v36 }
0x138f   :  { %v2466_v55 = vpop.permute.xlu0 %2465 }
0x1393   :  { %3752 = vmatmul.msk.bf16.gmra.mxu3 %vm154_vm3, %v2457_v56  ;;  %v2561_v56 = vperm.slane %v5259_v11, 0 }
0x1406   :  { %v2483_v2 = vpop.f32.mrf.mxu3 }
0x1407   :  { %v2484_v25 = vadd.f32 %v2483_v2, %v2466_v55 }
0x1409   :  { %v2492_v13 = vadd.f32 %v2484_v25, %v4973_v32 }
0x140b   :  { %v2495_v57 = vsel %vm154_vm3, %v2492_v13, 0.0 }
0x140c   :  { %2496 = vadd.xlane.f32.xlu1 %v2495_v57 }
0x140e   :  { %v2485_v12 = vpop.f32.mrf.mxu3 }
0x140f   :  { %v2486_v59 = vadd.f32 %v2485_v12, %v2466_v55  ;;  %v2565_v12 = vperm.slane %v5259_v11, 1 }
0x1411   :  { %v2493_v6 = vadd.f32 %v2486_v59, %v4971_v49 }
0x1413   :  { %v2498_v21 = vsel %vm154_vm3, %v2493_v6, 0.0 }
0x1414   :  { %2499 = vadd.xlane.f32.xlu2 %v2498_v21 }
0x1416   :  { %v2488_v53 = vpop.f32.mrf.mxu3 }
0x1417   :  { %v2489_v30 = vadd.f32 %v2488_v53, %v2466_v55 }
0x1419   :  { %v2494_v5 = vadd.f32 %v2489_v30, %v4978_v17 }
0x141b   :  { %v2501_v0 = vsel %vm808_vm10, %v2494_v5, 0.0 }
0x141c   :  { %2502 = vadd.xlane.f32.xlu0 %v2501_v0 }
0x141e   :  { %v2490_v29 = vpop.f32.mrf.mxu3 }
0x142c   :  { %2615 = vrot.lane.b32.xlu2 %v5227_v46, %s4302_s16 }
0x147f   :  { %v2497_v24 = vpop.xlane.xlu1 %2496 }
0x1480   :  { %v2504_v32 = vmul.f32 %v2497_v24, %v4646_v60 }
0x1482   :  { %v2507_v40 = vsub.f32 %v2492_v13, %v2504_v32 }
0x1484   :  { %v2510_v49 = vmul.f32 %v2507_v40, %v2507_v40 }
0x1486   :  { %v2513_v17 = vsel %vm154_vm3, %v2510_v49, 0.0 }
0x1487   :  { %v2500_v9 = vpop.xlane.xlu2 %2499  ;;  %2514 = vadd.xlane.f32.xlu1 %v2513_v17 }
0x1488   :  { %v2505_v19 = vmul.f32 %v2500_v9, %v4646_v60 }
0x148a   :  { %v2508_v14 = vsub.f32 %v2493_v6, %v2505_v19 }
0x148c   :  { %v2511_v47 = vmul.f32 %v2508_v14, %v2508_v14 }
0x148e   :  { %v2516_v62 = vsel %vm154_vm3, %v2511_v47, 0.0 }
0x148f   :  { %v2503_v41 = vpop.xlane.xlu0 %2502  ;;  %2517 = vadd.xlane.f32.xlu0 %v2516_v62  ;;  %v2616_v44 = vpop.permute.xlu2 %2615 }
0x1490   :  { %v2506_v28 = vmul.f32 %v2503_v41, %v4646_v60  ;;  %2629 = vmatpush.bf16.msrb.mxu0 %v2616_v44 }
0x1492   :  { %v5239_v26 = vsub.f32 %v2494_v5, %v2506_v28 }
0x1494   :  { %v2512_v48 = vmul.f32 %v5239_v26, %v5239_v26 }
0x1496   :  { %v2519_v35 = vsel %vm808_vm10, %v2512_v48, 0.0 }
0x1497   :  { %2520 = vadd.xlane.f32.xlu0 %v2519_v35 }
0x14a0   :  { %2613 = vrot.lane.b32.xlu1 %v5232_v38, %s4302_s16 }
0x14ab   :  { %2620 = vrot.lane.b32.xlu0 %v5250_v22, %s4302_s16 }
0x14fa   :  { %v2515_v43 = vpop.xlane.xlu1 %2514 }
0x14fb   :  { %v2522_v33 = vmul.f32 %v2515_v43, %v4646_v60 }
0x14fd   :  { %v2525_v45 = vadd.f32 1e-05, %v2522_v33 }
0x14ff   :  { %4201 = vrsqrt.f32 %v2525_v45  ;;  %vm2534_vm4 = vweird.f32 %v2525_v45 }
0x1502   :  { %v2518_v34 = vpop.xlane.xlu0 %2517 }
0x1503   :  { %v2523_v15 = vmul.f32 %v2518_v34, %v4646_v60 }
0x1505   :  { %v4202_v58 = vpop.eup %4201  ;;  %v2526_v51 = vadd.f32 1e-05, %v2523_v15 }
0x1506   :  { %v2529_v8 = vmul.f32 %v4202_v58, %v2525_v45  ;;  %vm2535_vm0 = vweird.f32 %v4202_v58 }
0x1507   :  { %4203 = vrsqrt.f32 %v2526_v51  ;;  %vm2536_vm6 = vmor %vm2534_vm4, %vm2535_vm0  ;;  %vm2544_vm1 = vweird.f32 %v2526_v51 }
0x1508   :  { %v2530_v31 = vmul.f32 %v4202_v58, %v2529_v8 }
0x150a   :  { %v2531_v42 = vmul.f32 0.5, %v2530_v31  ;;  %v2521_v27 = vpop.xlane.xlu0 %2520 }
0x150b   :  { %v2524_v61 = vmul.f32 %v2521_v27, %v4646_v60 }
0x150c   :  { %v2532_v3 = vsub.f32 1.5, %v2531_v42 }
0x150d   :  { %v4204_v52 = vpop.eup %4203  ;;  %v2527_v37 = vadd.f32 1e-05, %v2524_v61 }
0x150e   :  { %v2533_v50 = vmul.f32 %v4202_v58, %v2532_v3  ;;  %v2539_v63 = vmul.f32 %v4204_v52, %v2526_v51  ;;  %vm2545_vm7 = vweird.f32 %v4204_v52 }
0x150f   :  { %4205 = vrsqrt.f32 %v2527_v37  ;;  %vm2546_vm2 = vmor %vm2544_vm1, %vm2545_vm7  ;;  %vm2554_vm13 = vweird.f32 %v2527_v37 }
0x1510   :  { %v2540_v23 = vmul.f32 %v4204_v52, %v2539_v63  ;;  %v2537_v39 = vsel %vm2536_vm6, %v4202_v58, %v2533_v50 }
0x1511   :  { %v2558_v55 = vmul.f32 %v2537_v39, %v2507_v40 }
0x1512   :  { %v2541_v4 = vmul.f32 0.5, %v2540_v23  ;;  %v2614_v10 = vpop.permute.xlu1 %2613 }
0x1513   :  { %2630 = vmatpush.bf16.msrb.mxu0 %v2614_v10  ;;  %v2562_v59 = vmul.f32 %v2561_v56, %v2558_v55 }
0x1514   :  { %v2542_v7 = vsub.f32 1.5, %v2541_v4 }
0x1515   :  { %v4206_v36 = vpop.eup %4205  ;;  %v5265_v5 = vadd.f32 %v2565_v12, %v2562_v59 }
0x1516   :  { %v2543_v2 = vmul.f32 %v4204_v52, %v2542_v7  ;;  %v2549_v25 = vmul.f32 %v4206_v36, %v2527_v37  ;;  %3763 = vmatmul.msk.bf16.vlgmr.msrb.gmra.mxu0 %vm154_vm3, %v4664_v18  ;;  %vm2555_vm12 = vweird.f32 %v4206_v36 }
0x1517   :  { %vm2556_vm15 = vmor %vm2554_vm13, %vm2555_vm12 }
0x1518   :  { %v2547_v13 = vsel %vm2546_vm2, %v4204_v52, %v2543_v2  ;;  %v2550_v57 = vmul.f32 %v4206_v36, %v2549_v25 }
0x1519   :  { %v2559_v6 = vmul.f32 %v2547_v13, %v2508_v14 }
0x151a   :  { %v2551_v21 = vmul.f32 0.5, %v2550_v57 }
0x151b   :  { %v2563_v53 = vmul.f32 %v2561_v56, %v2559_v6 }
0x151c   :  { %v2552_v30 = vsub.f32 1.5, %v2551_v21 }
0x151d   :  { %v5267_v0 = vadd.f32 %v2565_v12, %v2563_v53  ;;  %v2621_v9 = vpop.permute.xlu0 %2620 }
0x151e   :  { %v2553_v29 = vmul.f32 %v4206_v36, %v2552_v30 }
0x151f   :  { %v2574_v18 = vpack.c.bf16 %v5267_v0, %v5265_v5 }
0x1520   :  { %v2557_v24 = vsel %vm2556_vm15, %v4206_v36, %v2553_v29 }
0x1521   :  { %3761 = vmatmul.msk.bf16.vlgmr.msra.gmra.mxu1 %vm154_vm3, %v2574_v18  ;;  %v2560_v32 = vmul.f32 %v2557_v24, %v5239_v26 }
0x1523   :  { %v2564_v40 = vmul.f32 %v2561_v56, %v2560_v32 }
0x1525   :  { %v5275_v49 = vadd.f32 %v2565_v12, %v2564_v40 }
0x1526   :  { %3764 = vmatmul.msk.bf16.gmra.mxu0 %vm154_vm3, %v4671_v20 }
0x1527   :  { %v2575_v17 = vpack.c.bf16 %v5275_v49, %v5275_v49 }
0x1531   :  { %3762 = vmatmul.msk.bf16.gmra.mxu1 %vm154_vm3, %v2575_v17 }
0x1593   :  { %v2632_v19 = vpop.f32.mrf.mxu0 }
0x1594   :  { %v5280_v14 = vadd.f32 %v2632_v19, %v2621_v9 }
0x1596   :  { %2774 = vrot.lane.b32.xlu1 %v5280_v14, %s4304_s24 }
0x159b   :  { %v2634_v47 = vpop.f32.mrf.mxu0 }
0x159c   :  { %v2635_v41 = vadd.f32 %v2634_v47, %v2621_v9 }
0x159e   :  { %v2604_v62 = vpop.f32.mrf.mxu1  ;;  %2907 = vrot.lane.b32.xlu1 %v5280_v14, %s4308_s28 }
0x159f   :  { %v2605_v45 = vadd.f32 %v5250_v22, %v2604_v62 }
0x15a3   :  { %v2637_v20 = vpop.f32.mrf.mxu0 }
0x15a4   :  { %v2638_v28 = vadd.f32 %v2637_v20, %v2621_v9 }
0x15a6   :  { %v2606_v26 = vpop.f32.mrf.mxu1  ;;  %2911 = vrot.lane.b32.xlu0 %v2638_v28, %s4308_s28  ;;  %2778 = vrot.lane.b32.xlu2 %v2638_v28, %s4304_s24  ;;  %v5288_v48 = vpack.i.bf16 %v2635_v41, %v2638_v28 }
0x15a7   :  { %v2607_v35 = vadd.f32 %v5250_v22, %v2606_v26  ;;  %3765 = vmatpush.xpose.msk.msrb.mxu2 %vm188_vm5, %v2638_v28 }
0x15a9   :  { %2770 = vrot.lane.b32.xlu1 %v2607_v35, %s4304_s24 }
0x15ab   :  { %3766 = vmatpush.xpose.msk.msrb.mxu2 %vm188_vm5, %v2635_v41  ;;  %v2639_v44 = vpop.f32.mrf.mxu0 }
0x15ae   :  { %v2609_v43 = vpop.f32.mrf.mxu1  ;;  %2909 = vrot.lane.b32.xlu0 %v2635_v41, %s4308_s28  ;;  %2776 = vrot.lane.b32.xlu2 %v2635_v41, %s4304_s24 }
0x15af   :  { %v5297_v33 = vadd.f32 %v5250_v22, %v2609_v43  ;;  %3767 = vmatpush.xpose.msk.msrb.mxu2 %vm188_vm5, %v5280_v14 }
0x15b1   :  { %2772 = vrot.lane.b32.xlu1 %v5297_v33, %s4304_s24 }
0x15b2   :  { %3768 = vmatmul.msk.f32.vlgmr.msrb.gmra.mxu2 %vm188_vm5, %v2605_v45 }
0x15b6   :  { %v2611_v34 = vpop.f32.mrf.mxu1  ;;  %2768 = vrot.lane.b32.xlu2 %v2605_v45, %s4304_s24  ;;  %3040 = vrot.lane.b32.xlu0 %v5280_v14, %s4307_s4 }
0x15b9   :  { %3034 = vrot.lane.b32.xlu1 %v2605_v45, %s4307_s4 }
0x15ba   :  { %3769 = vmatmul.msk.f32.gmra.mxu2 %vm188_vm5, %v2607_v35 }
0x15be   :  { %3044 = vrot.lane.b32.xlu2 %v2638_v28, %s4307_s4  ;;  %2903 = vrot.lane.b32.xlu0 %v2607_v35, %s4308_s28 }
0x15c1   :  { %3994 = vrot.lane.b32.xlu1 %v5288_v48, %s4302_s16 }
0x15c2   :  { %3770 = vmatmul.msk.f32.gmra.mxu2 %vm188_vm5, %v5297_v33 }
0x15c6   :  { %3042 = vrot.lane.b32.xlu2 %v2635_v41, %s4307_s4  ;;  %3999 = vrot.lane.b32.xlu0 %v5288_v48, %s4303_s17 }
0x15c9   :  { %2857 = vrot.lane.b32.xlu1 %v5280_v14, %s4303_s17 }
0x15ce   :  { %2901 = vrot.lane.b32.xlu2 %v2605_v45, %s4308_s28 }
0x15d6   :  { %3036 = vrot.lane.b32.xlu2 %v2607_v35, %s4307_s4 }
0x15de   :  { %2724 = vrot.lane.b32.xlu2 %v5280_v14, %s4302_s16 }
0x1600   :  { %v2779_v15 = vpop.permute.xlu2 %2778 }
0x1601   :  { %3774 = vmatpush.xpose.msk.msrb.mxu1 %vm188_vm5, %v2779_v15 }
0x1608   :  { %v2777_v58 = vpop.permute.xlu2 %2776  ;;  %v2775_v51 = vpop.permute.xlu1 %2774 }
0x1609   :  { %3775 = vmatpush.xpose.msk.msrb.mxu1 %vm188_vm5, %v2777_v58 }
0x160d   :  { %3776 = vmatpush.xpose.msk.msrb.mxu1 %vm188_vm5, %v2775_v51 }
0x1610   :  { %v2769_v8 = vpop.permute.xlu2 %2768  ;;  %v2908_v31 = vpop.permute.xlu1 %2907 }
0x1611   :  { %3777 = vmatmul.msk.f32.vlgmr.msrb.gmra.mxu1 %vm188_vm5, %v2769_v8 }
0x1618   :  { %v2912_v42 = vpop.permute.xlu0 %2911  ;;  %v3045_v27 = vpop.permute.xlu2 %3044 }
0x1619   :  { %3783 = vmatpush.xpose.msk.msra.mxu0 %vm188_vm5, %v2912_v42  ;;  %3792 = vmatpush.xpose.msk.msra.mxu1 %vm188_vm5, %v3045_v27 }
0x161b   :  { %v2771_v61 = vpop.permute.xlu1 %2770 }
0x161c   :  { %3778 = vmatmul.msk.f32.gmra.mxu1 %vm188_vm5, %v2771_v61 }
0x1620   :  { %v2910_v3 = vpop.permute.xlu0 %2909  ;;  %v3043_v52 = vpop.permute.xlu2 %3042 }
0x1621   :  { %3784 = vmatpush.xpose.msk.msra.mxu0 %vm188_vm5, %v2910_v3  ;;  %3793 = vmatpush.xpose.msk.msra.mxu1 %vm188_vm5, %v3043_v52 }
0x1623   :  { %v2773_v37 = vpop.permute.xlu1 %2772 }
0x1624   :  { %3779 = vmatmul.msk.f32.gmra.mxu1 %vm188_vm5, %v2773_v37 }
0x1625   :  { %3785 = vmatpush.xpose.msk.msra.mxu0 %vm188_vm5, %v2908_v31 }
0x1628   :  { %v2902_v50 = vpop.permute.xlu2 %2901  ;;  %v3041_v63 = vpop.permute.xlu0 %3040 }
0x1629   :  { %3786 = vmatmul.msk.f32.vlgmr.msra.gmra.mxu0 %vm188_vm5, %v2902_v50  ;;  %3794 = vmatpush.xpose.msk.msra.mxu1 %vm188_vm5, %v3041_v63 }
0x162b   :  { %v3035_v23 = vpop.permute.xlu1 %3034 }
0x162c   :  { %3795 = vmatmul.msk.f32.vlgmr.msra.gmra.mxu1 %vm188_vm5, %v3035_v23 }
0x1630   :  { %v3037_v39 = vpop.permute.xlu2 %3036  ;;  %v2904_v4 = vpop.permute.xlu0 %2903 }
0x1631   :  { %3787 = vmatmul.msk.f32.gmra.mxu0 %vm188_vm5, %v2904_v4 }
0x1633   :  { %v3995_v10 = vpop.permute.xlu1 %3994 }
0x1634   :  { %v3996_v7 = vunpack.i.l.bf16 %v3995_v10  ;;  %3796 = vmatmul.msk.f32.gmra.mxu1 %vm188_vm5, %v3037_v39  ;;  %v3997_v56 = vunpack.i.h.bf16 %v3995_v10 }
0x1635   :  { %v2676_v36 = vpop.f32.mrf.mxu2 }
0x1636   :  { %v2685_v55 = vmul.f32 0.35355338, %v2676_v36  ;;  %2755 = vmatpush.msrb.mxu3 %v3996_v7 }
0x1638   :  { %v2688_v2 = vadd.f32 %v2685_v55, %v4766_v16  ;;  %v2725_v25 = vpop.permute.xlu2 %2724  ;;  %v4000_v13 = vpop.permute.xlu0 %3999  ;;  %2756 = vmatpush.msrb.mxu3 %v3997_v56 }
0x1639   :  { %v4001_v57 = vunpack.i.l.bf16 %v4000_v13  ;;  %v4002_v59 = vunpack.i.h.bf16 %v4000_v13 }
0x163a   :  { %2757 = vmatpush.msrb.mxu3 %v2725_v25  ;;  %v2691_v12 = vsel %vm759_vm9, %v2688_v2, -inf }
0x163b   :  { %2692 = vmax.xlane.f32.xlu1 %v2691_v12  ;;  %2888 = vmatpush.msra.mxu2 %v4001_v57  ;;  %v2858_v21 = vpop.permute.xlu1 %2857 }
0x163d   :  { %v2679_v6 = vpop.f32.mrf.mxu2  ;;  %2889 = vmatpush.msra.mxu2 %v4002_v59 }
0x163e   :  { %v2686_v53 = vmul.f32 0.35355338, %v2679_v6 }
0x163f   :  { %2890 = vmatpush.msra.mxu2 %v2858_v21 }
0x1640   :  { %v2689_v30 = vadd.f32 %v2686_v53, %v4776_v54 }
0x1642   :  { %v2694_v29 = vsel %vm759_vm9, %v2689_v30, -inf }
0x1643   :  { %2695 = vmax.xlane.f32.xlu2 %v2694_v29 }
0x1645   :  { %v2682_v18 = vpop.f32.mrf.mxu2 }
0x1646   :  { %v2687_v24 = vmul.f32 0.35355338, %v2682_v18 }
0x1648   :  { %v2690_v32 = vadd.f32 %v2687_v24, %v4785_v1 }
0x164a   :  { %v2697_v40 = vsel %vm1020_vm14, %v2690_v32, -inf }
0x164b   :  { %2698 = vmax.xlane.f32.xlu0 %v2697_v40 }
0x168e   :  { %v2809_v17 = vpop.f32.mrf.mxu1 }
0x168f   :  { %v2818_v9 = vmul.f32 0.35355338, %v2809_v17 }
0x1691   :  { %v2821_v19 = vadd.f32 %v2818_v9, %v4766_v16 }
0x1693   :  { %v2824_v47 = vsel %vm759_vm9, %v2821_v19, -inf }
0x1694   :  { %2825 = vmax.xlane.f32.xlu0 %v2824_v47 }
0x1699   :  { %v2812_v62 = vpop.f32.mrf.mxu1 }
0x169a   :  { %v2819_v44 = vmul.f32 0.35355338, %v2812_v62 }
0x169c   :  { %v2822_v45 = vadd.f32 %v2819_v44, %v4776_v54 }
0x169e   :  { %v2827_v27 = vsel %vm759_vm9, %v2822_v45, -inf }
0x16a1   :  { %v2815_v20 = vpop.f32.mrf.mxu1 }
0x16a2   :  { %v2820_v61 = vmul.f32 0.35355338, %v2815_v20 }
0x16a4   :  { %v2823_v50 = vadd.f32 %v2820_v61, %v4785_v1 }
0x16a6   :  { %v2942_v41 = vpop.f32.mrf.mxu0  ;;  %v2830_v56 = vsel %vm1020_vm14, %v2823_v50, -inf }
0x16a7   :  { %v2951_v28 = vmul.f32 0.35355338, %v2942_v41 }
0x16a9   :  { %v2954_v26 = vadd.f32 %v2951_v28, %v4766_v16  ;;  %v3075_v35 = vpop.f32.mrf.mxu1 }
0x16aa   :  { %v3084_v10 = vmul.f32 0.35355338, %v3075_v35 }
0x16ab   :  { %v2957_v43 = vsel %vm759_vm9, %v2954_v26, -inf }
0x16ac   :  { %2958 = vmax.xlane.f32.xlu1 %v2957_v43  ;;  %v3087_v55 = vadd.f32 %v3084_v10, %v4766_v16 }
0x16ae   :  { %v2693_v34 = vpop.xlane.xlu1 %2692  ;;  %v2945_v15 = vpop.f32.mrf.mxu0  ;;  %v3090_v57 = vsel %vm759_vm9, %v3087_v55, -inf }
0x16af   :  { %v2700_v58 = vsub.f32 %v2688_v2, %v2693_v34  ;;  %v2952_v51 = vmul.f32 0.35355338, %v2945_v15 }
0x16b1   :  { %v2703_v8 = vmul.f32 1.442695, %v2700_v58  ;;  %v2955_v31 = vadd.f32 %v2952_v51, %v4776_v54  ;;  %v3078_v42 = vpop.f32.mrf.mxu1 }
0x16b2   :  { %v3085_v3 = vmul.f32 0.35355338, %v3078_v42 }
0x16b3   :  { %4207 = vpow2.f32 %v2703_v8  ;;  %v2960_v52 = vsel %vm759_vm9, %v2955_v31, -inf }
0x16b4   :  { %2828 = vmax.xlane.f32.xlu1 %v2827_v27  ;;  %2961 = vmax.xlane.f32.xlu2 %v2960_v52  ;;  %v3088_v63 = vadd.f32 %v3085_v3, %v4776_v54 }
0x16b6   :  { %v2696_v37 = vpop.xlane.xlu2 %2695  ;;  %v3093_v36 = vsel %vm759_vm9, %v3088_v63, -inf }
0x16b7   :  { %v2701_v23 = vsub.f32 %v2689_v30, %v2696_v37 }
0x16b9   :  { %v4208_v39 = vpop.eup %4207  ;;  %v2705_v4 = vmul.f32 1.442695, %v2701_v23 }
0x16ba   :  { %v2709_v7 = vsel %vm759_vm9, %v4208_v39, 0.0 }
0x16bb   :  { %4209 = vpow2.f32 %v2705_v4  ;;  %2710 = vadd.xlane.f32.xlu0 %v2709_v7 }
0x16bc   :  { %3094 = vmax.xlane.f32.xlu1 %v3093_v36  ;;  %2831 = vmax.xlane.f32.xlu2 %v2830_v56 }
0x16be   :  { %v2699_v2 = vpop.xlane.xlu0 %2698 }
0x16bf   :  { %v2702_v25 = vsub.f32 %v2690_v32, %v2699_v2 }
0x16c1   :  { %v5361_v13 = vpop.eup %4209  ;;  %v2707_v54 = vmul.f32 1.442695, %v2702_v25 }
0x16c2   :  { %v2712_v12 = vsel %vm759_vm9, %v5361_v13, 0.0 }
0x16c3   :  { %4211 = vpow2.f32 %v2707_v54  ;;  %3091 = vmax.xlane.f32.xlu0 %v3090_v57 }
0x16c4   :  { %2713 = vadd.xlane.f32.xlu2 %v2712_v12 }
0x16c9   :  { %v5366_v59 = vpop.eup %4211 }
0x16ca   :  { %v2715_v6 = vsel %vm1020_vm14, %v5366_v59, 0.0 }
0x16cb   :  { %2716 = vadd.xlane.f32.xlu1 %v2715_v6 }
0x16dc   :  { %4009 = vrot.lane.b32.xlu2 %v5288_v48, %s4305_s25 }
0x16e4   :  { %4004 = vrot.lane.b32.xlu1 %v5288_v48, %s4306_s27 }
0x1707   :  { %v2826_v16 = vpop.xlane.xlu0 %2825 }
0x1708   :  { %v2833_v21 = vsub.f32 %v2821_v19, %v2826_v16 }
0x170a   :  { %v2836_v53 = vmul.f32 1.442695, %v2833_v21 }
0x170c   :  { %4213 = vpow2.f32 %v2836_v53 }
0x1712   :  { %v5374_v30 = vpop.eup %4213 }
0x1713   :  { %v2842_v29 = vsel %vm759_vm9, %v5374_v30, 0.0 }
0x1714   :  { %2843 = vadd.xlane.f32.xlu2 %v2842_v29 }
0x171f   :  { %v2959_v18 = vpop.xlane.xlu1 %2958 }
0x1720   :  { %v2966_v24 = vsub.f32 %v2954_v26, %v2959_v18 }
0x1722   :  { %v2969_v32 = vmul.f32 1.442695, %v2966_v24 }
0x1724   :  { %4215 = vpow2.f32 %v2969_v32 }
0x1727   :  { %v2829_v40 = vpop.xlane.xlu1 %2828  ;;  %v2962_v17 = vpop.xlane.xlu2 %2961 }
0x1728   :  { %v2834_v9 = vsub.f32 %v2822_v45, %v2829_v40  ;;  %v2967_v62 = vsub.f32 %v2955_v31, %v2962_v17 }
0x172a   :  { %v5378_v47 = vpop.eup %4215  ;;  %v2838_v48 = vmul.f32 1.442695, %v2834_v9  ;;  %v2971_v20 = vmul.f32 1.442695, %v2967_v62 }
0x172b   :  { %v2975_v19 = vsel %vm759_vm9, %v5378_v47, 0.0 }
0x172c   :  { %4217 = vpow2.f32 %v2838_v48  ;;  %2976 = vadd.xlane.f32.xlu0 %v2975_v19 }
0x172e   :  { %v2711_v41 = vpop.xlane.xlu0 %2710 }
0x172f   :  { %4219 = vrcp.f32 %v2711_v41  ;;  %v3095_v28 = vpop.xlane.xlu1 %3094  ;;  %v2832_v35 = vpop.xlane.xlu2 %2831 }
0x1730   :  { %v3100_v26 = vsub.f32 %v3088_v63, %v3095_v28  ;;  %v2835_v44 = vsub.f32 %v2823_v50, %v2832_v35  ;;  %4221 = vpow2.f32 %v2971_v20 }
0x1732   :  { %v4218_v43 = vpop.eup %4217  ;;  %v3104_v34 = vmul.f32 1.442695, %v3100_v26  ;;  %v2840_v45 = vmul.f32 1.442695, %v2835_v44 }
0x1733   :  { %v2845_v15 = vsel %vm759_vm9, %v4218_v43, 0.0 }
0x1734   :  { %4223 = vpow2.f32 %v3104_v34  ;;  %2846 = vadd.xlane.f32.xlu0 %v2845_v15 }
0x1735   :  { %v4220_v58 = vpop.eup %4219  ;;  %4225 = vpow2.f32 %v2840_v45 }
0x1736   :  { %v2721_v51 = vmul.f32 %v4220_v58, %v4208_v39  ;;  %v3092_v8 = vpop.xlane.xlu0 %3091  ;;  %v5383_v27 = vpop.eup %4221 }
0x1737   :  { %v3099_v31 = vsub.f32 %v3087_v55, %v3092_v8  ;;  %v2714_v42 = vpop.xlane.xlu2 %2713  ;;  %v2978_v37 = vsel %vm759_vm9, %v5383_v27, 0.0 }
0x1738   :  { %4227 = vrcp.f32 %v2714_v42  ;;  %3771 = vmatmul.msk.f32.vlgmr.msrb.gmra.mxu3 %vm759_vm9, %v2721_v51 }
0x1739   :  { %v3102_v61 = vmul.f32 1.442695, %v3099_v31 }
0x173a   :  { %v5386_v3 = vpop.eup %4223 }
0x173b   :  { %v4226_v52 = vpop.eup %4225  ;;  %4229 = vpow2.f32 %v3102_v61  ;;  %v3111_v50 = vsel %vm759_vm9, %v5386_v3, 0.0 }
0x173c   :  { %2979 = vadd.xlane.f32.xlu0 %v2978_v37  ;;  %3112 = vadd.xlane.f32.xlu1 %v3111_v50  ;;  %v2848_v63 = vsel %vm1020_vm14, %v4226_v52, 0.0 }
0x173d   :  { %2849 = vadd.xlane.f32.xlu2 %v2848_v63 }
0x173e   :  { %v4228_v23 = vpop.eup %4227  ;;  %v2717_v39 = vpop.xlane.xlu1 %2716 }
0x173f   :  { %4231 = vrcp.f32 %v2717_v39  ;;  %v4010_v4 = vpop.permute.xlu2 %4009  ;;  %v2722_v10 = vmul.f32 %v4228_v23, %v5361_v13 }
0x1740   :  { %v4011_v7 = vunpack.i.l.bf16 %v4010_v4  ;;  %v4012_v56 = vunpack.i.h.bf16 %v4010_v4 }
0x1741   :  { %v4230_v36 = vpop.eup %4229  ;;  %3772 = vmatmul.msk.f32.gmra.mxu3 %vm759_vm9, %v2722_v10 }
0x1742   :  { %3154 = vmatpush.msrb.mxu2 %v4011_v7  ;;  %v3108_v55 = vsel %vm759_vm9, %v4230_v36, 0.0 }
0x1744   :  { %3155 = vmatpush.msrb.mxu2 %v4012_v56  ;;  %3109 = vadd.xlane.f32.xlu0 %v3108_v55 }
0x1745   :  { %v4232_v2 = vpop.eup %4231 }
0x1746   :  { %v2723_v25 = vmul.f32 %v4232_v2, %v5366_v59 }
0x1749   :  { %3773 = vmatmul.msk.f32.gmra.mxu3 %vm759_vm9, %v2723_v25 }
0x1755   :  { %3123 = vrot.lane.b32.xlu2 %v5280_v14, %s4305_s25 }
0x1756   :  { %v4005_v54 = vpop.permute.xlu1 %4004 }
0x1757   :  { %v4006_v13 = vunpack.i.l.bf16 %v4005_v54  ;;  %v4007_v57 = vunpack.i.h.bf16 %v4005_v54 }
0x1758   :  { %2990 = vrot.lane.b32.xlu0 %v5280_v14, %s4306_s27 }
0x1759   :  { %3021 = vmatpush.msra.mxu3 %v4006_v13 }
0x175b   :  { %3022 = vmatpush.msra.mxu3 %v4007_v57 }
0x175d   :  { %3038 = vrot.lane.b32.xlu2 %v5297_v33, %s4307_s4 }
0x1760   :  { %2905 = vrot.lane.b32.xlu0 %v5297_v33, %s4308_s28 }
0x1768   :  { %3216 = vrot.lane.b32.xlu0 %v5227_v46, %s4312_s8 }
0x1787   :  { %v2844_v12 = vpop.xlane.xlu2 %2843 }
0x1788   :  { %4233 = vrcp.f32 %v2844_v12 }
0x178e   :  { %v4234_v59 = vpop.eup %4233 }
0x178f   :  { %v2854_v6 = vmul.f32 %v4234_v59, %v5374_v30 }
0x1791   :  { %3780 = vmatmul.msk.f32.vlgmr.msra.gmra.mxu2 %vm759_vm9, %v2854_v6 }
0x179f   :  { %v2977_v14 = vpop.xlane.xlu0 %2976 }
0x17a7   :  { %v2847_v16 = vpop.xlane.xlu0 %2846 }
0x17a8   :  { %4235 = vrcp.f32 %v2847_v16 }
0x17ae   :  { %v4236_v21 = vpop.eup %4235 }
0x17af   :  { %v2980_v53 = vpop.xlane.xlu0 %2979  ;;  %v2855_v29 = vmul.f32 %v4236_v21, %v4218_v43  ;;  %v3113_v30 = vpop.xlane.xlu1 %3112 }
0x17b0   :  { %v2850_v18 = vpop.xlane.xlu2 %2849 }
0x17b1   :  { %4237 = vrcp.f32 %v2850_v18  ;;  %3781 = vmatmul.msk.f32.gmra.mxu2 %vm759_vm9, %v2855_v29 }
0x17b7   :  { %v4238_v33 = vpop.eup %4237  ;;  %v3110_v24 = vpop.xlane.xlu0 %3109 }
0x17b8   :  { %v3124_v46 = vpop.permute.xlu2 %3123  ;;  %4239 = vrcp.f32 %v3110_v24  ;;  %v2856_v32 = vmul.f32 %v4238_v33, %v4226_v52 }
0x17b9   :  { %3156 = vmatpush.msrb.mxu2 %v3124_v46  ;;  %4241 = vrcp.f32 %v3113_v30 }
0x17ba   :  { %3782 = vmatmul.msk.f32.gmra.mxu2 %vm759_vm9, %v2856_v32  ;;  %4243 = vrcp.f32 %v2977_v14 }
0x17bb   :  { %4245 = vrcp.f32 %v2980_v53  ;;  %v2759_v34 = vpop.f32.mrf.mxu3 }
0x17be   :  { %v4240_v40 = vpop.eup %4239 }
0x17bf   :  { %v3120_v17 = vmul.f32 %v4240_v40, %v4230_v36  ;;  %v4242_v48 = vpop.eup %4241 }
0x17c0   :  { %v3039_v9 = vpop.permute.xlu2 %3038  ;;  %v4244_v62 = vpop.eup %4243  ;;  %v3121_v19 = vmul.f32 %v4242_v48, %v5386_v3 }
0x17c1   :  { %3797 = vmatmul.msk.f32.gmra.mxu1 %vm188_vm5, %v3039_v9  ;;  %v2987_v20 = vmul.f32 %v4244_v62, %v5378_v47  ;;  %v4246_v28 = vpop.eup %4245 }
0x17c2   :  { %3798 = vmatmul.msk.f32.vlgmr.msrb.gmra.mxu2 %vm759_vm9, %v3120_v17  ;;  %v2988_v26 = vmul.f32 %v4246_v28, %v5383_v27 }
0x17c4   :  { %v2762_v47 = vpop.f32.mrf.mxu3 }
0x17ca   :  { %3799 = vmatmul.msk.f32.gmra.mxu2 %vm759_vm9, %v3121_v19  ;;  %v2991_v41 = vpop.permute.xlu0 %2990 }
0x17cb   :  { %3023 = vmatpush.msra.mxu3 %v2991_v41 }
0x17cc   :  { %3789 = vmatmul.msk.f32.vlgmr.msra.gmra.mxu3 %vm759_vm9, %v2987_v20  ;;  %v5426_v27 = vpop.f32.mrf.mxu3 }
0x17d2   :  { %v2906_v35 = vpop.permute.xlu0 %2905 }
0x17d3   :  { %3788 = vmatmul.msk.f32.gmra.mxu0 %vm188_vm5, %v2906_v35 }
0x17d4   :  { %3790 = vmatmul.msk.f32.gmra.mxu3 %vm759_vm9, %v2988_v26 }
0x17da   :  { %v3217_v10 = vpop.permute.xlu0 %3216 }
0x17db   :  { %3235 = vmatpush.bf16.msrb.mxu0 %v3217_v10 }
0x1814   :  { %v2892_v44 = vpop.f32.mrf.mxu2 }
0x1834   :  { %v2895_v43 = vpop.f32.mrf.mxu2 }
0x1835   :  { %v4013_v45 = vpack.i.bf16 %v2895_v43, %v2892_v44 }
0x1837   :  { %4014 = vrot.lane.b32.xlu2 %v4013_v45, %s4313_s9 }
0x183d   :  { %v5422_v15 = vpop.f32.mrf.mxu2 }
0x183e   :  { %v3081_v58 = vpop.f32.mrf.mxu1 }
0x183f   :  { %v3086_v51 = vmul.f32 0.35355338, %v3081_v58 }
0x1841   :  { %v3089_v8 = vadd.f32 %v3086_v51, %v4785_v1 }
0x1843   :  { %v3096_v31 = vsel %vm1020_vm14, %v3089_v8, -inf }
0x1844   :  { %3097 = vmax.xlane.f32.xlu1 %v3096_v31 }
0x1845   :  { %v3158_v42 = vpop.f32.mrf.mxu2 }
0x184d   :  { %v3161_v61 = vpop.f32.mrf.mxu2 }
0x184e   :  { %v4023_v3 = vpack.i.bf16 %v3161_v61, %v3158_v42 }
0x184f   :  { %v3025_v52 = vpop.f32.mrf.mxu3 }
0x1850   :  { %4024 = vrot.lane.b32.xlu2 %v4023_v3, %s4315_s11  ;;  %v2948_v63 = vpop.f32.mrf.mxu0 }
0x1851   :  { %v2953_v23 = vmul.f32 0.35355338, %v2948_v63 }
0x1853   :  { %v2956_v39 = vadd.f32 %v2953_v23, %v4785_v1 }
0x1855   :  { %v2963_v4 = vsel %vm1020_vm14, %v2956_v39, -inf }
0x1857   :  { %v3028_v37 = vpop.f32.mrf.mxu3 }
0x1858   :  { %v4018_v50 = vpack.i.bf16 %v3028_v37, %v3025_v52 }
0x185a   :  { %4019 = vrot.lane.b32.xlu0 %v4018_v50, %s4314_s10  ;;  %v3859_v50 = vld [vmem:[#allocation2 + $0x88] sm:$0xff] }
0x185b   :  { %3365 = vmatpush.bf16.msrb.mxu3 %v3859_v50 }
0x1862   :  { %3214 = vrot.lane.b32.xlu0 %v5232_v38, %s4312_s8 }
0x186a   :  { %3220 = vrot.lane.b32.xlu0 %v5250_v22, %s4312_s8 }
0x1879   :  { %2964 = vmax.xlane.f32.xlu2 %v2963_v4 }
0x1891   :  { %v4015_v7 = vpop.permute.xlu2 %4014 }
0x1892   :  { %v4017_v36 = vunpack.i.h.bf16 %v4015_v7  ;;  %v4016_v56 = vunpack.i.l.bf16 %v4015_v7 }
0x1894   :  { %v3204_v38 = vsel %vm188_vm5, %v2762_v47, %v4017_v36  ;;  %v3203_v22 = vsel %vm188_vm5, %v2759_v34, %v4016_v56 }
0x18aa   :  { %v4025_v54 = vpop.permute.xlu2 %4024 }
0x18ab   :  { %v4027_v57 = vunpack.i.h.bf16 %v4025_v54  ;;  %v4026_v12 = vunpack.i.l.bf16 %v4025_v54 }
0x18b7   :  { %v3098_v40 = vpop.xlane.xlu1 %3097 }
0x18b8   :  { %v3101_v48 = vsub.f32 %v3089_v8, %v3098_v40  ;;  %v3862_v40 = vld [vmem:[#allocation2 + $0xc0] sm:$0xff] }
0x18ba   :  { %v3106_v19 = vmul.f32 1.442695, %v3101_v48 }
0x18cc   :  { %v4020_v55 = vpop.permute.xlu0 %4019 }
0x18cd   :  { %v4022_v2 = vunpack.i.h.bf16 %v4020_v55  ;;  %v4021_v25 = vunpack.i.l.bf16 %v4020_v55 }
0x18cf   :  { %v3207_v13 = vsel %vm755_vm8, %v3204_v38, %v4022_v2  ;;  %v3206_v1 = vsel %vm755_vm8, %v3203_v22, %v4021_v25 }
0x18d0   :  { %v3210_v59 = vsel %vm759_vm9, %v3207_v13, %v4027_v57  ;;  %v3209_v6 = vsel %vm759_vm9, %v3206_v1, %v4026_v12  ;;  %v5464_v12 = vperm.slane %v5259_v11, 2 }
0x18d1   :  { %v3212_v16 = vpack.c.bf16 %v3210_v59, %v3209_v6 }
0x18d4   :  { %v3215_v14 = vpop.permute.xlu0 %3214 }
0x18d5   :  { %3236 = vmatpush.bf16.msrb.mxu0 %v3215_v14 }
0x18d8   :  { %3801 = vmatmul.msk.bf16.vlgmr.msrb.gmra.mxu0 %vm154_vm3, %v3212_v16  ;;  %v5467_v16 = vperm.slane %v5259_v11, 3  ;;  %v3863_v11 = vld [vmem:[#allocation2 + $0xc8] sm:$0xff] }
0x18d9   :  { %3417 = vmatpush.bf16.msrb.mxu1 %v3863_v11 }
0x18dc   :  { %v5443_v21 = vpop.permute.xlu0 %3220 }
0x18dd   :  { %3418 = vmatpush.bf16.msrb.mxu1 %v3862_v40  ;;  %v3865_v40 = vld [vmem:[#allocation2 + $0xd8] sm:$0xff] }
0x18de   :  { %3511 = vmatpush.bf16.msra.mxu2 %v3865_v40 }
0x18ec   :  { %v2965_v29 = vpop.xlane.xlu2 %2964 }
0x18ed   :  { %v2968_v24 = vsub.f32 %v2956_v39, %v2965_v29  ;;  %v3858_v39 = vld [vmem:[#allocation2 + $0x80] sm:$0xff] }
0x18ee   :  { %3366 = vmatpush.bf16.msrb.mxu3 %v3858_v39 }
0x18ef   :  { %v2973_v32 = vmul.f32 1.442695, %v2968_v24 }
0x18f1   :  { %4247 = vpow2.f32 %v2973_v32 }
0x18f2   :  { %4249 = vpow2.f32 %v3106_v19 }
0x18f7   :  { %v4248_v20 = vpop.eup %4247 }
0x18f8   :  { %v4250_v41 = vpop.eup %4249 }
0x18f9   :  { %v3114_v28 = vsel %vm1020_vm14, %v4250_v41, 0.0 }
0x1955   :  { %v3238_v53 = vpop.f32.mrf.mxu0 }
0x1956   :  { %v3239_v18 = vadd.f32 %v3238_v53, %v5443_v21 }
0x1958   :  { %v3247_v33 = vadd.f32 %v3239_v18, %v5265_v5  ;;  %v2981_v5 = vsel %vm1020_vm14, %v4248_v20, 0.0 }
0x195a   :  { %v3250_v46 = vsel %vm154_vm3, %v3247_v33, 0.0 }
0x195b   :  { %3251 = vadd.xlane.f32.xlu0 %v3250_v46 }
0x195d   :  { %v3240_v30 = vpop.f32.mrf.mxu0 }
0x195e   :  { %v3241_v17 = vadd.f32 %v3240_v30, %v5443_v21 }
0x1960   :  { %v3248_v9 = vadd.f32 %v3241_v17, %v5267_v0  ;;  %v3861_v17 = vld [vmem:[#allocation2 + $0xb8] sm:$0xff] }
0x1961   :  { %3419 = vmatpush.bf16.msrb.mxu1 %v3861_v17 }
0x1962   :  { %v3253_v62 = vsel %vm154_vm3, %v3248_v9, 0.0 }
0x1963   :  { %3254 = vadd.xlane.f32.xlu1 %v3253_v62 }
0x196b   :  { %2982 = vadd.xlane.f32.xlu1 %v2981_v5 }
0x1973   :  { %3115 = vadd.xlane.f32.xlu1 %v3114_v28 }
0x19ce   :  { %v3252_v35 = vpop.xlane.xlu0 %3251 }
0x19cf   :  { %v3259_v26 = vmul.f32 %v3252_v35, %v4646_v60 }
0x19d1   :  { %v3262_v44 = vsub.f32 %v3247_v33, %v3259_v26  ;;  %v5484_v26 = vld [vmem:[%s5535_s5 + $0x21] ss:$0 sm:$0xff] }
0x19d3   :  { %v3265_v0 = vmul.f32 %v3262_v44, %v3262_v44 }
0x19d5   :  { %v3268_v43 = vsel %vm154_vm3, %v3265_v0, 0.0 }
0x19d6   :  { %v3255_v34 = vpop.xlane.xlu1 %3254  ;;  %3269 = vadd.xlane.f32.xlu1 %v3268_v43 }
0x19d7   :  { %v3260_v45 = vmul.f32 %v3255_v34, %v4646_v60 }
0x19d9   :  { %v3263_v47 = vsub.f32 %v3248_v9, %v3260_v45  ;;  %v3860_v9 = vld [vmem:[#allocation2 + $0xb0] sm:$0xff] }
0x19da   :  { %3420 = vmatpush.bf16.msrb.mxu1 %v3860_v9 }
0x19db   :  { %v3266_v58 = vmul.f32 %v3263_v47, %v3263_v47 }
0x19dd   :  { %v3271_v51 = vsel %vm154_vm3, %v3266_v58, 0.0 }
0x19de   :  { %3272 = vadd.xlane.f32.xlu2 %v3271_v51  ;;  %v2983_v8 = vpop.xlane.xlu1 %2982 }
0x19df   :  { %4251 = vrcp.f32 %v2983_v8 }
0x19e5   :  { %v4252_v31 = vpop.eup %4251 }
0x19e6   :  { %v3116_v42 = vpop.xlane.xlu1 %3115  ;;  %v2989_v61 = vmul.f32 %v4252_v31, %v4248_v20 }
0x19e7   :  { %4253 = vrcp.f32 %v3116_v42  ;;  %v4035_v42 = vld [vmem:[%s5535_s5 + $0x29] ss:$0 sm:$0xff] }
0x19e8   :  { %3791 = vmatmul.msk.f32.gmra.mxu3 %vm759_vm9, %v2989_v61 }
0x19ed   :  { %v4254_v3 = vpop.eup %4253 }
0x19ee   :  { %v3122_v52 = vmul.f32 %v4254_v3, %v4250_v41 }
0x19ef   :  { %3174 = vrot.lane.b32.xlu1 %v5422_v15, %s4313_s9 }
0x19f0   :  { %3800 = vmatmul.msk.f32.gmra.mxu2 %vm759_vm9, %v3122_v52 }
0x1a49   :  { %v3270_v37 = vpop.xlane.xlu1 %3269 }
0x1a4a   :  { %v3277_v63 = vmul.f32 %v3270_v37, %v4646_v60 }
0x1a4c   :  { %v3280_v23 = vadd.f32 1e-05, %v3277_v63 }
0x1a4e   :  { %4255 = vrsqrt.f32 %v3280_v23  ;;  %vm3289_vm0 = vweird.f32 %v3280_v23 }
0x1a51   :  { %v3273_v4 = vpop.xlane.xlu2 %3272 }
0x1a52   :  { %v3278_v10 = vmul.f32 %v3273_v4, %v4646_v60 }
0x1a54   :  { %v4256_v7 = vpop.eup %4255  ;;  %v3281_v36 = vadd.f32 1e-05, %v3278_v10 }
0x1a55   :  { %v3284_v56 = vmul.f32 %v4256_v7, %v3280_v23  ;;  %vm3290_vm14 = vweird.f32 %v4256_v7 }
0x1a56   :  { %4257 = vrsqrt.f32 %v3281_v36  ;;  %vm3291_vm4 = vmor %vm3289_vm0, %vm3290_vm14  ;;  %vm3299_vm7 = vweird.f32 %v3281_v36 }
0x1a57   :  { %v3285_v55 = vmul.f32 %v4256_v7, %v3284_v56 }
0x1a59   :  { %v3286_v15 = vmul.f32 0.5, %v3285_v55 }
0x1a5b   :  { %v3287_v2 = vsub.f32 1.5, %v3286_v15 }
0x1a5c   :  { %v4258_v25 = vpop.eup %4257 }
0x1a5d   :  { %v3288_v54 = vmul.f32 %v4256_v7, %v3287_v2  ;;  %v3294_v38 = vmul.f32 %v4258_v25, %v3281_v36  ;;  %vm3300_vm6 = vweird.f32 %v4258_v25 }
0x1a5e   :  { %vm3301_vm1 = vmor %vm3299_vm7, %vm3300_vm6  ;;  %vm5538_vm6 = vcmask 1041408   ;;  %vm3521_vm7 = vcmask 1040384  }
0x1a5f   :  { %v3295_v22 = vmul.f32 %v4258_v25, %v3294_v38  ;;  %v3292_v13 = vsel %vm3291_vm4, %v4256_v7, %v3288_v54 }
0x1a60   :  { %v3313_v59 = vmul.f32 %v3292_v13, %v3262_v44 }
0x1a61   :  { %v3296_v1 = vmul.f32 0.5, %v3295_v22  ;;  %v3175_v48 = vpop.permute.xlu1 %3174 }
0x1a62   :  { %v3317_v53 = vmul.f32 %v5464_v12, %v3313_v59  ;;  %v3205_v19 = vsel %vm188_vm5, %v5426_v27, %v3175_v48  ;;  %v3864_v48 = vld [vmem:[#allocation2 + $0xd0] sm:$0xff] }
0x1a63   :  { %v3297_v57 = vsub.f32 1.5, %v3296_v1  ;;  %3512 = vmatpush.bf16.msra.mxu2 %v3864_v48 }
0x1a64   :  { %v3321_v24 = vadd.f32 %v5467_v16, %v3317_v53 }
0x1a65   :  { %v3298_v6 = vmul.f32 %v4258_v25, %v3297_v57 }
0x1a67   :  { %v3302_v14 = vsel %vm3301_vm1, %v4258_v25, %v3298_v6 }
0x1a68   :  { %v3314_v29 = vmul.f32 %v3302_v14, %v3263_v47 }
0x1a6a   :  { %v3318_v18 = vmul.f32 %v5464_v12, %v3314_v29 }
0x1a6b   :  { %v3031_v33 = vpop.f32.mrf.mxu3 }
0x1a6c   :  { %v3322_v46 = vadd.f32 %v5467_v16, %v3318_v18  ;;  %3186 = vrot.lane.b32.xlu2 %v3031_v33, %s4314_s10 }
0x1a6e   :  { %v3338_v32 = vpack.c.bf16 %v3322_v46, %v3321_v24 }
0x1a70   :  { %3811 = vmatmul.msk.bf16.vlgmr.msrb.gmra.mxu3 %vm154_vm3, %v3338_v32 }
0x1a73   :  { %v3164_v30 = vpop.f32.mrf.mxu2 }
0x1a74   :  { %3198 = vrot.lane.b32.xlu0 %v3164_v30, %s4315_s11 }
0x1ac6   :  { %v3187_v62 = vpop.permute.xlu2 %3186 }
0x1ac7   :  { %v3208_v20 = vsel %vm755_vm8, %v3205_v19, %v3187_v62 }
0x1ae6   :  { %v3199_v5 = vpop.permute.xlu0 %3198 }
0x1ae7   :  { %v3211_v41 = vsel %vm759_vm9, %v3208_v20, %v3199_v5  ;;  %v3529_v20 = vld [vmem:[%s5533_s3] sm:$0x3] }
0x1ae8   :  { %v3213_v28 = vpack.c.bf16 %v3211_v41, %v3211_v41 }
0x1aea   :  { %3802 = vmatmul.msk.bf16.gmra.mxu0 %vm154_vm3, %v3213_v28 }
0x1af3   :  { %v3368_v35 = vpop.f32.mrf.mxu3 }
0x1af4   :  { %v3369_v44 = vadd.f32 %v5484_v26, %v3368_v35 }
0x1af6   :  { %v3377_v27 = vmax.f32 %v3369_v44, 0.0 }
0x1afb   :  { %v3370_v0 = vpop.f32.mrf.mxu3 }
0x1afc   :  { %v3371_v43 = vadd.f32 %v5484_v26, %v3370_v0 }
0x1afe   :  { %v3378_v34 = vmax.f32 %v3371_v43, 0.0 }
0x1b00   :  { %v3380_v45 = vpack.c.bf16 %v3378_v34, %v3377_v27 }
0x1b02   :  { %3829 = vmatmul.msk.bf16.vlgmr.msrb.gmra.mxu1 %vm1731_vm11, %v3380_v45 }
0x1b67   :  { %v3243_v47 = vpop.f32.mrf.mxu0 }
0x1b68   :  { %v3244_v58 = vadd.f32 %v3243_v47, %v5443_v21 }
0x1b6a   :  { %v3249_v51 = vadd.f32 %v3244_v58, %v5275_v49 }
0x1b6c   :  { %v3256_v8 = vsel %vm808_vm10, %v3249_v51, 0.0 }
0x1b6d   :  { %3257 = vadd.xlane.f32.xlu1 %v3256_v8 }
0x1b6f   :  { %v3245_v31 = vpop.f32.mrf.mxu0 }
0x1b7f   :  { %v3422_v61 = vpop.f32.mrf.mxu1 }
0x1b80   :  { %v3423_v3 = vadd.f32 %v4035_v42, %v3422_v61 }
0x1b82   :  { %v3430_v52 = vadd.f32 %v3423_v3, %v3321_v24 }
0x1b84   :  { %v3432_v37 = vsel %vm154_vm3, %v3430_v52, 0.0 }
0x1b85   :  { %3433 = vadd.xlane.f32.xlu2 %v3432_v37 }
0x1b87   :  { %v3424_v50 = vpop.f32.mrf.mxu1 }
0x1b88   :  { %v3425_v63 = vadd.f32 %v4035_v42, %v3424_v50 }
0x1b8a   :  { %v3431_v23 = vadd.f32 %v3425_v63, %v3322_v46 }
0x1b8c   :  { %v3435_v21 = vsel %vm154_vm3, %v3431_v23, 0.0 }
0x1b8d   :  { %3436 = vadd.xlane.f32.xlu0 %v3435_v21 }
0x1be0   :  { %v3258_v49 = vpop.xlane.xlu1 %3257 }
0x1be1   :  { %v3261_v39 = vmul.f32 %v3258_v49, %v4646_v60 }
0x1be3   :  { %v3264_v4 = vsub.f32 %v3249_v51, %v3261_v39 }
0x1be5   :  { %v3267_v10 = vmul.f32 %v3264_v4, %v3264_v4 }
0x1be7   :  { %v3274_v7 = vsel %vm808_vm10, %v3267_v10, 0.0 }
0x1be8   :  { %3275 = vadd.xlane.f32.xlu2 %v3274_v7 }
0x1bf8   :  { %v3434_v36 = vpop.xlane.xlu2 %3433 }
0x1bf9   :  { %v3438_v56 = vmul.f32 %v3434_v36, %v4646_v60  ;;  %v4036_v36 = vld [vmem:[%s5535_s5 + $0x40] ss:$0 sm:$0xff] }
0x1bfb   :  { %v3440_v55 = vsub.f32 %v3430_v52, %v3438_v56 }
0x1bfd   :  { %v3442_v15 = vmul.f32 %v3440_v55, %v3440_v55 }
0x1bff   :  { %v3444_v2 = vsel %vm154_vm3, %v3442_v15, 0.0 }
0x1c00   :  { %3445 = vadd.xlane.f32.xlu1 %v3444_v2  ;;  %v3437_v25 = vpop.xlane.xlu0 %3436  ;;  %3531 = vrot.lane.b32.xlu2 %v3529_v20, %s4313_s9 }
0x1c01   :  { %v3439_v54 = vmul.f32 %v3437_v25, %v4646_v60 }
0x1c03   :  { %v3441_v38 = vsub.f32 %v3431_v23, %v3439_v54 }
0x1c05   :  { %v3443_v22 = vmul.f32 %v3441_v38, %v3441_v38 }
0x1c07   :  { %v3447_v13 = vsel %vm154_vm3, %v3443_v22, 0.0 }
0x1c08   :  { %3448 = vadd.xlane.f32.xlu0 %v3447_v13 }
0x1c5b   :  { %v3276_v1 = vpop.xlane.xlu2 %3275 }
0x1c5c   :  { %v3279_v57 = vmul.f32 %v3276_v1, %v4646_v60 }
0x1c5e   :  { %v3282_v59 = vadd.f32 1e-05, %v3279_v57 }
0x1c60   :  { %4259 = vrsqrt.f32 %v3282_v59  ;;  %vm3309_vm10 = vweird.f32 %v3282_v59 }
0x1c66   :  { %v4260_v6 = vpop.eup %4259 }
0x1c67   :  { %v3304_v14 = vmul.f32 %v4260_v6, %v3282_v59  ;;  %vm3310_vm9 = vweird.f32 %v4260_v6 }
0x1c68   :  { %vm3311_vm2 = vmor %vm3309_vm10, %vm3310_vm9 }
0x1c69   :  { %v3305_v53 = vmul.f32 %v4260_v6, %v3304_v14 }
0x1c6b   :  { %v3306_v29 = vmul.f32 0.5, %v3305_v53 }
0x1c6d   :  { %v3307_v18 = vsub.f32 1.5, %v3306_v29 }
0x1c6f   :  { %v3308_v33 = vmul.f32 %v4260_v6, %v3307_v18 }
0x1c71   :  { %v3312_v24 = vsel %vm3311_vm2, %v4260_v6, %v3308_v33 }
0x1c72   :  { %v3315_v46 = vmul.f32 %v3312_v24, %v3264_v4 }
0x1c73   :  { %v3446_v32 = vpop.xlane.xlu1 %3445 }
0x1c74   :  { %v3450_v30 = vmul.f32 %v3446_v32, %v4646_v60  ;;  %v3319_v11 = vmul.f32 %v5464_v12, %v3315_v46 }
0x1c76   :  { %v3452_v17 = vadd.f32 1e-05, %v3450_v30  ;;  %v3323_v9 = vadd.f32 %v5467_v16, %v3319_v11 }
0x1c78   :  { %4261 = vrsqrt.f32 %v3452_v17  ;;  %v3339_v62 = vpack.c.bf16 %v3323_v9, %v3323_v9  ;;  %vm3460_vm13 = vweird.f32 %v3452_v17 }
0x1c7a   :  { %3812 = vmatmul.msk.bf16.gmra.mxu3 %vm154_vm3, %v3339_v62 }
0x1c7b   :  { %v3449_v19 = vpop.xlane.xlu0 %3448 }
0x1c7c   :  { %v3451_v5 = vmul.f32 %v3449_v19, %v4646_v60  ;;  %v4271_v60 = vld [vmem:[%s5535_s5 + $0x38] sm:$0x3f] }
0x1c7d   :  { %v3476_v51 = vperm.slane %v4271_v60, 4  ;;  %v3479_v61 = vperm.slane %v4271_v60, 5 }
0x1c7e   :  { %v4262_v12 = vpop.eup %4261  ;;  %v3453_v41 = vadd.f32 1e-05, %v3451_v5 }
0x1c7f   :  { %v3455_v28 = vmul.f32 %v4262_v12, %v3452_v17  ;;  %vm3461_vm12 = vweird.f32 %v4262_v12 }
0x1c80   :  { %4263 = vrsqrt.f32 %v3453_v41  ;;  %vm3462_vm15 = vmor %vm3460_vm13, %vm3461_vm12  ;;  %vm3470_vm0 = vweird.f32 %v3453_v41 }
0x1c81   :  { %v3456_v16 = vmul.f32 %v4262_v12, %v3455_v28 }
0x1c83   :  { %v3457_v35 = vmul.f32 0.5, %v3456_v16 }
0x1c85   :  { %v3458_v44 = vsub.f32 1.5, %v3457_v35 }
0x1c86   :  { %v4264_v0 = vpop.eup %4263 }
0x1c87   :  { %v3459_v43 = vmul.f32 %v4262_v12, %v3458_v44  ;;  %v3465_v27 = vmul.f32 %v4264_v0, %v3453_v41  ;;  %vm3471_vm14 = vweird.f32 %v4264_v0 }
0x1c88   :  { %vm3472_vm4 = vmor %vm3470_vm0, %vm3471_vm14 }
0x1c89   :  { %v3466_v34 = vmul.f32 %v4264_v0, %v3465_v27  ;;  %v3463_v45 = vsel %vm3462_vm15, %v4262_v12, %v3459_v43 }
0x1c8a   :  { %v3474_v8 = vmul.f32 %v3463_v45, %v3440_v55 }
0x1c8b   :  { %v3467_v47 = vmul.f32 0.5, %v3466_v34 }
0x1c8c   :  { %v3477_v3 = vmul.f32 %v3476_v51, %v3474_v8 }
0x1c8d   :  { %v3468_v58 = vsub.f32 1.5, %v3467_v47 }
0x1c8e   :  { %v3480_v50 = vadd.f32 %v3479_v61, %v3477_v3 }
0x1c8f   :  { %v3469_v31 = vmul.f32 %v4264_v0, %v3468_v58 }
0x1c91   :  { %v3473_v42 = vsel %vm3472_vm4, %v4264_v0, %v3469_v31 }
0x1c92   :  { %v3475_v52 = vmul.f32 %v3473_v42, %v3441_v38 }
0x1c94   :  { %v3478_v37 = vmul.f32 %v3476_v51, %v3475_v52 }
0x1c96   :  { %v3481_v63 = vadd.f32 %v3479_v61, %v3478_v37 }
0x1c98   :  { %v3487_v23 = vsel %vm5538_vm6, %v3480_v50, %v3481_v63 }
0x1c99   :  { %v3488_v21 = vpack.c.bf16 %v3487_v23, %v3487_v23 }
0x1c9b   :  { %3839 = vmatmul.msk.bf16.vlgmr.msra.gmra.mxu2 %vm154_vm3, %v3488_v21  ;;  %vm3546_vm3 = vcmask 189440  }
0x1cfd   :  { %v3373_v49 = vpop.f32.mrf.mxu3 }
0x1cfe   :  { %v3374_v39 = vadd.f32 %v5484_v26, %v3373_v49  ;;  %v3532_v26 = vpop.permute.xlu2 %3531 }
0x1d00   :  { %v3379_v4 = vmax.f32 %v3374_v39, 0.0 }
0x1d02   :  { %v3381_v10 = vpack.c.bf16 %v3379_v4, %v3379_v4 }
0x1d04   :  { %3830 = vmatmul.msk.bf16.gmra.mxu1 %vm1731_vm11, %v3381_v10 }
0x1d05   :  { %v3375_v7 = vpop.f32.mrf.mxu3 }
0x1d1e   :  { %v3514_v56 = vpop.f32.mrf.mxu2 }
0x1d1f   :  { %v3515_v55 = vadd.f32 %v4036_v36, %v3514_v56 }
0x1d21   :  { %v3519_v15 = vrot.slane %v3515_v55, 1  ;;  %v3523_v2 = vrot.slane %v3515_v55, 2 }
0x1d23   :  { %v3525_v25 = vsel %vm3521_vm7, %v3519_v15, %v3523_v2  ;;  %v3522_v54 = vsel %vm3521_vm7, %v3515_v55, %v3519_v15 }
0x1d24   :  { %v3526_v38 = vmul.f32 0.5, %v3525_v25  ;;  %v3544_v29 = vsel %vm188_vm5, %v3522_v54, %v3525_v25 }
0x1d26   :  { %v3516_v22 = vpop.f32.mrf.mxu2  ;;  %v3527_v13 = vmul.f32 1.442695, %v3526_v38 }
0x1d28   :  { %4265 = vpow2.f32 %v3527_v13 }
0x1d2e   :  { %v4266_v1 = vpop.eup %4265 }
0x1d2f   :  { %v3534_v57 = vmul.f32 %v4266_v1, %v3532_v26 }
0x1d31   :  { %3536 = vrot.lane.b32.xlu1 %v3534_v57, %s4304_s24 }
0x1d81   :  { %v3427_v59 = vpop.f32.mrf.mxu1 }
0x1d89   :  { %v3428_v6 = vpop.f32.mrf.mxu1 }
0x1da3   :  { %v3537_v14 = vpop.permute.xlu1 %3536 }
0x1da4   :  { %v3539_v53 = vadd.f32 %v3537_v14, %v3522_v54 }
0x1da6   :  { %3541 = vrot.lane.b32.xlu0 %v3539_v53, %s4314_s10 }
0x1e18   :  { %v3542_v18 = vpop.permute.xlu0 %3541 }
0x1e19   :  { %v3545_v33 = vsel %vm755_vm8, %v3544_v29, %v3542_v18 }
0x1e1a   :  { %3547 = vst.msk [vmem:[%s5536_s6] sm:$0x3] %vm3546_vm3, %v3545_v33 }
0x1e1b   :  { %3552 = vsyncpa [#allocation3], 1 }

</bundles_post_ra>
